<compile_context>
chip_gen: v5e
topology: v5e:2x2
jax: 0.10.0
libtpu: 0.0.40
codegen_flags: <defaults>
</compile_context>

<pallas_src>
import jax
import jax.numpy as jnp
from jax import lax
from jax.experimental import pallas as pl
from jax.experimental.pallas import tpu as pltpu


# ----------------------------------------------------------------------------
# Fused VAE forward kernel.
# ----------------------------------------------------------------------------
def _vae_kernel(x_ref, eps_ref,
                e_wi_ref, e_wh_ref, e_bi_ref, e_bhn_ref,     # encoder GRU
                wml_ref, bml_ref,                             # fused mu|logvar head
                d_wi_ref, d_wh_ref, d_bi_ref, d_bhn_ref,     # decoder GRU
                wout_ref, bout_ref,                           # decoder readout
                enc_out_ref, mu_ref, lv_ref, z_ref, recon_ref,
                gi_scr, dech_scr):
    f32 = jnp.float32
    cdt = e_wh_ref.dtype                    # MXU operand dtype (f32 or bf16)
    T, Bp, Dp = x_ref.shape
    Hp = e_wh_ref.shape[0]
    Lp = d_wh_ref.shape[0]
    T_out = recon_ref.shape[0]

    # ---------- Encoder prologue: input projection for ALL timesteps as one
    # (T*Bp, Dp) @ (Dp, 3*Hp) matmul; only the h @ W_hh path stays in the loop.
    # e_bi already contains the folded r/z hidden biases (exact).
    x_all = x_ref[...].reshape(T * Bp, Dp).astype(cdt)
    gi_scr[...] = (jnp.dot(x_all, e_wi_ref[...], preferred_element_type=f32)
                   + e_bi_ref[...]).reshape(T, Bp, 3 * Hp)

    # Hoisted bias broadcast (n-gate hidden bias must stay inside r*(...)).
    e_bhn = jnp.broadcast_to(e_bhn_ref[...], (Bp, Hp))

    def enc_step(t, h):
        gh = jnp.dot(h.astype(cdt), e_wh_ref[...], preferred_element_type=f32)
        gi = gi_scr[t]
        r = jax.nn.sigmoid(gi[:, :Hp] + gh[:, :Hp])
        zg = jax.nn.sigmoid(gi[:, Hp:2 * Hp] + gh[:, Hp:2 * Hp])
        n = jnp.tanh(gi[:, 2 * Hp:] + r * (gh[:, 2 * Hp:] + e_bhn))
        h_new = (1.0 - zg) * n + zg * h
        enc_out_ref[t] = h_new               # lane-dense (Bp, Hp) store
        return h_new

    c_t = lax.fori_loop(0, T, enc_step, jnp.zeros((Bp, Hp), f32),
                        unroll=min(8, T))

    # ---------- Latent head: mu and logvar fused into ONE (Hp, 2*Lp) matmul.
    mulv = (jnp.dot(c_t.astype(cdt), wml_ref[...], preferred_element_type=f32)
            + bml_ref[...])
    mu = mulv[:, :Lp]
    lv = mulv[:, Lp:]
    z = mu + eps_ref[...] * jnp.exp(0.5 * lv)
    mu_ref[...] = mu
    lv_ref[...] = lv
    z_ref[...] = z

    # ---------- Decoder: input is x[:, 0, :] every step, so its input
    # projection is loop-invariant — one (Bp, Dp) @ (Dp, 3*Lp) matmul.
    x0 = x_ref[0].astype(cdt)
    dgi = jnp.dot(x0, d_wi_ref[...], preferred_element_type=f32) + d_bi_ref[...]
    dgi_r = dgi[:, :Lp]
    dgi_z = dgi[:, Lp:2 * Lp]
    dgi_n = dgi[:, 2 * Lp:]
    d_bhn = jnp.broadcast_to(d_bhn_ref[...], (Bp, Lp))

    def dec_step(t, h):
        gh = jnp.dot(h.astype(cdt), d_wh_ref[...], preferred_element_type=f32)
        r = jax.nn.sigmoid(dgi_r + gh[:, :Lp])
        zg = jax.nn.sigmoid(dgi_z + gh[:, Lp:2 * Lp])
        n = jnp.tanh(dgi_n + r * (gh[:, 2 * Lp:] + d_bhn))
        h_new = (1.0 - zg) * n + zg * h
        dech_scr[t] = h_new                   # accumulate hiddens in VMEM
        return h_new

    lax.fori_loop(0, T_out, dec_step, z, unroll=min(8, T_out))

    # ---------- Readout: one batched matmul + one lane-dense slab store. ----
    h_all = dech_scr[...].reshape(T_out * Bp, Lp).astype(cdt)
    recon = (jnp.dot(h_all, wout_ref[...], preferred_element_type=f32)
             + bout_ref[...])
    recon_ref[...] = recon.reshape(T_out, Bp, Dp)


# ----------------------------------------------------------------------------
# Host-side packing: PyTorch-layout GRU params -> gate-concatenated, padded
# matrices (gate order r, z, n along the lane axis).
# ----------------------------------------------------------------------------
def _round_up(n, m):
    return ((n + m - 1) // m) * m


def _pad_2d(a, rows, cols):
    a = jnp.asarray(a, jnp.float32)
    return jnp.pad(a, ((0, rows - a.shape[0]), (0, cols - a.shape[1])))


def _pack_gru(w_ih, w_hh, b_ih, b_hh, in_p, h_p, weight_dtype):
    """Returns:
      wi  : (in_p, 3*h_p)  input->gates weight (r|z|n), cast to weight_dtype
      wh  : (h_p, 3*h_p)   hidden->gates weight (r|z|n), cast to weight_dtype
      bi  : (1, 3*h_p)     input bias with r/z HIDDEN biases folded in (exact)
      bhn : (1, h_p)       n-gate hidden bias (must stay inside r*(...)) """
    H = w_hh.shape[1]
    g = lambda a, i: a[i * H:(i + 1) * H]
    wi = jnp.concatenate([_pad_2d(g(w_ih, i).T, in_p, h_p) for i in range(3)], axis=1)
    wh = jnp.concatenate([_pad_2d(g(w_hh, i).T, h_p, h_p) for i in range(3)], axis=1)
    bi = jnp.concatenate(
        [_pad_2d((g(b_ih, i) + (g(b_hh, i) if i < 2 else 0.0)).reshape(1, H), 1, h_p)
         for i in range(3)], axis=1)
    bhn = _pad_2d(g(b_hh, 2).reshape(1, H), 1, h_p)
    return wi.astype(weight_dtype), wh.astype(weight_dtype), bi, bhn


def _nbytes(a):
    n = 1
    for d in a.shape:
        n *= int(d)
    return n * jnp.dtype(a.dtype).itemsize


def vae_autoencoder_forward(params, x, eps, out_len=None,
                            weight_dtype=jnp.float32):
    """Matches VAEAutoencoder.forward (is_vae=True, bottleneck_size=-1)."""
    B, T, D = x.shape
    H = params["enc_w_hh"].shape[1]
    L = params["dec_w_hh"].shape[1]
    T_out = T if out_len is None else out_len

    Bp = _round_up(max(B, 8), 8)
    Dp = _round_up(max(D, 128), 128)
    Hp = _round_up(max(H, 128), 128)
    Lp = _round_up(max(L, 128), 128)

    # Time-major, padded input (zero padding is exact: padded hidden lanes stay
    # zero through the GRU recurrence and padded batch rows are sliced away).
    x_tbd = jnp.transpose(x.astype(jnp.float32), (1, 0, 2))
    x_p = jnp.pad(x_tbd, ((0, 0), (0, Bp - B), (0, Dp - D)))
    eps_p = jnp.pad(eps.astype(jnp.float32), ((0, Bp - B), (0, Lp - L)))

    e_wi, e_wh, e_bi, e_bhn = _pack_gru(
        params["enc_w_ih"], params["enc_w_hh"],
        params["enc_b_ih"], params["enc_b_hh"], Dp, Hp, weight_dtype)
    d_wi, d_wh, d_bi, d_bhn = _pack_gru(
        params["dec_w_ih"], params["dec_w_hh"],
        params["dec_b_ih"], params["dec_b_hh"], Dp, Lp, weight_dtype)
    # Fused mu|logvar head.
    w_ml = jnp.concatenate([_pad_2d(params["w_mu"].T, Hp, Lp),
                            _pad_2d(params["w_lv"].T, Hp, Lp)],
                           axis=1).astype(weight_dtype)
    b_ml = jnp.concatenate([_pad_2d(params["b_mu"].reshape(1, L), 1, Lp),
                            _pad_2d(params["b_lv"].reshape(1, L), 1, Lp)], axis=1)
    w_out = _pad_2d(params["dec_w_out"].T, Lp, Dp).astype(weight_dtype)
    b_out = _pad_2d(params["dec_b_out"].reshape(1, D), 1, Dp)

    operands = (x_p, eps_p,
                e_wi, e_wh, e_bi, e_bhn,
                w_ml, b_ml,
                d_wi, d_wh, d_bi, d_bhn,
                w_out, b_out)
    out_shapes = (
        jax.ShapeDtypeStruct((T, Bp, Hp), jnp.float32),      # encoder hiddens
        jax.ShapeDtypeStruct((Bp, Lp), jnp.float32),         # mu
        jax.ShapeDtypeStruct((Bp, Lp), jnp.float32),         # logvar
        jax.ShapeDtypeStruct((Bp, Lp), jnp.float32),         # z
        jax.ShapeDtypeStruct((T_out, Bp, Dp), jnp.float32),  # reconstruction
    )
    scratch_shapes = [
        pltpu.VMEM((T, Bp, 3 * Hp), jnp.float32),    # fused encoder gi (r|z|n)
        pltpu.VMEM((T_out, Bp, Lp), jnp.float32),    # decoder hidden states
    ]

    # Explicit VMEM limit sized to actual residency (with headroom), capped at
    # 64 MiB so the same setting is valid on v5e/v6e (128 MiB) and v7x (64 MiB).
    scratch_bytes = (T * Bp * 3 * Hp + T_out * Bp * Lp) * 4
    resident = (sum(_nbytes(a) for a in operands)
                + sum(_nbytes(s) for s in out_shapes) + scratch_bytes)
    vmem_limit = min(max(2 * resident + (8 << 20), 16 << 20), 64 << 20)

    enc_out, mu, lv, z, recon = pl.pallas_call(
        _vae_kernel,
        out_shape=out_shapes,
        scratch_shapes=scratch_shapes,
        compiler_params=pltpu.CompilerParams(vmem_limit_bytes=vmem_limit),
    )(*operands)

    # TODO(synk): at real sizes emit batch-major outputs from the kernel to
    # avoid these HBM transposes (kept here — trivial at toy shapes).
    encoder_out = jnp.transpose(enc_out, (1, 0, 2))[:B, :, :H]
    recon_x = jnp.transpose(recon, (1, 0, 2))[:B, :, :D]
    mu = mu[:B, :L]
    logvar = lv[:B, :L]
    z = z[:B, :L]
    if recon_x.shape[1] == 1:     # torch .squeeze(1) only drops size-1 dims
        recon_x = jnp.squeeze(recon_x, axis=1)
    return recon_x, encoder_out, mu, logvar, z


# ----------------------------------------------------------------------------
# Pure-JAX reference (for correctness checking only).
# ----------------------------------------------------------------------------
def _reference_forward(params, x, eps, out_len=None):
    B, T, D = x.shape
    T_out = T if out_len is None else out_len

    def gru(x_seq, h0, w_ih, w_hh, b_ih, b_hh):
        Hh = w_hh.shape[1]

        def step(h, x_t):
            gi = x_t @ w_ih.T + b_ih
            gh = h @ w_hh.T + b_hh
            r = jax.nn.sigmoid(gi[:, :Hh] + gh[:, :Hh])
            zg = jax.nn.sigmoid(gi[:, Hh:2 * Hh] + gh[:, Hh:2 * Hh])
            n = jnp.tanh(gi[:, 2 * Hh:] + r * gh[:, 2 * Hh:])
            h_new = (1.0 - zg) * n + zg * h
            return h_new, h_new

        h_fin, hs = lax.scan(step, h0, jnp.transpose(x_seq, (1, 0, 2)))
        return jnp.transpose(hs, (1, 0, 2)), h_fin

    H = params["enc_w_hh"].shape[1]
    enc_out, c_t = gru(x, jnp.zeros((B, H), jnp.float32),
                       params["enc_w_ih"], params["enc_w_hh"],
                       params["enc_b_ih"], params["enc_b_hh"])
    mu = c_t @ params["w_mu"].T + params["b_mu"]
    lv = c_t @ params["w_lv"].T + params["b_lv"]
    z = mu + eps * jnp.exp(0.5 * lv)
    x_rep = jnp.repeat(x[:, :1, :], T_out, axis=1)
    dec_hs, _ = gru(x_rep, z, params["dec_w_ih"], params["dec_w_hh"],
                    params["dec_b_ih"], params["dec_b_hh"])
    recon = dec_hs @ params["dec_w_out"].T + params["dec_b_out"]
    if recon.shape[1] == 1:
        recon = jnp.squeeze(recon, axis=1)
    return recon, enc_out, mu, lv, z


# ----------------------------------------------------------------------------
# Parameter initialization (PyTorch GRU/Linear layout; gate order r, z, n).
# ----------------------------------------------------------------------------
def init_params(key, D, enc_h, lat_h):
    ks = jax.random.split(key, 14)
    s = 0.1
    f32 = jnp.float32
    return {
        "enc_w_ih": s * jax.random.normal(ks[0], (3 * enc_h, D), f32),
        "enc_w_hh": s * jax.random.normal(ks[1], (3 * enc_h, enc_h), f32),
        "enc_b_ih": s * jax.random.normal(ks[2], (3 * enc_h,), f32),
        "enc_b_hh": s * jax.random.normal(ks[3], (3 * enc_h,), f32),
        "w_mu": s * jax.random.normal(ks[4], (lat_h, enc_h), f32),
        "b_mu": s * jax.random.normal(ks[5], (lat_h,), f32),
        "w_lv": s * jax.random.normal(ks[6], (lat_h, enc_h), f32),
        "b_lv": s * jax.random.normal(ks[7], (lat_h,), f32),
        "dec_w_ih": s * jax.random.normal(ks[8], (3 * lat_h, D), f32),
        "dec_w_hh": s * jax.random.normal(ks[9], (3 * lat_h, lat_h), f32),
        "dec_b_ih": s * jax.random.normal(ks[10], (3 * lat_h,), f32),
        "dec_b_hh": s * jax.random.normal(ks[11], (3 * lat_h,), f32),
        "dec_w_out": s * jax.random.normal(ks[12], (D, lat_h), f32),
        "dec_b_out": s * jax.random.normal(ks[13], (D,), f32),
    }


if __name__ == "__main__":
    B, T, D = 2, 8, 4         # batch, seq_len, features
    ENC_H, LAT_H = 32, 16     # encoder hidden size, VAE latent hidden size

    key = jax.random.PRNGKey(0)
    k_x, k_eps, k_p = jax.random.split(key, 3)
    x = jax.random.normal(k_x, (B, T, D), jnp.float32)
    eps = jax.random.normal(k_eps, (B, LAT_H), jnp.float32)   # reparam noise
    params = init_params(k_p, D, ENC_H, LAT_H)

    r_recon, r_enc, r_mu, r_lv, r_z = _reference_forward(params, x, eps)

    def check(outs, tol):
        recon_x, encoder_out, mu, logvar, z = outs
        assert recon_x.shape == (B, T, D)
        assert encoder_out.shape == (B, T, ENC_H)
        assert mu.shape == (B, LAT_H) and logvar.shape == (B, LAT_H)
        assert z.shape == (B, LAT_H)
        for got, ref in ((recon_x, r_recon), (encoder_out, r_enc),
                         (mu, r_mu), (logvar, r_lv), (z, r_z)):
            err = float(jnp.max(jnp.abs(got - ref)))
            assert err < tol, f"max abs error {err} (tol {tol})"

    # 1) f32 weights: exact structural check against the pure-JAX reference.
    fwd_f32 = jax.jit(
        lambda p, xx, ee: vae_autoencoder_forward(p, xx, ee,
                                                  weight_dtype=jnp.float32))
    outs_f32 = fwd_f32(params, x, eps)
    jax.block_until_ready(outs_f32)
    check(outs_f32, 1e-4)

    # 2) bf16 weights (v6e/v7x MXU-native path); looser tolerance per review.
    fwd_bf16 = jax.jit(
        lambda p, xx, ee: vae_autoencoder_forward(p, xx, ee,
                                                  weight_dtype=jnp.bfloat16))
    outs_bf16 = fwd_bf16(params, x, eps)
    jax.block_until_ready(outs_bf16)
    check(outs_bf16, 5e-2)

    print("KERNEL_OK")
</pallas_src>

<mosaic_0001>
module attributes {stable_mosaic.version = 11 : i64} {
  func.func @_vae_kernel(%arg0: memref<8x8x128xf32, #tpu.memory_space<vmem>>, %arg1: memref<8x128xf32, #tpu.memory_space<vmem>>, %arg2: memref<128x384xf32, #tpu.memory_space<vmem>>, %arg3: memref<128x384xf32, #tpu.memory_space<vmem>>, %arg4: memref<1x384xf32, #tpu.memory_space<vmem>>, %arg5: memref<1x128xf32, #tpu.memory_space<vmem>>, %arg6: memref<128x256xf32, #tpu.memory_space<vmem>>, %arg7: memref<1x256xf32, #tpu.memory_space<vmem>>, %arg8: memref<128x384xf32, #tpu.memory_space<vmem>>, %arg9: memref<128x384xf32, #tpu.memory_space<vmem>>, %arg10: memref<1x384xf32, #tpu.memory_space<vmem>>, %arg11: memref<1x128xf32, #tpu.memory_space<vmem>>, %arg12: memref<128x128xf32, #tpu.memory_space<vmem>>, %arg13: memref<1x128xf32, #tpu.memory_space<vmem>>, %arg14: memref<8x8x128xf32, #tpu.memory_space<vmem>>, %arg15: memref<8x128xf32, #tpu.memory_space<vmem>>, %arg16: memref<8x128xf32, #tpu.memory_space<vmem>>, %arg17: memref<8x128xf32, #tpu.memory_space<vmem>>, %arg18: memref<8x8x128xf32, #tpu.memory_space<vmem>>, %arg19: memref<8x8x384xf32, #tpu.memory_space<vmem>>, %arg20: memref<8x8x128xf32, #tpu.memory_space<vmem>>) attributes {dimension_semantics = [], scalar_prefetch = 0 : i64, scratch_operands = 2 : i64, tpu.core_type = #tpu.core_type<tc>} {
    %c0 = arith.constant 0 : index
    %c0_0 = arith.constant 0 : index
    %c0_1 = arith.constant 0 : index
    %0 = vector.load %arg0[%c0, %c0_0, %c0_1] : memref<8x8x128xf32, #tpu.memory_space<vmem>>, vector<8x8x128xf32>
    %1 = vector.shape_cast %0 : vector<8x8x128xf32> to vector<64x128xf32>
    %c0_2 = arith.constant 0 : index
    %c0_3 = arith.constant 0 : index
    %2 = vector.load %arg2[%c0_2, %c0_3] : memref<128x384xf32, #tpu.memory_space<vmem>>, vector<128x384xf32>
    %cst = arith.constant dense<0.000000e+00> : vector<64x384xf32>
    %3 = tpu.matmul %1, %2, %cst {dimension_numbers = #tpu.dot_dimension_numbers<[1], [0], [0], [1], [0, 0, 1, 1], [], []>} : vector<64x128xf32>, vector<128x384xf32>, vector<64x384xf32> -> vector<64x384xf32>
    %c0_4 = arith.constant 0 : index
    %c0_5 = arith.constant 0 : index
    %4 = vector.load %arg4[%c0_4, %c0_5] : memref<1x384xf32, #tpu.memory_space<vmem>>, vector<1x384xf32>
    %5 = vector.broadcast %4 : vector<1x384xf32> to vector<64x384xf32>
    %6 = arith.addf %3, %5 : vector<64x384xf32>
    %7 = vector.shape_cast %6 : vector<64x384xf32> to vector<8x8x384xf32>
    %c0_6 = arith.constant 0 : index
    %c0_7 = arith.constant 0 : index
    %c0_8 = arith.constant 0 : index
    %8 = vector.load %arg19[%c0_6, %c0_7, %c0_8] : memref<8x8x384xf32, #tpu.memory_space<vmem>>, vector<8x8x384xf32>
    tpu.vector_store %arg19[%c0_6, %c0_7, %c0_8], %7 {strides = array<i32>} : memref<8x8x384xf32, #tpu.memory_space<vmem>>, vector<8x8x384xf32>,
    %c0_9 = arith.constant 0 : index
    %c0_10 = arith.constant 0 : index
    %9 = vector.load %arg5[%c0_9, %c0_10] : memref<1x128xf32, #tpu.memory_space<vmem>>, vector<1x128xf32>
    %10 = vector.shape_cast %9 : vector<1x128xf32> to vector<1x128xf32>
    %11 = vector.broadcast %10 : vector<1x128xf32> to vector<8x128xf32>
    %cst_11 = arith.constant 0.000000e+00 : f32
    %12 = vector.broadcast %cst_11 : f32 to vector<8x128xf32>
    %c0_i32 = arith.constant 0 : i32
    %c0_12 = arith.constant 0 : index
    %c0_13 = arith.constant 0 : index
    %13 = vector.load %arg3[%c0_12, %c0_13] : memref<128x384xf32, #tpu.memory_space<vmem>>, vector<128x384xf32>
    %cst_14 = arith.constant dense<0.000000e+00> : vector<8x384xf32>
    %14 = tpu.matmul %12, %13, %cst_14 {dimension_numbers = #tpu.dot_dimension_numbers<[1], [0], [0], [1], [0, 0, 1, 1], [], []>} : vector<8x128xf32>, vector<128x384xf32>, vector<8x384xf32> -> vector<8x384xf32>
    %15 = arith.index_cast %c0_i32 : i32 to index
    %c0_15 = arith.constant 0 : index
    %c0_16 = arith.constant 0 : index
    %16 = vector.load %arg19[%15, %c0_15, %c0_16] : memref<8x8x384xf32, #tpu.memory_space<vmem>>, vector<1x8x384xf32>
    %17 = vector.shape_cast %16 : vector<1x8x384xf32> to vector<8x384xf32>
    %18 = vector.extract_strided_slice %17 {offsets = [0, 0], sizes = [8, 128], strides = [1, 1]} : vector<8x384xf32> to vector<8x128xf32>
    %19 = vector.extract_strided_slice %14 {offsets = [0, 0], sizes = [8, 128], strides = [1, 1]} : vector<8x384xf32> to vector<8x128xf32>
    %20 = arith.addf %18, %19 : vector<8x128xf32>
    %21 = arith.negf %20 : vector<8x128xf32>
    %22 = math.exp %21 : vector<8x128xf32>
    %cst_17 = arith.constant 1.000000e+00 : f32
    %23 = vector.broadcast %cst_17 : f32 to vector<8x128xf32>
    %24 = arith.addf %23, %22 : vector<8x128xf32>
    %25 = arith.divf %23, %24 : vector<8x128xf32>
    %26 = vector.extract_strided_slice %17 {offsets = [0, 128], sizes = [8, 128], strides = [1, 1]} : vector<8x384xf32> to vector<8x128xf32>
    %27 = vector.extract_strided_slice %14 {offsets = [0, 128], sizes = [8, 128], strides = [1, 1]} : vector<8x384xf32> to vector<8x128xf32>
    %28 = arith.addf %26, %27 : vector<8x128xf32>
    %29 = arith.negf %28 : vector<8x128xf32>
    %30 = math.exp %29 : vector<8x128xf32>
    %cst_18 = arith.constant 1.000000e+00 : f32
    %31 = vector.broadcast %cst_18 : f32 to vector<8x128xf32>
    %32 = arith.addf %31, %30 : vector<8x128xf32>
    %33 = arith.divf %31, %32 : vector<8x128xf32>
    %34 = vector.extract_strided_slice %17 {offsets = [0, 256], sizes = [8, 128], strides = [1, 1]} : vector<8x384xf32> to vector<8x128xf32>
    %35 = vector.extract_strided_slice %14 {offsets = [0, 256], sizes = [8, 128], strides = [1, 1]} : vector<8x384xf32> to vector<8x128xf32>
    %36 = arith.addf %35, %11 : vector<8x128xf32>
    %37 = arith.mulf %25, %36 : vector<8x128xf32>
    %38 = arith.addf %34, %37 : vector<8x128xf32>
    %39 = math.tanh %38 : vector<8x128xf32>
    %cst_19 = arith.constant 1.000000e+00 : f32
    %40 = vector.broadcast %cst_19 : f32 to vector<8x128xf32>
    %41 = arith.subf %40, %33 : vector<8x128xf32>
    %42 = arith.mulf %41, %39 : vector<8x128xf32>
    %43 = arith.mulf %33, %12 : vector<8x128xf32>
    %44 = arith.addf %42, %43 : vector<8x128xf32>
    %45 = arith.index_cast %c0_i32 : i32 to index
    %c0_20 = arith.constant 0 : index
    %c0_21 = arith.constant 0 : index
    %46 = vector.load %arg14[%45, %c0_20, %c0_21] : memref<8x8x128xf32, #tpu.memory_space<vmem>>, vector<1x8x128xf32>
    %47 = vector.shape_cast %46 : vector<1x8x128xf32> to vector<8x128xf32>
    %48 = vector.shape_cast %44 : vector<8x128xf32> to vector<1x8x128xf32>
    tpu.vector_store %arg14[%45, %c0_20, %c0_21], %48 {strides = array<i32>} : memref<8x8x128xf32, #tpu.memory_space<vmem>>, vector<1x8x128xf32>,
    %c1_i32 = arith.constant 1 : i32
    %c0_22 = arith.constant 0 : index
    %c0_23 = arith.constant 0 : index
    %49 = vector.load %arg3[%c0_22, %c0_23] : memref<128x384xf32, #tpu.memory_space<vmem>>, vector<128x384xf32>
    %cst_24 = arith.constant dense<0.000000e+00> : vector<8x384xf32>
    %50 = tpu.matmul %44, %49, %cst_24 {dimension_numbers = #tpu.dot_dimension_numbers<[1], [0], [0], [1], [0, 0, 1, 1], [], []>} : vector<8x128xf32>, vector<128x384xf32>, vector<8x384xf32> -> vector<8x384xf32>
    %51 = arith.index_cast %c1_i32 : i32 to index
    %c0_25 = arith.constant 0 : index
    %c0_26 = arith.constant 0 : index
    %52 = vector.load %arg19[%51, %c0_25, %c0_26] : memref<8x8x384xf32, #tpu.memory_space<vmem>>, vector<1x8x384xf32>
    %53 = vector.shape_cast %52 : vector<1x8x384xf32> to vector<8x384xf32>
    %54 = vector.extract_strided_slice %53 {offsets = [0, 0], sizes = [8, 128], strides = [1, 1]} : vector<8x384xf32> to vector<8x128xf32>
    %55 = vector.extract_strided_slice %50 {offsets = [0, 0], sizes = [8, 128], strides = [1, 1]} : vector<8x384xf32> to vector<8x128xf32>
    %56 = arith.addf %54, %55 : vector<8x128xf32>
    %57 = arith.negf %56 : vector<8x128xf32>
    %58 = math.exp %57 : vector<8x128xf32>
    %cst_27 = arith.constant 1.000000e+00 : f32
    %59 = vector.broadcast %cst_27 : f32 to vector<8x128xf32>
    %60 = arith.addf %59, %58 : vector<8x128xf32>
    %61 = arith.divf %59, %60 : vector<8x128xf32>
    %62 = vector.extract_strided_slice %53 {offsets = [0, 128], sizes = [8, 128], strides = [1, 1]} : vector<8x384xf32> to vector<8x128xf32>
    %63 = vector.extract_strided_slice %50 {offsets = [0, 128], sizes = [8, 128], strides = [1, 1]} : vector<8x384xf32> to vector<8x128xf32>
    %64 = arith.addf %62, %63 : vector<8x128xf32>
    %65 = arith.negf %64 : vector<8x128xf32>
    %66 = math.exp %65 : vector<8x128xf32>
    %cst_28 = arith.constant 1.000000e+00 : f32
    %67 = vector.broadcast %cst_28 : f32 to vector<8x128xf32>
    %68 = arith.addf %67, %66 : vector<8x128xf32>
    %69 = arith.divf %67, %68 : vector<8x128xf32>
    %70 = vector.extract_strided_slice %53 {offsets = [0, 256], sizes = [8, 128], strides = [1, 1]} : vector<8x384xf32> to vector<8x128xf32>
    %71 = vector.extract_strided_slice %50 {offsets = [0, 256], sizes = [8, 128], strides = [1, 1]} : vector<8x384xf32> to vector<8x128xf32>
    %72 = arith.addf %71, %11 : vector<8x128xf32>
    %73 = arith.mulf %61, %72 : vector<8x128xf32>
    %74 = arith.addf %70, %73 : vector<8x128xf32>
    %75 = math.tanh %74 : vector<8x128xf32>
    %cst_29 = arith.constant 1.000000e+00 : f32
    %76 = vector.broadcast %cst_29 : f32 to vector<8x128xf32>
    %77 = arith.subf %76, %69 : vector<8x128xf32>
    %78 = arith.mulf %77, %75 : vector<8x128xf32>
    %79 = arith.mulf %69, %44 : vector<8x128xf32>
    %80 = arith.addf %78, %79 : vector<8x128xf32>
    %81 = arith.index_cast %c1_i32 : i32 to index
    %c0_30 = arith.constant 0 : index
    %c0_31 = arith.constant 0 : index
    %82 = vector.load %arg14[%81, %c0_30, %c0_31] : memref<8x8x128xf32, #tpu.memory_space<vmem>>, vector<1x8x128xf32>
    %83 = vector.shape_cast %82 : vector<1x8x128xf32> to vector<8x128xf32>
    %84 = vector.shape_cast %80 : vector<8x128xf32> to vector<1x8x128xf32>
    tpu.vector_store %arg14[%81, %c0_30, %c0_31], %84 {strides = array<i32>} : memref<8x8x128xf32, #tpu.memory_space<vmem>>, vector<1x8x128xf32>,
    %c2_i32 = arith.constant 2 : i32
    %c0_32 = arith.constant 0 : index
    %c0_33 = arith.constant 0 : index
    %85 = vector.load %arg3[%c0_32, %c0_33] : memref<128x384xf32, #tpu.memory_space<vmem>>, vector<128x384xf32>
    %cst_34 = arith.constant dense<0.000000e+00> : vector<8x384xf32>
    %86 = tpu.matmul %80, %85, %cst_34 {dimension_numbers = #tpu.dot_dimension_numbers<[1], [0], [0], [1], [0, 0, 1, 1], [], []>} : vector<8x128xf32>, vector<128x384xf32>, vector<8x384xf32> -> vector<8x384xf32>
    %87 = arith.index_cast %c2_i32 : i32 to index
    %c0_35 = arith.constant 0 : index
    %c0_36 = arith.constant 0 : index
    %88 = vector.load %arg19[%87, %c0_35, %c0_36] : memref<8x8x384xf32, #tpu.memory_space<vmem>>, vector<1x8x384xf32>
    %89 = vector.shape_cast %88 : vector<1x8x384xf32> to vector<8x384xf32>
    %90 = vector.extract_strided_slice %89 {offsets = [0, 0], sizes = [8, 128], strides = [1, 1]} : vector<8x384xf32> to vector<8x128xf32>
    %91 = vector.extract_strided_slice %86 {offsets = [0, 0], sizes = [8, 128], strides = [1, 1]} : vector<8x384xf32> to vector<8x128xf32>
    %92 = arith.addf %90, %91 : vector<8x128xf32>
    %93 = arith.negf %92 : vector<8x128xf32>
    %94 = math.exp %93 : vector<8x128xf32>
    %cst_37 = arith.constant 1.000000e+00 : f32
    %95 = vector.broadcast %cst_37 : f32 to vector<8x128xf32>
    %96 = arith.addf %95, %94 : vector<8x128xf32>
    %97 = arith.divf %95, %96 : vector<8x128xf32>
    %98 = vector.extract_strided_slice %89 {offsets = [0, 128], sizes = [8, 128], strides = [1, 1]} : vector<8x384xf32> to vector<8x128xf32>
    %99 = vector.extract_strided_slice %86 {offsets = [0, 128], sizes = [8, 128], strides = [1, 1]} : vector<8x384xf32> to vector<8x128xf32>
    %100 = arith.addf %98, %99 : vector<8x128xf32>
    %101 = arith.negf %100 : vector<8x128xf32>
    %102 = math.exp %101 : vector<8x128xf32>
    %cst_38 = arith.constant 1.000000e+00 : f32
    %103 = vector.broadcast %cst_38 : f32 to vector<8x128xf32>
    %104 = arith.addf %103, %102 : vector<8x128xf32>
    %105 = arith.divf %103, %104 : vector<8x128xf32>
    %106 = vector.extract_strided_slice %89 {offsets = [0, 256], sizes = [8, 128], strides = [1, 1]} : vector<8x384xf32> to vector<8x128xf32>
    %107 = vector.extract_strided_slice %86 {offsets = [0, 256], sizes = [8, 128], strides = [1, 1]} : vector<8x384xf32> to vector<8x128xf32>
    %108 = arith.addf %107, %11 : vector<8x128xf32>
    %109 = arith.mulf %97, %108 : vector<8x128xf32>
    %110 = arith.addf %106, %109 : vector<8x128xf32>
    %111 = math.tanh %110 : vector<8x128xf32>
    %cst_39 = arith.constant 1.000000e+00 : f32
    %112 = vector.broadcast %cst_39 : f32 to vector<8x128xf32>
    %113 = arith.subf %112, %105 : vector<8x128xf32>
    %114 = arith.mulf %113, %111 : vector<8x128xf32>
    %115 = arith.mulf %105, %80 : vector<8x128xf32>
    %116 = arith.addf %114, %115 : vector<8x128xf32>
    %117 = arith.index_cast %c2_i32 : i32 to index
    %c0_40 = arith.constant 0 : index
    %c0_41 = arith.constant 0 : index
    %118 = vector.load %arg14[%117, %c0_40, %c0_41] : memref<8x8x128xf32, #tpu.memory_space<vmem>>, vector<1x8x128xf32>
    %119 = vector.shape_cast %118 : vector<1x8x128xf32> to vector<8x128xf32>
    %120 = vector.shape_cast %116 : vector<8x128xf32> to vector<1x8x128xf32>
    tpu.vector_store %arg14[%117, %c0_40, %c0_41], %120 {strides = array<i32>} : memref<8x8x128xf32, #tpu.memory_space<vmem>>, vector<1x8x128xf32>,
    %c3_i32 = arith.constant 3 : i32
    %c0_42 = arith.constant 0 : index
    %c0_43 = arith.constant 0 : index
    %121 = vector.load %arg3[%c0_42, %c0_43] : memref<128x384xf32, #tpu.memory_space<vmem>>, vector<128x384xf32>
    %cst_44 = arith.constant dense<0.000000e+00> : vector<8x384xf32>
    %122 = tpu.matmul %116, %121, %cst_44 {dimension_numbers = #tpu.dot_dimension_numbers<[1], [0], [0], [1], [0, 0, 1, 1], [], []>} : vector<8x128xf32>, vector<128x384xf32>, vector<8x384xf32> -> vector<8x384xf32>
    %123 = arith.index_cast %c3_i32 : i32 to index
    %c0_45 = arith.constant 0 : index
    %c0_46 = arith.constant 0 : index
    %124 = vector.load %arg19[%123, %c0_45, %c0_46] : memref<8x8x384xf32, #tpu.memory_space<vmem>>, vector<1x8x384xf32>
    %125 = vector.shape_cast %124 : vector<1x8x384xf32> to vector<8x384xf32>
    %126 = vector.extract_strided_slice %125 {offsets = [0, 0], sizes = [8, 128], strides = [1, 1]} : vector<8x384xf32> to vector<8x128xf32>
    %127 = vector.extract_strided_slice %122 {offsets = [0, 0], sizes = [8, 128], strides = [1, 1]} : vector<8x384xf32> to vector<8x128xf32>
    %128 = arith.addf %126, %127 : vector<8x128xf32>
    %129 = arith.negf %128 : vector<8x128xf32>
    %130 = math.exp %129 : vector<8x128xf32>
    %cst_47 = arith.constant 1.000000e+00 : f32
    %131 = vector.broadcast %cst_47 : f32 to vector<8x128xf32>
    %132 = arith.addf %131, %130 : vector<8x128xf32>
    %133 = arith.divf %131, %132 : vector<8x128xf32>
    %134 = vector.extract_strided_slice %125 {offsets = [0, 128], sizes = [8, 128], strides = [1, 1]} : vector<8x384xf32> to vector<8x128xf32>
    %135 = vector.extract_strided_slice %122 {offsets = [0, 128], sizes = [8, 128], strides = [1, 1]} : vector<8x384xf32> to vector<8x128xf32>
    %136 = arith.addf %134, %135 : vector<8x128xf32>
    %137 = arith.negf %136 : vector<8x128xf32>
    %138 = math.exp %137 : vector<8x128xf32>
    %cst_48 = arith.constant 1.000000e+00 : f32
    %139 = vector.broadcast %cst_48 : f32 to vector<8x128xf32>
    %140 = arith.addf %139, %138 : vector<8x128xf32>
    %141 = arith.divf %139, %140 : vector<8x128xf32>
    %142 = vector.extract_strided_slice %125 {offsets = [0, 256], sizes = [8, 128], strides = [1, 1]} : vector<8x384xf32> to vector<8x128xf32>
    %143 = vector.extract_strided_slice %122 {offsets = [0, 256], sizes = [8, 128], strides = [1, 1]} : vector<8x384xf32> to vector<8x128xf32>
    %144 = arith.addf %143, %11 : vector<8x128xf32>
    %145 = arith.mulf %133, %144 : vector<8x128xf32>
    %146 = arith.addf %142, %145 : vector<8x128xf32>
    %147 = math.tanh %146 : vector<8x128xf32>
    %cst_49 = arith.constant 1.000000e+00 : f32
    %148 = vector.broadcast %cst_49 : f32 to vector<8x128xf32>
    %149 = arith.subf %148, %141 : vector<8x128xf32>
    %150 = arith.mulf %149, %147 : vector<8x128xf32>
    %151 = arith.mulf %141, %116 : vector<8x128xf32>
    %152 = arith.addf %150, %151 : vector<8x128xf32>
    %153 = arith.index_cast %c3_i32 : i32 to index
    %c0_50 = arith.constant 0 : index
    %c0_51 = arith.constant 0 : index
    %154 = vector.load %arg14[%153, %c0_50, %c0_51] : memref<8x8x128xf32, #tpu.memory_space<vmem>>, vector<1x8x128xf32>
    %155 = vector.shape_cast %154 : vector<1x8x128xf32> to vector<8x128xf32>
    %156 = vector.shape_cast %152 : vector<8x128xf32> to vector<1x8x128xf32>
    tpu.vector_store %arg14[%153, %c0_50, %c0_51], %156 {strides = array<i32>} : memref<8x8x128xf32, #tpu.memory_space<vmem>>, vector<1x8x128xf32>,
    %c4_i32 = arith.constant 4 : i32
    %c0_52 = arith.constant 0 : index
    %c0_53 = arith.constant 0 : index
    %157 = vector.load %arg3[%c0_52, %c0_53] : memref<128x384xf32, #tpu.memory_space<vmem>>, vector<128x384xf32>
    %cst_54 = arith.constant dense<0.000000e+00> : vector<8x384xf32>
    %158 = tpu.matmul %152, %157, %cst_54 {dimension_numbers = #tpu.dot_dimension_numbers<[1], [0], [0], [1], [0, 0, 1, 1], [], []>} : vector<8x128xf32>, vector<128x384xf32>, vector<8x384xf32> -> vector<8x384xf32>
    %159 = arith.index_cast %c4_i32 : i32 to index
    %c0_55 = arith.constant 0 : index
    %c0_56 = arith.constant 0 : index
    %160 = vector.load %arg19[%159, %c0_55, %c0_56] : memref<8x8x384xf32, #tpu.memory_space<vmem>>, vector<1x8x384xf32>
    %161 = vector.shape_cast %160 : vector<1x8x384xf32> to vector<8x384xf32>
    %162 = vector.extract_strided_slice %161 {offsets = [0, 0], sizes = [8, 128], strides = [1, 1]} : vector<8x384xf32> to vector<8x128xf32>
    %163 = vector.extract_strided_slice %158 {offsets = [0, 0], sizes = [8, 128], strides = [1, 1]} : vector<8x384xf32> to vector<8x128xf32>
    %164 = arith.addf %162, %163 : vector<8x128xf32>
    %165 = arith.negf %164 : vector<8x128xf32>
    %166 = math.exp %165 : vector<8x128xf32>
    %cst_57 = arith.constant 1.000000e+00 : f32
    %167 = vector.broadcast %cst_57 : f32 to vector<8x128xf32>
    %168 = arith.addf %167, %166 : vector<8x128xf32>
    %169 = arith.divf %167, %168 : vector<8x128xf32>
    %170 = vector.extract_strided_slice %161 {offsets = [0, 128], sizes = [8, 128], strides = [1, 1]} : vector<8x384xf32> to vector<8x128xf32>
    %171 = vector.extract_strided_slice %158 {offsets = [0, 128], sizes = [8, 128], strides = [1, 1]} : vector<8x384xf32> to vector<8x128xf32>
    %172 = arith.addf %170, %171 : vector<8x128xf32>
    %173 = arith.negf %172 : vector<8x128xf32>
    %174 = math.exp %173 : vector<8x128xf32>
    %cst_58 = arith.constant 1.000000e+00 : f32
    %175 = vector.broadcast %cst_58 : f32 to vector<8x128xf32>
    %176 = arith.addf %175, %174 : vector<8x128xf32>
    %177 = arith.divf %175, %176 : vector<8x128xf32>
    %178 = vector.extract_strided_slice %161 {offsets = [0, 256], sizes = [8, 128], strides = [1, 1]} : vector<8x384xf32> to vector<8x128xf32>
    %179 = vector.extract_strided_slice %158 {offsets = [0, 256], sizes = [8, 128], strides = [1, 1]} : vector<8x384xf32> to vector<8x128xf32>
    %180 = arith.addf %179, %11 : vector<8x128xf32>
    %181 = arith.mulf %169, %180 : vector<8x128xf32>
    %182 = arith.addf %178, %181 : vector<8x128xf32>
    %183 = math.tanh %182 : vector<8x128xf32>
    %cst_59 = arith.constant 1.000000e+00 : f32
    %184 = vector.broadcast %cst_59 : f32 to vector<8x128xf32>
    %185 = arith.subf %184, %177 : vector<8x128xf32>
    %186 = arith.mulf %185, %183 : vector<8x128xf32>
    %187 = arith.mulf %177, %152 : vector<8x128xf32>
    %188 = arith.addf %186, %187 : vector<8x128xf32>
    %189 = arith.index_cast %c4_i32 : i32 to index
    %c0_60 = arith.constant 0 : index
    %c0_61 = arith.constant 0 : index
    %190 = vector.load %arg14[%189, %c0_60, %c0_61] : memref<8x8x128xf32, #tpu.memory_space<vmem>>, vector<1x8x128xf32>
    %191 = vector.shape_cast %190 : vector<1x8x128xf32> to vector<8x128xf32>
    %192 = vector.shape_cast %188 : vector<8x128xf32> to vector<1x8x128xf32>
    tpu.vector_store %arg14[%189, %c0_60, %c0_61], %192 {strides = array<i32>} : memref<8x8x128xf32, #tpu.memory_space<vmem>>, vector<1x8x128xf32>,
    %c5_i32 = arith.constant 5 : i32
    %c0_62 = arith.constant 0 : index
    %c0_63 = arith.constant 0 : index
    %193 = vector.load %arg3[%c0_62, %c0_63] : memref<128x384xf32, #tpu.memory_space<vmem>>, vector<128x384xf32>
    %cst_64 = arith.constant dense<0.000000e+00> : vector<8x384xf32>
    %194 = tpu.matmul %188, %193, %cst_64 {dimension_numbers = #tpu.dot_dimension_numbers<[1], [0], [0], [1], [0, 0, 1, 1], [], []>} : vector<8x128xf32>, vector<128x384xf32>, vector<8x384xf32> -> vector<8x384xf32>
    %195 = arith.index_cast %c5_i32 : i32 to index
    %c0_65 = arith.constant 0 : index
    %c0_66 = arith.constant 0 : index
    %196 = vector.load %arg19[%195, %c0_65, %c0_66] : memref<8x8x384xf32, #tpu.memory_space<vmem>>, vector<1x8x384xf32>
    %197 = vector.shape_cast %196 : vector<1x8x384xf32> to vector<8x384xf32>
    %198 = vector.extract_strided_slice %197 {offsets = [0, 0], sizes = [8, 128], strides = [1, 1]} : vector<8x384xf32> to vector<8x128xf32>
    %199 = vector.extract_strided_slice %194 {offsets = [0, 0], sizes = [8, 128], strides = [1, 1]} : vector<8x384xf32> to vector<8x128xf32>
    %200 = arith.addf %198, %199 : vector<8x128xf32>
    %201 = arith.negf %200 : vector<8x128xf32>
    %202 = math.exp %201 : vector<8x128xf32>
    %cst_67 = arith.constant 1.000000e+00 : f32
    %203 = vector.broadcast %cst_67 : f32 to vector<8x128xf32>
    %204 = arith.addf %203, %202 : vector<8x128xf32>
    %205 = arith.divf %203, %204 : vector<8x128xf32>
    %206 = vector.extract_strided_slice %197 {offsets = [0, 128], sizes = [8, 128], strides = [1, 1]} : vector<8x384xf32> to vector<8x128xf32>
    %207 = vector.extract_strided_slice %194 {offsets = [0, 128], sizes = [8, 128], strides = [1, 1]} : vector<8x384xf32> to vector<8x128xf32>
    %208 = arith.addf %206, %207 : vector<8x128xf32>
    %209 = arith.negf %208 : vector<8x128xf32>
    %210 = math.exp %209 : vector<8x128xf32>
    %cst_68 = arith.constant 1.000000e+00 : f32
    %211 = vector.broadcast %cst_68 : f32 to vector<8x128xf32>
    %212 = arith.addf %211, %210 : vector<8x128xf32>
    %213 = arith.divf %211, %212 : vector<8x128xf32>
    %214 = vector.extract_strided_slice %197 {offsets = [0, 256], sizes = [8, 128], strides = [1, 1]} : vector<8x384xf32> to vector<8x128xf32>
    %215 = vector.extract_strided_slice %194 {offsets = [0, 256], sizes = [8, 128], strides = [1, 1]} : vector<8x384xf32> to vector<8x128xf32>
    %216 = arith.addf %215, %11 : vector<8x128xf32>
    %217 = arith.mulf %205, %216 : vector<8x128xf32>
    %218 = arith.addf %214, %217 : vector<8x128xf32>
    %219 = math.tanh %218 : vector<8x128xf32>
    %cst_69 = arith.constant 1.000000e+00 : f32
    %220 = vector.broadcast %cst_69 : f32 to vector<8x128xf32>
    %221 = arith.subf %220, %213 : vector<8x128xf32>
    %222 = arith.mulf %221, %219 : vector<8x128xf32>
    %223 = arith.mulf %213, %188 : vector<8x128xf32>
    %224 = arith.addf %222, %223 : vector<8x128xf32>
    %225 = arith.index_cast %c5_i32 : i32 to index
    %c0_70 = arith.constant 0 : index
    %c0_71 = arith.constant 0 : index
    %226 = vector.load %arg14[%225, %c0_70, %c0_71] : memref<8x8x128xf32, #tpu.memory_space<vmem>>, vector<1x8x128xf32>
    %227 = vector.shape_cast %226 : vector<1x8x128xf32> to vector<8x128xf32>
    %228 = vector.shape_cast %224 : vector<8x128xf32> to vector<1x8x128xf32>
    tpu.vector_store %arg14[%225, %c0_70, %c0_71], %228 {strides = array<i32>} : memref<8x8x128xf32, #tpu.memory_space<vmem>>, vector<1x8x128xf32>,
    %c6_i32 = arith.constant 6 : i32
    %c0_72 = arith.constant 0 : index
    %c0_73 = arith.constant 0 : index
    %229 = vector.load %arg3[%c0_72, %c0_73] : memref<128x384xf32, #tpu.memory_space<vmem>>, vector<128x384xf32>
    %cst_74 = arith.constant dense<0.000000e+00> : vector<8x384xf32>
    %230 = tpu.matmul %224, %229, %cst_74 {dimension_numbers = #tpu.dot_dimension_numbers<[1], [0], [0], [1], [0, 0, 1, 1], [], []>} : vector<8x128xf32>, vector<128x384xf32>, vector<8x384xf32> -> vector<8x384xf32>
    %231 = arith.index_cast %c6_i32 : i32 to index
    %c0_75 = arith.constant 0 : index
    %c0_76 = arith.constant 0 : index
    %232 = vector.load %arg19[%231, %c0_75, %c0_76] : memref<8x8x384xf32, #tpu.memory_space<vmem>>, vector<1x8x384xf32>
    %233 = vector.shape_cast %232 : vector<1x8x384xf32> to vector<8x384xf32>
    %234 = vector.extract_strided_slice %233 {offsets = [0, 0], sizes = [8, 128], strides = [1, 1]} : vector<8x384xf32> to vector<8x128xf32>
    %235 = vector.extract_strided_slice %230 {offsets = [0, 0], sizes = [8, 128], strides = [1, 1]} : vector<8x384xf32> to vector<8x128xf32>
    %236 = arith.addf %234, %235 : vector<8x128xf32>
    %237 = arith.negf %236 : vector<8x128xf32>
    %238 = math.exp %237 : vector<8x128xf32>
    %cst_77 = arith.constant 1.000000e+00 : f32
    %239 = vector.broadcast %cst_77 : f32 to vector<8x128xf32>
    %240 = arith.addf %239, %238 : vector<8x128xf32>
    %241 = arith.divf %239, %240 : vector<8x128xf32>
    %242 = vector.extract_strided_slice %233 {offsets = [0, 128], sizes = [8, 128], strides = [1, 1]} : vector<8x384xf32> to vector<8x128xf32>
    %243 = vector.extract_strided_slice %230 {offsets = [0, 128], sizes = [8, 128], strides = [1, 1]} : vector<8x384xf32> to vector<8x128xf32>
    %244 = arith.addf %242, %243 : vector<8x128xf32>
    %245 = arith.negf %244 : vector<8x128xf32>
    %246 = math.exp %245 : vector<8x128xf32>
    %cst_78 = arith.constant 1.000000e+00 : f32
    %247 = vector.broadcast %cst_78 : f32 to vector<8x128xf32>
    %248 = arith.addf %247, %246 : vector<8x128xf32>
    %249 = arith.divf %247, %248 : vector<8x128xf32>
    %250 = vector.extract_strided_slice %233 {offsets = [0, 256], sizes = [8, 128], strides = [1, 1]} : vector<8x384xf32> to vector<8x128xf32>
    %251 = vector.extract_strided_slice %230 {offsets = [0, 256], sizes = [8, 128], strides = [1, 1]} : vector<8x384xf32> to vector<8x128xf32>
    %252 = arith.addf %251, %11 : vector<8x128xf32>
    %253 = arith.mulf %241, %252 : vector<8x128xf32>
    %254 = arith.addf %250, %253 : vector<8x128xf32>
    %255 = math.tanh %254 : vector<8x128xf32>
    %cst_79 = arith.constant 1.000000e+00 : f32
    %256 = vector.broadcast %cst_79 : f32 to vector<8x128xf32>
    %257 = arith.subf %256, %249 : vector<8x128xf32>
    %258 = arith.mulf %257, %255 : vector<8x128xf32>
    %259 = arith.mulf %249, %224 : vector<8x128xf32>
    %260 = arith.addf %258, %259 : vector<8x128xf32>
    %261 = arith.index_cast %c6_i32 : i32 to index
    %c0_80 = arith.constant 0 : index
    %c0_81 = arith.constant 0 : index
    %262 = vector.load %arg14[%261, %c0_80, %c0_81] : memref<8x8x128xf32, #tpu.memory_space<vmem>>, vector<1x8x128xf32>
    %263 = vector.shape_cast %262 : vector<1x8x128xf32> to vector<8x128xf32>
    %264 = vector.shape_cast %260 : vector<8x128xf32> to vector<1x8x128xf32>
    tpu.vector_store %arg14[%261, %c0_80, %c0_81], %264 {strides = array<i32>} : memref<8x8x128xf32, #tpu.memory_space<vmem>>, vector<1x8x128xf32>,
    %c7_i32 = arith.constant 7 : i32
    %c0_82 = arith.constant 0 : index
    %c0_83 = arith.constant 0 : index
    %265 = vector.load %arg3[%c0_82, %c0_83] : memref<128x384xf32, #tpu.memory_space<vmem>>, vector<128x384xf32>
    %cst_84 = arith.constant dense<0.000000e+00> : vector<8x384xf32>
    %266 = tpu.matmul %260, %265, %cst_84 {dimension_numbers = #tpu.dot_dimension_numbers<[1], [0], [0], [1], [0, 0, 1, 1], [], []>} : vector<8x128xf32>, vector<128x384xf32>, vector<8x384xf32> -> vector<8x384xf32>
    %267 = arith.index_cast %c7_i32 : i32 to index
    %c0_85 = arith.constant 0 : index
    %c0_86 = arith.constant 0 : index
    %268 = vector.load %arg19[%267, %c0_85, %c0_86] : memref<8x8x384xf32, #tpu.memory_space<vmem>>, vector<1x8x384xf32>
    %269 = vector.shape_cast %268 : vector<1x8x384xf32> to vector<8x384xf32>
    %270 = vector.extract_strided_slice %269 {offsets = [0, 0], sizes = [8, 128], strides = [1, 1]} : vector<8x384xf32> to vector<8x128xf32>
    %271 = vector.extract_strided_slice %266 {offsets = [0, 0], sizes = [8, 128], strides = [1, 1]} : vector<8x384xf32> to vector<8x128xf32>
    %272 = arith.addf %270, %271 : vector<8x128xf32>
    %273 = arith.negf %272 : vector<8x128xf32>
    %274 = math.exp %273 : vector<8x128xf32>
    %cst_87 = arith.constant 1.000000e+00 : f32
    %275 = vector.broadcast %cst_87 : f32 to vector<8x128xf32>
    %276 = arith.addf %275, %274 : vector<8x128xf32>
    %277 = arith.divf %275, %276 : vector<8x128xf32>
    %278 = vector.extract_strided_slice %269 {offsets = [0, 128], sizes = [8, 128], strides = [1, 1]} : vector<8x384xf32> to vector<8x128xf32>
    %279 = vector.extract_strided_slice %266 {offsets = [0, 128], sizes = [8, 128], strides = [1, 1]} : vector<8x384xf32> to vector<8x128xf32>
    %280 = arith.addf %278, %279 : vector<8x128xf32>
    %281 = arith.negf %280 : vector<8x128xf32>
    %282 = math.exp %281 : vector<8x128xf32>
    %cst_88 = arith.constant 1.000000e+00 : f32
    %283 = vector.broadcast %cst_88 : f32 to vector<8x128xf32>
    %284 = arith.addf %283, %282 : vector<8x128xf32>
    %285 = arith.divf %283, %284 : vector<8x128xf32>
    %286 = vector.extract_strided_slice %269 {offsets = [0, 256], sizes = [8, 128], strides = [1, 1]} : vector<8x384xf32> to vector<8x128xf32>
    %287 = vector.extract_strided_slice %266 {offsets = [0, 256], sizes = [8, 128], strides = [1, 1]} : vector<8x384xf32> to vector<8x128xf32>
    %288 = arith.addf %287, %11 : vector<8x128xf32>
    %289 = arith.mulf %277, %288 : vector<8x128xf32>
    %290 = arith.addf %286, %289 : vector<8x128xf32>
    %291 = math.tanh %290 : vector<8x128xf32>
    %cst_89 = arith.constant 1.000000e+00 : f32
    %292 = vector.broadcast %cst_89 : f32 to vector<8x128xf32>
    %293 = arith.subf %292, %285 : vector<8x128xf32>
    %294 = arith.mulf %293, %291 : vector<8x128xf32>
    %295 = arith.mulf %285, %260 : vector<8x128xf32>
    %296 = arith.addf %294, %295 : vector<8x128xf32>
    %297 = arith.index_cast %c7_i32 : i32 to index
    %c0_90 = arith.constant 0 : index
    %c0_91 = arith.constant 0 : index
    %298 = vector.load %arg14[%297, %c0_90, %c0_91] : memref<8x8x128xf32, #tpu.memory_space<vmem>>, vector<1x8x128xf32>
    %299 = vector.shape_cast %298 : vector<1x8x128xf32> to vector<8x128xf32>
    %300 = vector.shape_cast %296 : vector<8x128xf32> to vector<1x8x128xf32>
    tpu.vector_store %arg14[%297, %c0_90, %c0_91], %300 {strides = array<i32>} : memref<8x8x128xf32, #tpu.memory_space<vmem>>, vector<1x8x128xf32>,
    %c8_i32 = arith.constant 8 : i32
    %c0_92 = arith.constant 0 : index
    %c0_93 = arith.constant 0 : index
    %301 = vector.load %arg6[%c0_92, %c0_93] : memref<128x256xf32, #tpu.memory_space<vmem>>, vector<128x256xf32>
    %cst_94 = arith.constant dense<0.000000e+00> : vector<8x256xf32>
    %302 = tpu.matmul %296, %301, %cst_94 {dimension_numbers = #tpu.dot_dimension_numbers<[1], [0], [0], [1], [0, 0, 1, 1], [], []>} : vector<8x128xf32>, vector<128x256xf32>, vector<8x256xf32> -> vector<8x256xf32>
    %c0_95 = arith.constant 0 : index
    %c0_96 = arith.constant 0 : index
    %303 = vector.load %arg7[%c0_95, %c0_96] : memref<1x256xf32, #tpu.memory_space<vmem>>, vector<1x256xf32>
    %304 = vector.broadcast %303 : vector<1x256xf32> to vector<8x256xf32>
    %305 = arith.addf %302, %304 : vector<8x256xf32>
    %306 = vector.extract_strided_slice %305 {offsets = [0, 0], sizes = [8, 128], strides = [1, 1]} : vector<8x256xf32> to vector<8x128xf32>
    %307 = vector.extract_strided_slice %305 {offsets = [0, 128], sizes = [8, 128], strides = [1, 1]} : vector<8x256xf32> to vector<8x128xf32>
    %c0_97 = arith.constant 0 : index
    %c0_98 = arith.constant 0 : index
    %308 = vector.load %arg1[%c0_97, %c0_98] : memref<8x128xf32, #tpu.memory_space<vmem>>, vector<8x128xf32>
    %cst_99 = arith.constant 5.000000e-01 : f32
    %309 = vector.broadcast %cst_99 : f32 to vector<8x128xf32>
    %310 = arith.mulf %309, %307 : vector<8x128xf32>
    %311 = math.exp %310 : vector<8x128xf32>
    %312 = arith.mulf %308, %311 : vector<8x128xf32>
    %313 = arith.addf %306, %312 : vector<8x128xf32>
    %c0_100 = arith.constant 0 : index
    %c0_101 = arith.constant 0 : index
    %314 = vector.load %arg15[%c0_100, %c0_101] : memref<8x128xf32, #tpu.memory_space<vmem>>, vector<8x128xf32>
    tpu.vector_store %arg15[%c0_100, %c0_101], %306 {strides = array<i32>} : memref<8x128xf32, #tpu.memory_space<vmem>>, vector<8x128xf32>,
    %c0_102 = arith.constant 0 : index
    %c0_103 = arith.constant 0 : index
    %315 = vector.load %arg16[%c0_102, %c0_103] : memref<8x128xf32, #tpu.memory_space<vmem>>, vector<8x128xf32>
    tpu.vector_store %arg16[%c0_102, %c0_103], %307 {strides = array<i32>} : memref<8x128xf32, #tpu.memory_space<vmem>>, vector<8x128xf32>,
    %c0_104 = arith.constant 0 : index
    %c0_105 = arith.constant 0 : index
    %316 = vector.load %arg17[%c0_104, %c0_105] : memref<8x128xf32, #tpu.memory_space<vmem>>, vector<8x128xf32>
    tpu.vector_store %arg17[%c0_104, %c0_105], %313 {strides = array<i32>} : memref<8x128xf32, #tpu.memory_space<vmem>>, vector<8x128xf32>,
    %c0_106 = arith.constant 0 : index
    %c0_107 = arith.constant 0 : index
    %c0_108 = arith.constant 0 : index
    %317 = vector.load %arg0[%c0_106, %c0_107, %c0_108] : memref<8x8x128xf32, #tpu.memory_space<vmem>>, vector<1x8x128xf32>
    %318 = vector.shape_cast %317 : vector<1x8x128xf32> to vector<8x128xf32>
    %c0_109 = arith.constant 0 : index
    %c0_110 = arith.constant 0 : index
    %319 = vector.load %arg8[%c0_109, %c0_110] : memref<128x384xf32, #tpu.memory_space<vmem>>, vector<128x384xf32>
    %cst_111 = arith.constant dense<0.000000e+00> : vector<8x384xf32>
    %320 = tpu.matmul %318, %319, %cst_111 {dimension_numbers = #tpu.dot_dimension_numbers<[1], [0], [0], [1], [0, 0, 1, 1], [], []>} : vector<8x128xf32>, vector<128x384xf32>, vector<8x384xf32> -> vector<8x384xf32>
    %c0_112 = arith.constant 0 : index
    %c0_113 = arith.constant 0 : index
    %321 = vector.load %arg10[%c0_112, %c0_113] : memref<1x384xf32, #tpu.memory_space<vmem>>, vector<1x384xf32>
    %322 = vector.broadcast %321 : vector<1x384xf32> to vector<8x384xf32>
    %323 = arith.addf %320, %322 : vector<8x384xf32>
    %324 = vector.extract_strided_slice %323 {offsets = [0, 0], sizes = [8, 128], strides = [1, 1]} : vector<8x384xf32> to vector<8x128xf32>
    %325 = vector.extract_strided_slice %323 {offsets = [0, 128], sizes = [8, 128], strides = [1, 1]} : vector<8x384xf32> to vector<8x128xf32>
    %326 = vector.extract_strided_slice %323 {offsets = [0, 256], sizes = [8, 128], strides = [1, 1]} : vector<8x384xf32> to vector<8x128xf32>
    %c0_114 = arith.constant 0 : index
    %c0_115 = arith.constant 0 : index
    %327 = vector.load %arg11[%c0_114, %c0_115] : memref<1x128xf32, #tpu.memory_space<vmem>>, vector<1x128xf32>
    %328 = vector.shape_cast %327 : vector<1x128xf32> to vector<1x128xf32>
    %329 = vector.broadcast %328 : vector<1x128xf32> to vector<8x128xf32>
    %c0_i32_116 = arith.constant 0 : i32
    %c0_117 = arith.constant 0 : index
    %c0_118 = arith.constant 0 : index
    %330 = vector.load %arg9[%c0_117, %c0_118] : memref<128x384xf32, #tpu.memory_space<vmem>>, vector<128x384xf32>
    %cst_119 = arith.constant dense<0.000000e+00> : vector<8x384xf32>
    %331 = tpu.matmul %313, %330, %cst_119 {dimension_numbers = #tpu.dot_dimension_numbers<[1], [0], [0], [1], [0, 0, 1, 1], [], []>} : vector<8x128xf32>, vector<128x384xf32>, vector<8x384xf32> -> vector<8x384xf32>
    %332 = vector.extract_strided_slice %331 {offsets = [0, 0], sizes = [8, 128], strides = [1, 1]} : vector<8x384xf32> to vector<8x128xf32>
    %333 = arith.addf %324, %332 : vector<8x128xf32>
    %334 = arith.negf %333 : vector<8x128xf32>
    %335 = math.exp %334 : vector<8x128xf32>
    %cst_120 = arith.constant 1.000000e+00 : f32
    %336 = vector.broadcast %cst_120 : f32 to vector<8x128xf32>
    %337 = arith.addf %336, %335 : vector<8x128xf32>
    %338 = arith.divf %336, %337 : vector<8x128xf32>
    %339 = vector.extract_strided_slice %331 {offsets = [0, 128], sizes = [8, 128], strides = [1, 1]} : vector<8x384xf32> to vector<8x128xf32>
    %340 = arith.addf %325, %339 : vector<8x128xf32>
    %341 = arith.negf %340 : vector<8x128xf32>
    %342 = math.exp %341 : vector<8x128xf32>
    %cst_121 = arith.constant 1.000000e+00 : f32
    %343 = vector.broadcast %cst_121 : f32 to vector<8x128xf32>
    %344 = arith.addf %343, %342 : vector<8x128xf32>
    %345 = arith.divf %343, %344 : vector<8x128xf32>
    %346 = vector.extract_strided_slice %331 {offsets = [0, 256], sizes = [8, 128], strides = [1, 1]} : vector<8x384xf32> to vector<8x128xf32>
    %347 = arith.addf %346, %329 : vector<8x128xf32>
    %348 = arith.mulf %338, %347 : vector<8x128xf32>
    %349 = arith.addf %326, %348 : vector<8x128xf32>
    %350 = math.tanh %349 : vector<8x128xf32>
    %cst_122 = arith.constant 1.000000e+00 : f32
    %351 = vector.broadcast %cst_122 : f32 to vector<8x128xf32>
    %352 = arith.subf %351, %345 : vector<8x128xf32>
    %353 = arith.mulf %352, %350 : vector<8x128xf32>
    %354 = arith.mulf %345, %313 : vector<8x128xf32>
    %355 = arith.addf %353, %354 : vector<8x128xf32>
    %356 = arith.index_cast %c0_i32_116 : i32 to index
    %c0_123 = arith.constant 0 : index
    %c0_124 = arith.constant 0 : index
    %357 = vector.load %arg20[%356, %c0_123, %c0_124] : memref<8x8x128xf32, #tpu.memory_space<vmem>>, vector<1x8x128xf32>
    %358 = vector.shape_cast %357 : vector<1x8x128xf32> to vector<8x128xf32>
    %359 = vector.shape_cast %355 : vector<8x128xf32> to vector<1x8x128xf32>
    tpu.vector_store %arg20[%356, %c0_123, %c0_124], %359 {strides = array<i32>} : memref<8x8x128xf32, #tpu.memory_space<vmem>>, vector<1x8x128xf32>,
    %c1_i32_125 = arith.constant 1 : i32
    %c0_126 = arith.constant 0 : index
    %c0_127 = arith.constant 0 : index
    %360 = vector.load %arg9[%c0_126, %c0_127] : memref<128x384xf32, #tpu.memory_space<vmem>>, vector<128x384xf32>
    %cst_128 = arith.constant dense<0.000000e+00> : vector<8x384xf32>
    %361 = tpu.matmul %355, %360, %cst_128 {dimension_numbers = #tpu.dot_dimension_numbers<[1], [0], [0], [1], [0, 0, 1, 1], [], []>} : vector<8x128xf32>, vector<128x384xf32>, vector<8x384xf32> -> vector<8x384xf32>
    %362 = vector.extract_strided_slice %361 {offsets = [0, 0], sizes = [8, 128], strides = [1, 1]} : vector<8x384xf32> to vector<8x128xf32>
    %363 = arith.addf %324, %362 : vector<8x128xf32>
    %364 = arith.negf %363 : vector<8x128xf32>
    %365 = math.exp %364 : vector<8x128xf32>
    %cst_129 = arith.constant 1.000000e+00 : f32
    %366 = vector.broadcast %cst_129 : f32 to vector<8x128xf32>
    %367 = arith.addf %366, %365 : vector<8x128xf32>
    %368 = arith.divf %366, %367 : vector<8x128xf32>
    %369 = vector.extract_strided_slice %361 {offsets = [0, 128], sizes = [8, 128], strides = [1, 1]} : vector<8x384xf32> to vector<8x128xf32>
    %370 = arith.addf %325, %369 : vector<8x128xf32>
    %371 = arith.negf %370 : vector<8x128xf32>
    %372 = math.exp %371 : vector<8x128xf32>
    %cst_130 = arith.constant 1.000000e+00 : f32
    %373 = vector.broadcast %cst_130 : f32 to vector<8x128xf32>
    %374 = arith.addf %373, %372 : vector<8x128xf32>
    %375 = arith.divf %373, %374 : vector<8x128xf32>
    %376 = vector.extract_strided_slice %361 {offsets = [0, 256], sizes = [8, 128], strides = [1, 1]} : vector<8x384xf32> to vector<8x128xf32>
    %377 = arith.addf %376, %329 : vector<8x128xf32>
    %378 = arith.mulf %368, %377 : vector<8x128xf32>
    %379 = arith.addf %326, %378 : vector<8x128xf32>
    %380 = math.tanh %379 : vector<8x128xf32>
    %cst_131 = arith.constant 1.000000e+00 : f32
    %381 = vector.broadcast %cst_131 : f32 to vector<8x128xf32>
    %382 = arith.subf %381, %375 : vector<8x128xf32>
    %383 = arith.mulf %382, %380 : vector<8x128xf32>
    %384 = arith.mulf %375, %355 : vector<8x128xf32>
    %385 = arith.addf %383, %384 : vector<8x128xf32>
    %386 = arith.index_cast %c1_i32_125 : i32 to index
    %c0_132 = arith.constant 0 : index
    %c0_133 = arith.constant 0 : index
    %387 = vector.load %arg20[%386, %c0_132, %c0_133] : memref<8x8x128xf32, #tpu.memory_space<vmem>>, vector<1x8x128xf32>
    %388 = vector.shape_cast %387 : vector<1x8x128xf32> to vector<8x128xf32>
    %389 = vector.shape_cast %385 : vector<8x128xf32> to vector<1x8x128xf32>
    tpu.vector_store %arg20[%386, %c0_132, %c0_133], %389 {strides = array<i32>} : memref<8x8x128xf32, #tpu.memory_space<vmem>>, vector<1x8x128xf32>,
    %c2_i32_134 = arith.constant 2 : i32
    %c0_135 = arith.constant 0 : index
    %c0_136 = arith.constant 0 : index
    %390 = vector.load %arg9[%c0_135, %c0_136] : memref<128x384xf32, #tpu.memory_space<vmem>>, vector<128x384xf32>
    %cst_137 = arith.constant dense<0.000000e+00> : vector<8x384xf32>
    %391 = tpu.matmul %385, %390, %cst_137 {dimension_numbers = #tpu.dot_dimension_numbers<[1], [0], [0], [1], [0, 0, 1, 1], [], []>} : vector<8x128xf32>, vector<128x384xf32>, vector<8x384xf32> -> vector<8x384xf32>
    %392 = vector.extract_strided_slice %391 {offsets = [0, 0], sizes = [8, 128], strides = [1, 1]} : vector<8x384xf32> to vector<8x128xf32>
    %393 = arith.addf %324, %392 : vector<8x128xf32>
    %394 = arith.negf %393 : vector<8x128xf32>
    %395 = math.exp %394 : vector<8x128xf32>
    %cst_138 = arith.constant 1.000000e+00 : f32
    %396 = vector.broadcast %cst_138 : f32 to vector<8x128xf32>
    %397 = arith.addf %396, %395 : vector<8x128xf32>
    %398 = arith.divf %396, %397 : vector<8x128xf32>
    %399 = vector.extract_strided_slice %391 {offsets = [0, 128], sizes = [8, 128], strides = [1, 1]} : vector<8x384xf32> to vector<8x128xf32>
    %400 = arith.addf %325, %399 : vector<8x128xf32>
    %401 = arith.negf %400 : vector<8x128xf32>
    %402 = math.exp %401 : vector<8x128xf32>
    %cst_139 = arith.constant 1.000000e+00 : f32
    %403 = vector.broadcast %cst_139 : f32 to vector<8x128xf32>
    %404 = arith.addf %403, %402 : vector<8x128xf32>
    %405 = arith.divf %403, %404 : vector<8x128xf32>
    %406 = vector.extract_strided_slice %391 {offsets = [0, 256], sizes = [8, 128], strides = [1, 1]} : vector<8x384xf32> to vector<8x128xf32>
    %407 = arith.addf %406, %329 : vector<8x128xf32>
    %408 = arith.mulf %398, %407 : vector<8x128xf32>
    %409 = arith.addf %326, %408 : vector<8x128xf32>
    %410 = math.tanh %409 : vector<8x128xf32>
    %cst_140 = arith.constant 1.000000e+00 : f32
    %411 = vector.broadcast %cst_140 : f32 to vector<8x128xf32>
    %412 = arith.subf %411, %405 : vector<8x128xf32>
    %413 = arith.mulf %412, %410 : vector<8x128xf32>
    %414 = arith.mulf %405, %385 : vector<8x128xf32>
    %415 = arith.addf %413, %414 : vector<8x128xf32>
    %416 = arith.index_cast %c2_i32_134 : i32 to index
    %c0_141 = arith.constant 0 : index
    %c0_142 = arith.constant 0 : index
    %417 = vector.load %arg20[%416, %c0_141, %c0_142] : memref<8x8x128xf32, #tpu.memory_space<vmem>>, vector<1x8x128xf32>
    %418 = vector.shape_cast %417 : vector<1x8x128xf32> to vector<8x128xf32>
    %419 = vector.shape_cast %415 : vector<8x128xf32> to vector<1x8x128xf32>
    tpu.vector_store %arg20[%416, %c0_141, %c0_142], %419 {strides = array<i32>} : memref<8x8x128xf32, #tpu.memory_space<vmem>>, vector<1x8x128xf32>,
    %c3_i32_143 = arith.constant 3 : i32
    %c0_144 = arith.constant 0 : index
    %c0_145 = arith.constant 0 : index
    %420 = vector.load %arg9[%c0_144, %c0_145] : memref<128x384xf32, #tpu.memory_space<vmem>>, vector<128x384xf32>
    %cst_146 = arith.constant dense<0.000000e+00> : vector<8x384xf32>
    %421 = tpu.matmul %415, %420, %cst_146 {dimension_numbers = #tpu.dot_dimension_numbers<[1], [0], [0], [1], [0, 0, 1, 1], [], []>} : vector<8x128xf32>, vector<128x384xf32>, vector<8x384xf32> -> vector<8x384xf32>
    %422 = vector.extract_strided_slice %421 {offsets = [0, 0], sizes = [8, 128], strides = [1, 1]} : vector<8x384xf32> to vector<8x128xf32>
    %423 = arith.addf %324, %422 : vector<8x128xf32>
    %424 = arith.negf %423 : vector<8x128xf32>
    %425 = math.exp %424 : vector<8x128xf32>
    %cst_147 = arith.constant 1.000000e+00 : f32
    %426 = vector.broadcast %cst_147 : f32 to vector<8x128xf32>
    %427 = arith.addf %426, %425 : vector<8x128xf32>
    %428 = arith.divf %426, %427 : vector<8x128xf32>
    %429 = vector.extract_strided_slice %421 {offsets = [0, 128], sizes = [8, 128], strides = [1, 1]} : vector<8x384xf32> to vector<8x128xf32>
    %430 = arith.addf %325, %429 : vector<8x128xf32>
    %431 = arith.negf %430 : vector<8x128xf32>
    %432 = math.exp %431 : vector<8x128xf32>
    %cst_148 = arith.constant 1.000000e+00 : f32
    %433 = vector.broadcast %cst_148 : f32 to vector<8x128xf32>
    %434 = arith.addf %433, %432 : vector<8x128xf32>
    %435 = arith.divf %433, %434 : vector<8x128xf32>
    %436 = vector.extract_strided_slice %421 {offsets = [0, 256], sizes = [8, 128], strides = [1, 1]} : vector<8x384xf32> to vector<8x128xf32>
    %437 = arith.addf %436, %329 : vector<8x128xf32>
    %438 = arith.mulf %428, %437 : vector<8x128xf32>
    %439 = arith.addf %326, %438 : vector<8x128xf32>
    %440 = math.tanh %439 : vector<8x128xf32>
    %cst_149 = arith.constant 1.000000e+00 : f32
    %441 = vector.broadcast %cst_149 : f32 to vector<8x128xf32>
    %442 = arith.subf %441, %435 : vector<8x128xf32>
    %443 = arith.mulf %442, %440 : vector<8x128xf32>
    %444 = arith.mulf %435, %415 : vector<8x128xf32>
    %445 = arith.addf %443, %444 : vector<8x128xf32>
    %446 = arith.index_cast %c3_i32_143 : i32 to index
    %c0_150 = arith.constant 0 : index
    %c0_151 = arith.constant 0 : index
    %447 = vector.load %arg20[%446, %c0_150, %c0_151] : memref<8x8x128xf32, #tpu.memory_space<vmem>>, vector<1x8x128xf32>
    %448 = vector.shape_cast %447 : vector<1x8x128xf32> to vector<8x128xf32>
    %449 = vector.shape_cast %445 : vector<8x128xf32> to vector<1x8x128xf32>
    tpu.vector_store %arg20[%446, %c0_150, %c0_151], %449 {strides = array<i32>} : memref<8x8x128xf32, #tpu.memory_space<vmem>>, vector<1x8x128xf32>,
    %c4_i32_152 = arith.constant 4 : i32
    %c0_153 = arith.constant 0 : index
    %c0_154 = arith.constant 0 : index
    %450 = vector.load %arg9[%c0_153, %c0_154] : memref<128x384xf32, #tpu.memory_space<vmem>>, vector<128x384xf32>
    %cst_155 = arith.constant dense<0.000000e+00> : vector<8x384xf32>
    %451 = tpu.matmul %445, %450, %cst_155 {dimension_numbers = #tpu.dot_dimension_numbers<[1], [0], [0], [1], [0, 0, 1, 1], [], []>} : vector<8x128xf32>, vector<128x384xf32>, vector<8x384xf32> -> vector<8x384xf32>
    %452 = vector.extract_strided_slice %451 {offsets = [0, 0], sizes = [8, 128], strides = [1, 1]} : vector<8x384xf32> to vector<8x128xf32>
    %453 = arith.addf %324, %452 : vector<8x128xf32>
    %454 = arith.negf %453 : vector<8x128xf32>
    %455 = math.exp %454 : vector<8x128xf32>
    %cst_156 = arith.constant 1.000000e+00 : f32
    %456 = vector.broadcast %cst_156 : f32 to vector<8x128xf32>
    %457 = arith.addf %456, %455 : vector<8x128xf32>
    %458 = arith.divf %456, %457 : vector<8x128xf32>
    %459 = vector.extract_strided_slice %451 {offsets = [0, 128], sizes = [8, 128], strides = [1, 1]} : vector<8x384xf32> to vector<8x128xf32>
    %460 = arith.addf %325, %459 : vector<8x128xf32>
    %461 = arith.negf %460 : vector<8x128xf32>
    %462 = math.exp %461 : vector<8x128xf32>
    %cst_157 = arith.constant 1.000000e+00 : f32
    %463 = vector.broadcast %cst_157 : f32 to vector<8x128xf32>
    %464 = arith.addf %463, %462 : vector<8x128xf32>
    %465 = arith.divf %463, %464 : vector<8x128xf32>
    %466 = vector.extract_strided_slice %451 {offsets = [0, 256], sizes = [8, 128], strides = [1, 1]} : vector<8x384xf32> to vector<8x128xf32>
    %467 = arith.addf %466, %329 : vector<8x128xf32>
    %468 = arith.mulf %458, %467 : vector<8x128xf32>
    %469 = arith.addf %326, %468 : vector<8x128xf32>
    %470 = math.tanh %469 : vector<8x128xf32>
    %cst_158 = arith.constant 1.000000e+00 : f32
    %471 = vector.broadcast %cst_158 : f32 to vector<8x128xf32>
    %472 = arith.subf %471, %465 : vector<8x128xf32>
    %473 = arith.mulf %472, %470 : vector<8x128xf32>
    %474 = arith.mulf %465, %445 : vector<8x128xf32>
    %475 = arith.addf %473, %474 : vector<8x128xf32>
    %476 = arith.index_cast %c4_i32_152 : i32 to index
    %c0_159 = arith.constant 0 : index
    %c0_160 = arith.constant 0 : index
    %477 = vector.load %arg20[%476, %c0_159, %c0_160] : memref<8x8x128xf32, #tpu.memory_space<vmem>>, vector<1x8x128xf32>
    %478 = vector.shape_cast %477 : vector<1x8x128xf32> to vector<8x128xf32>
    %479 = vector.shape_cast %475 : vector<8x128xf32> to vector<1x8x128xf32>
    tpu.vector_store %arg20[%476, %c0_159, %c0_160], %479 {strides = array<i32>} : memref<8x8x128xf32, #tpu.memory_space<vmem>>, vector<1x8x128xf32>,
    %c5_i32_161 = arith.constant 5 : i32
    %c0_162 = arith.constant 0 : index
    %c0_163 = arith.constant 0 : index
    %480 = vector.load %arg9[%c0_162, %c0_163] : memref<128x384xf32, #tpu.memory_space<vmem>>, vector<128x384xf32>
    %cst_164 = arith.constant dense<0.000000e+00> : vector<8x384xf32>
    %481 = tpu.matmul %475, %480, %cst_164 {dimension_numbers = #tpu.dot_dimension_numbers<[1], [0], [0], [1], [0, 0, 1, 1], [], []>} : vector<8x128xf32>, vector<128x384xf32>, vector<8x384xf32> -> vector<8x384xf32>
    %482 = vector.extract_strided_slice %481 {offsets = [0, 0], sizes = [8, 128], strides = [1, 1]} : vector<8x384xf32> to vector<8x128xf32>
    %483 = arith.addf %324, %482 : vector<8x128xf32>
    %484 = arith.negf %483 : vector<8x128xf32>
    %485 = math.exp %484 : vector<8x128xf32>
    %cst_165 = arith.constant 1.000000e+00 : f32
    %486 = vector.broadcast %cst_165 : f32 to vector<8x128xf32>
    %487 = arith.addf %486, %485 : vector<8x128xf32>
    %488 = arith.divf %486, %487 : vector<8x128xf32>
    %489 = vector.extract_strided_slice %481 {offsets = [0, 128], sizes = [8, 128], strides = [1, 1]} : vector<8x384xf32> to vector<8x128xf32>
    %490 = arith.addf %325, %489 : vector<8x128xf32>
    %491 = arith.negf %490 : vector<8x128xf32>
    %492 = math.exp %491 : vector<8x128xf32>
    %cst_166 = arith.constant 1.000000e+00 : f32
    %493 = vector.broadcast %cst_166 : f32 to vector<8x128xf32>
    %494 = arith.addf %493, %492 : vector<8x128xf32>
    %495 = arith.divf %493, %494 : vector<8x128xf32>
    %496 = vector.extract_strided_slice %481 {offsets = [0, 256], sizes = [8, 128], strides = [1, 1]} : vector<8x384xf32> to vector<8x128xf32>
    %497 = arith.addf %496, %329 : vector<8x128xf32>
    %498 = arith.mulf %488, %497 : vector<8x128xf32>
    %499 = arith.addf %326, %498 : vector<8x128xf32>
    %500 = math.tanh %499 : vector<8x128xf32>
    %cst_167 = arith.constant 1.000000e+00 : f32
    %501 = vector.broadcast %cst_167 : f32 to vector<8x128xf32>
    %502 = arith.subf %501, %495 : vector<8x128xf32>
    %503 = arith.mulf %502, %500 : vector<8x128xf32>
    %504 = arith.mulf %495, %475 : vector<8x128xf32>
    %505 = arith.addf %503, %504 : vector<8x128xf32>
    %506 = arith.index_cast %c5_i32_161 : i32 to index
    %c0_168 = arith.constant 0 : index
    %c0_169 = arith.constant 0 : index
    %507 = vector.load %arg20[%506, %c0_168, %c0_169] : memref<8x8x128xf32, #tpu.memory_space<vmem>>, vector<1x8x128xf32>
    %508 = vector.shape_cast %507 : vector<1x8x128xf32> to vector<8x128xf32>
    %509 = vector.shape_cast %505 : vector<8x128xf32> to vector<1x8x128xf32>
    tpu.vector_store %arg20[%506, %c0_168, %c0_169], %509 {strides = array<i32>} : memref<8x8x128xf32, #tpu.memory_space<vmem>>, vector<1x8x128xf32>,
    %c6_i32_170 = arith.constant 6 : i32
    %c0_171 = arith.constant 0 : index
    %c0_172 = arith.constant 0 : index
    %510 = vector.load %arg9[%c0_171, %c0_172] : memref<128x384xf32, #tpu.memory_space<vmem>>, vector<128x384xf32>
    %cst_173 = arith.constant dense<0.000000e+00> : vector<8x384xf32>
    %511 = tpu.matmul %505, %510, %cst_173 {dimension_numbers = #tpu.dot_dimension_numbers<[1], [0], [0], [1], [0, 0, 1, 1], [], []>} : vector<8x128xf32>, vector<128x384xf32>, vector<8x384xf32> -> vector<8x384xf32>
    %512 = vector.extract_strided_slice %511 {offsets = [0, 0], sizes = [8, 128], strides = [1, 1]} : vector<8x384xf32> to vector<8x128xf32>
    %513 = arith.addf %324, %512 : vector<8x128xf32>
    %514 = arith.negf %513 : vector<8x128xf32>
    %515 = math.exp %514 : vector<8x128xf32>
    %cst_174 = arith.constant 1.000000e+00 : f32
    %516 = vector.broadcast %cst_174 : f32 to vector<8x128xf32>
    %517 = arith.addf %516, %515 : vector<8x128xf32>
    %518 = arith.divf %516, %517 : vector<8x128xf32>
    %519 = vector.extract_strided_slice %511 {offsets = [0, 128], sizes = [8, 128], strides = [1, 1]} : vector<8x384xf32> to vector<8x128xf32>
    %520 = arith.addf %325, %519 : vector<8x128xf32>
    %521 = arith.negf %520 : vector<8x128xf32>
    %522 = math.exp %521 : vector<8x128xf32>
    %cst_175 = arith.constant 1.000000e+00 : f32
    %523 = vector.broadcast %cst_175 : f32 to vector<8x128xf32>
    %524 = arith.addf %523, %522 : vector<8x128xf32>
    %525 = arith.divf %523, %524 : vector<8x128xf32>
    %526 = vector.extract_strided_slice %511 {offsets = [0, 256], sizes = [8, 128], strides = [1, 1]} : vector<8x384xf32> to vector<8x128xf32>
    %527 = arith.addf %526, %329 : vector<8x128xf32>
    %528 = arith.mulf %518, %527 : vector<8x128xf32>
    %529 = arith.addf %326, %528 : vector<8x128xf32>
    %530 = math.tanh %529 : vector<8x128xf32>
    %cst_176 = arith.constant 1.000000e+00 : f32
    %531 = vector.broadcast %cst_176 : f32 to vector<8x128xf32>
    %532 = arith.subf %531, %525 : vector<8x128xf32>
    %533 = arith.mulf %532, %530 : vector<8x128xf32>
    %534 = arith.mulf %525, %505 : vector<8x128xf32>
    %535 = arith.addf %533, %534 : vector<8x128xf32>
    %536 = arith.index_cast %c6_i32_170 : i32 to index
    %c0_177 = arith.constant 0 : index
    %c0_178 = arith.constant 0 : index
    %537 = vector.load %arg20[%536, %c0_177, %c0_178] : memref<8x8x128xf32, #tpu.memory_space<vmem>>, vector<1x8x128xf32>
    %538 = vector.shape_cast %537 : vector<1x8x128xf32> to vector<8x128xf32>
    %539 = vector.shape_cast %535 : vector<8x128xf32> to vector<1x8x128xf32>
    tpu.vector_store %arg20[%536, %c0_177, %c0_178], %539 {strides = array<i32>} : memref<8x8x128xf32, #tpu.memory_space<vmem>>, vector<1x8x128xf32>,
    %c7_i32_179 = arith.constant 7 : i32
    %c0_180 = arith.constant 0 : index
    %c0_181 = arith.constant 0 : index
    %540 = vector.load %arg9[%c0_180, %c0_181] : memref<128x384xf32, #tpu.memory_space<vmem>>, vector<128x384xf32>
    %cst_182 = arith.constant dense<0.000000e+00> : vector<8x384xf32>
    %541 = tpu.matmul %535, %540, %cst_182 {dimension_numbers = #tpu.dot_dimension_numbers<[1], [0], [0], [1], [0, 0, 1, 1], [], []>} : vector<8x128xf32>, vector<128x384xf32>, vector<8x384xf32> -> vector<8x384xf32>
    %542 = vector.extract_strided_slice %541 {offsets = [0, 0], sizes = [8, 128], strides = [1, 1]} : vector<8x384xf32> to vector<8x128xf32>
    %543 = arith.addf %324, %542 : vector<8x128xf32>
    %544 = arith.negf %543 : vector<8x128xf32>
    %545 = math.exp %544 : vector<8x128xf32>
    %cst_183 = arith.constant 1.000000e+00 : f32
    %546 = vector.broadcast %cst_183 : f32 to vector<8x128xf32>
    %547 = arith.addf %546, %545 : vector<8x128xf32>
    %548 = arith.divf %546, %547 : vector<8x128xf32>
    %549 = vector.extract_strided_slice %541 {offsets = [0, 128], sizes = [8, 128], strides = [1, 1]} : vector<8x384xf32> to vector<8x128xf32>
    %550 = arith.addf %325, %549 : vector<8x128xf32>
    %551 = arith.negf %550 : vector<8x128xf32>
    %552 = math.exp %551 : vector<8x128xf32>
    %cst_184 = arith.constant 1.000000e+00 : f32
    %553 = vector.broadcast %cst_184 : f32 to vector<8x128xf32>
    %554 = arith.addf %553, %552 : vector<8x128xf32>
    %555 = arith.divf %553, %554 : vector<8x128xf32>
    %556 = vector.extract_strided_slice %541 {offsets = [0, 256], sizes = [8, 128], strides = [1, 1]} : vector<8x384xf32> to vector<8x128xf32>
    %557 = arith.addf %556, %329 : vector<8x128xf32>
    %558 = arith.mulf %548, %557 : vector<8x128xf32>
    %559 = arith.addf %326, %558 : vector<8x128xf32>
    %560 = math.tanh %559 : vector<8x128xf32>
    %cst_185 = arith.constant 1.000000e+00 : f32
    %561 = vector.broadcast %cst_185 : f32 to vector<8x128xf32>
    %562 = arith.subf %561, %555 : vector<8x128xf32>
    %563 = arith.mulf %562, %560 : vector<8x128xf32>
    %564 = arith.mulf %555, %535 : vector<8x128xf32>
    %565 = arith.addf %563, %564 : vector<8x128xf32>
    %566 = arith.index_cast %c7_i32_179 : i32 to index
    %c0_186 = arith.constant 0 : index
    %c0_187 = arith.constant 0 : index
    %567 = vector.load %arg20[%566, %c0_186, %c0_187] : memref<8x8x128xf32, #tpu.memory_space<vmem>>, vector<1x8x128xf32>
    %568 = vector.shape_cast %567 : vector<1x8x128xf32> to vector<8x128xf32>
    %569 = vector.shape_cast %565 : vector<8x128xf32> to vector<1x8x128xf32>
    tpu.vector_store %arg20[%566, %c0_186, %c0_187], %569 {strides = array<i32>} : memref<8x8x128xf32, #tpu.memory_space<vmem>>, vector<1x8x128xf32>,
    %c8_i32_188 = arith.constant 8 : i32
    %c0_189 = arith.constant 0 : index
    %c0_190 = arith.constant 0 : index
    %c0_191 = arith.constant 0 : index
    %570 = vector.load %arg20[%c0_189, %c0_190, %c0_191] : memref<8x8x128xf32, #tpu.memory_space<vmem>>, vector<8x8x128xf32>
    %571 = vector.shape_cast %570 : vector<8x8x128xf32> to vector<64x128xf32>
    %c0_192 = arith.constant 0 : index
    %c0_193 = arith.constant 0 : index
    %572 = vector.load %arg12[%c0_192, %c0_193] : memref<128x128xf32, #tpu.memory_space<vmem>>, vector<128x128xf32>
    %cst_194 = arith.constant dense<0.000000e+00> : vector<64x128xf32>
    %573 = tpu.matmul %571, %572, %cst_194 {dimension_numbers = #tpu.dot_dimension_numbers<[1], [0], [0], [1], [0, 0, 1, 1], [], []>} : vector<64x128xf32>, vector<128x128xf32>, vector<64x128xf32> -> vector<64x128xf32>
    %c0_195 = arith.constant 0 : index
    %c0_196 = arith.constant 0 : index
    %574 = vector.load %arg13[%c0_195, %c0_196] : memref<1x128xf32, #tpu.memory_space<vmem>>, vector<1x128xf32>
    %575 = vector.broadcast %574 : vector<1x128xf32> to vector<64x128xf32>
    %576 = arith.addf %573, %575 : vector<64x128xf32>
    %577 = vector.shape_cast %576 : vector<64x128xf32> to vector<8x8x128xf32>
    %c0_197 = arith.constant 0 : index
    %c0_198 = arith.constant 0 : index
    %c0_199 = arith.constant 0 : index
    %578 = vector.load %arg18[%c0_197, %c0_198, %c0_199] : memref<8x8x128xf32, #tpu.memory_space<vmem>>, vector<8x8x128xf32>
    tpu.vector_store %arg18[%c0_197, %c0_198, %c0_199], %577 {strides = array<i32>} : memref<8x8x128xf32, #tpu.memory_space<vmem>>, vector<8x8x128xf32>,
    return
  }
}

</mosaic_0001>

<bundles_post_ra>
// kernel: _lambda_.1
= control target key start
LH: loop header
LB: loop body
LE: loop exit
PB: predicated region body
PF: predicated region fallthrough
CT: control target
= control target key end

     0   :  { %s6108_s2 = inlined_call_operand.vmem [shape: f32[128,384], index: 2, kind: input, shape index: {}]   ;;  %s6109_s3 = inlined_call_operand.vmem [shape: f32[128,384], index: 3, kind: input, shape index: {}]   ;;  %s6110_s0 = inlined_call_operand.vmem [shape: f32[8,8,128], index: 0, kind: input, shape index: {}]   ;;  %s6111_s5 = inlined_call_operand.vmem [shape: f32[1,128], index: 5, kind: input, shape index: {}]   ;;  %s6112_s4 = inlined_call_operand.vmem [shape: f32[1,384], index: 4, kind: input, shape index: {}]   ;;  %s6113_s14 = inlined_call_operand.vmem [shape: f32[8,8,128], index: 14, kind: output, shape index: {0}]   ;;  %s6114_s6 = inlined_call_operand.vmem [shape: f32[128,256], index: 6, kind: input, shape index: {}]   ;;  %s6115_s8 = inlined_call_operand.vmem [shape: f32[128,384], index: 8, kind: input, shape index: {}]   ;;  %s6116_s9 = inlined_call_operand.vmem [shape: f32[128,384], index: 9, kind: input, shape index: {}]   ;;  %s6117_s7 = inlined_call_operand.vmem [shape: f32[1,256], index: 7, kind: input, shape index: {}]   ;;  %s6118_s15 = inlined_call_operand.vmem [shape: f32[8,128], index: 15, kind: output, shape index: {1}]   ;;  %s6119_s16 = inlined_call_operand.vmem [shape: f32[8,128], index: 16, kind: output, shape index: {2}]   ;;  %s6120_s1 = inlined_call_operand.vmem [shape: f32[8,128], index: 1, kind: input, shape index: {}]   ;;  %s6121_s11 = inlined_call_operand.vmem [shape: f32[1,128], index: 11, kind: input, shape index: {}]   ;;  %s6122_s17 = inlined_call_operand.vmem [shape: f32[8,128], index: 17, kind: output, shape index: {3}]   ;;  %s6123_s10 = inlined_call_operand.vmem [shape: f32[1,384], index: 10, kind: input, shape index: {}]   ;;  %s6124_s12 = inlined_call_operand.vmem [shape: f32[128,128], index: 12, kind: input, shape index: {}]   ;;  %s6125_s13 = inlined_call_operand.vmem [shape: f32[1,128], index: 13, kind: input, shape index: {}]   ;;  %s6126_s18 = inlined_call_operand.vmem [shape: f32[8,8,128], index: 18, kind: output, shape index: {4}]  }
   0x1   :  { %6138 = sst [smem:[#allocation9_spill]] %s6108_s2 }
   0x2   :  { %6139 = sst [smem:[#allocation10_spill]] %s6109_s3 }
   0x3   :  { %6140 = sst [smem:[#allocation11_spill]] %s6110_s0 }
   0x4   :  { %s6141_s29 = sld [smem:[#allocation9_spill]] }
   0x5   :  { %s6142_s22 = sld [smem:[#allocation10_spill]] }
   0x6   :  { %s6143_s24 = sld [smem:[#allocation11_spill]] }
   0xa   :  { %v105_v0 = vld [vmem:[%s6141_s29 + $0x168] sm:$0xff]  ;;  %v102_v1 = vld [vmem:[%s6141_s29 + $0x150] sm:$0xff]  ;;  %v99_v2 = vld [vmem:[%s6141_s29 + $0x138] sm:$0xff] }
   0xb   :  { %116 = vmatpush.msra.mxu0 %v105_v0  ;;  %v96_v3 = vld [vmem:[%s6141_s29 + $0x120] sm:$0xff]  ;;  %v93_v4 = vld [vmem:[%s6141_s29 + $0x108] sm:$0xff]  ;;  %v90_v5 = vld [vmem:[%s6141_s29 + $0xf0] sm:$0xff]  ;;  %v3336_v0 = vmov 0.0  }
   0xc   :  { %v87_v6 = vld [vmem:[%s6141_s29 + $0xd8] sm:$0xff]  ;;  %v84_v7 = vld [vmem:[%s6141_s29 + $0xc0] sm:$0xff]  ;;  %v81_v8 = vld [vmem:[%s6141_s29 + $0xa8] sm:$0xff] }
   0xd   :  { %117 = vmatpush.msra.mxu0 %v102_v1  ;;  %v78_v9 = vld [vmem:[%s6141_s29 + $0x90] sm:$0xff]  ;;  %v75_v11 = vld [vmem:[%s6141_s29 + $0x78] sm:$0xff]  ;;  %v72_v12 = vld [vmem:[%s6141_s29 + $0x60] sm:$0xff] }
   0xe   :  { %v3465_v10 = vld [vmem:[%s6142_s22 + $0x170] sm:$0xff]  ;;  %v69_v13 = vld [vmem:[%s6141_s29 + $0x48] sm:$0xff]  ;;  %v3483_v15 = vld [vmem:[%s6142_s22 + $0x158] sm:$0xff] }
   0xf   :  { %118 = vmatpush.msra.mxu0 %v99_v2  ;;  %335 = vmatpush.msra.mxu3 %v3465_v10  ;;  %v66_v14 = vld [vmem:[%s6141_s29 + $0x30] sm:$0xff]  ;;  %v3492_v17 = vld [vmem:[%s6142_s22 + $0x140] sm:$0xff]  ;;  %v103_v18 = vld [vmem:[%s6141_s29 + $0x158] sm:$0xff] }
  0x10   :  { %v106_v16 = vld [vmem:[%s6141_s29 + $0x170] sm:$0xff]  ;;  %v63_v19 = vld [vmem:[%s6141_s29 + $0x18] sm:$0xff]  ;;  %v3503_v20 = vld [vmem:[%s6142_s22 + $0x128] sm:$0xff] }
  0x11   :  { %119 = vmatpush.msra.mxu0 %v96_v3  ;;  %336 = vmatpush.msra.mxu3 %v3483_v15  ;;  %v100_v21 = vld [vmem:[%s6141_s29 + $0x140] sm:$0xff]  ;;  %v3515_v23 = vld [vmem:[%s6142_s22 + $0x110] sm:$0xff]  ;;  %v3526_v25 = vld [vmem:[%s6142_s22 + $0x168] sm:$0xff] }
  0x12   :  { %157 = vmatpush.msra.mxu1 %v106_v16  ;;  %v60_v22 = vld [vmem:[%s6141_s29] sm:$0xff]  ;;  %v3533_v26 = vld [vmem:[%s6142_s22 + $0x150] sm:$0xff]  ;;  %v97_v27 = vld [vmem:[%s6141_s29 + $0x128] sm:$0xff] }
  0x13   :  { %120 = vmatpush.msra.mxu0 %v93_v4  ;;  %337 = vmatpush.msra.mxu3 %v3492_v17  ;;  %v3520_v24 = vld [vmem:[%s6143_s24] sm:$0xff]  ;;  %v3541_v28 = vld [vmem:[%s6142_s22 + $0xf8] sm:$0xff]  ;;  %v94_v29 = vld [vmem:[%s6141_s29 + $0x110] sm:$0xff] }
  0x14   :  { %158 = vmatpush.msra.mxu1 %v103_v18  ;;  %v3550_v30 = vld [vmem:[%s6142_s22 + $0xe0] sm:$0xff]  ;;  %v3555_v31 = vld [vmem:[%s6142_s22 + $0x138] sm:$0xff]  ;;  %v3565_v33 = vld [vmem:[%s6142_s22 + $0xc8] sm:$0xff] }
  0x15   :  { %121 = vmatpush.msra.mxu0 %v90_v5  ;;  %338 = vmatpush.msra.mxu3 %v3503_v20  ;;  %v91_v32 = vld [vmem:[%s6141_s29 + $0xf8] sm:$0xff]  ;;  %v3570_v34 = vld [vmem:[%s6142_s22 + $0x120] sm:$0xff]  ;;  %v3579_v36 = vld [vmem:[%s6143_s24 + $0x8] sm:$0xff] }
  0x16   :  { %159 = vmatpush.msra.mxu1 %v100_v21  ;;  %v88_v35 = vld [vmem:[%s6141_s29 + $0xe0] sm:$0xff]  ;;  %v3585_v37 = vld [vmem:[%s6142_s22 + $0xb0] sm:$0xff]  ;;  %v3590_v38 = vld [vmem:[%s6142_s22 + $0x108] sm:$0xff] }
  0x17   :  { %122 = vmatpush.msra.mxu0 %v87_v6  ;;  %339 = vmatpush.msra.mxu3 %v3515_v23  ;;  %v3598_v39 = vld [vmem:[%s6142_s22 + $0xf0] sm:$0xff]  ;;  %v85_v40 = vld [vmem:[%s6141_s29 + $0xc8] sm:$0xff]  ;;  %v3607_v41 = vld [vmem:[%s6142_s22 + $0x98] sm:$0xff] }
  0x18   :  { %160 = vmatpush.msra.mxu1 %v97_v27  ;;  %v82_v42 = vld [vmem:[%s6141_s29 + $0xb0] sm:$0xff]  ;;  %v3616_v43 = vld [vmem:[%s6142_s22 + $0x80] sm:$0xff]  ;;  %v3621_v44 = vld [vmem:[%s6142_s22 + $0xd8] sm:$0xff] }
  0x19   :  { %123 = vmatpush.msra.mxu0 %v84_v7  ;;  %340 = vmatpush.msra.mxu3 %v3541_v28  ;;  %v79_v45 = vld [vmem:[%s6141_s29 + $0x98] sm:$0xff]  ;;  %v3631_v46 = vld [vmem:[%s6142_s22 + $0x68] sm:$0xff]  ;;  %v3636_v47 = vld [vmem:[%s6142_s22 + $0xc0] sm:$0xff] }
  0x1a   :  { %161 = vmatpush.msra.mxu1 %v94_v29  ;;  %v76_v48 = vld [vmem:[%s6141_s29 + $0x80] sm:$0xff]  ;;  %v3645_v49 = vld [vmem:[%s6143_s24 + $0x10] sm:$0xff]  ;;  %v3656_v51 = vld [vmem:[%s6142_s22 + $0xa8] sm:$0xff] }
  0x1b   :  { %124 = vmatpush.msra.mxu0 %v81_v8  ;;  %341 = vmatpush.msra.mxu3 %v3550_v30  ;;  %v3651_v50 = vld [vmem:[%s6142_s22 + $0x50] sm:$0xff]  ;;  %v73_v53 = vld [vmem:[%s6141_s29 + $0x68] sm:$0xff]  ;;  %v3673_v54 = vld [vmem:[%s6142_s22 + $0x38] sm:$0xff] }
  0x1c   :  { %162 = vmatpush.msra.mxu1 %v91_v32  ;;  %v3664_v52 = vld [vmem:[%s6142_s22 + $0x90] sm:$0xff]  ;;  %v3682_v56 = vld [vmem:[%s6142_s22 + $0x20] sm:$0xff]  ;;  %v3687_v57 = vld [vmem:[%s6142_s22 + $0x78] sm:$0xff] }
  0x1d   :  { %125 = vmatpush.msra.mxu0 %v78_v9  ;;  %342 = vmatpush.msra.mxu3 %v3565_v33  ;;  %v70_v55 = vld [vmem:[%s6141_s29 + $0x50] sm:$0xff]  ;;  %v67_v58 = vld [vmem:[%s6141_s29 + $0x38] sm:$0xff]  ;;  %v3697_v59 = vld [vmem:[%s6142_s22 + $0x8] sm:$0xff] }
  0x1e   :  { %163 = vmatpush.msra.mxu1 %v88_v35  ;;  %v3702_v60 = vld [vmem:[%s6142_s22 + $0x60] sm:$0xff]  ;;  %v3708_v61 = vld [vmem:[%s6143_s24 + $0x18] sm:$0xff]  ;;  %v3717_v63 = vld [vmem:[%s6142_s22 + $0x48] sm:$0xff] }
  0x1f   :  { %126 = vmatpush.msra.mxu0 %v75_v11  ;;  %343 = vmatpush.msra.mxu3 %v3585_v37  ;;  %v64_v62 = vld [vmem:[%s6141_s29 + $0x20] sm:$0xff]  ;;  %v3726_v1 = vld [vmem:[%s6142_s22 + $0x30] sm:$0xff]  ;;  %v61_v2 = vld [vmem:[%s6141_s29 + $0x8] sm:$0xff] }
  0x20   :  { %164 = vmatpush.msra.mxu1 %v85_v40  ;;  %v107_v3 = vld [vmem:[%s6141_s29 + $0x178] sm:$0xff]  ;;  %v104_v4 = vld [vmem:[%s6141_s29 + $0x160] sm:$0xff]  ;;  %v101_v6 = vld [vmem:[%s6141_s29 + $0x148] sm:$0xff] }
  0x21   :  { %127 = vmatpush.msra.mxu0 %v72_v12  ;;  %344 = vmatpush.msra.mxu3 %v3607_v41  ;;  %v3741_v5 = vld [vmem:[%s6142_s22 + $0x18] sm:$0xff]  ;;  %v3751_v7 = vld [vmem:[%s6142_s22] sm:$0xff]  ;;  %v98_v11 = vld [vmem:[%s6141_s29 + $0x130] sm:$0xff] }
  0x22   :  { %165 = vmatpush.msra.mxu1 %v82_v42  ;;  %198 = vmatpush.msra.mxu2 %v107_v3  ;;  %v3756_v8 = vld [vmem:[%s6142_s22 + $0x178] sm:$0xff]  ;;  %v3762_v9 = vld [vmem:[%s6143_s24 + $0x20] sm:$0xff]  ;;  %v89_v18 = vld [vmem:[%s6141_s29 + $0xe8] sm:$0xff] }
  0x23   :  { %128 = vmatpush.msra.mxu0 %v69_v13  ;;  %345 = vmatpush.msra.mxu3 %v3616_v43  ;;  %v3772_v12 = vld [vmem:[%s6142_s22 + $0x160] sm:$0xff]  ;;  %v95_v13 = vld [vmem:[%s6141_s29 + $0x118] sm:$0xff]  ;;  %v3806_v21 = vld [vmem:[%s6143_s24 + $0x28] sm:$0xff] }
  0x24   :  { %166 = vmatpush.msra.mxu1 %v79_v45  ;;  %199 = vmatpush.msra.mxu2 %v104_v4  ;;  %v92_v16 = vld [vmem:[%s6141_s29 + $0x100] sm:$0xff]  ;;  %v3816_v27 = vld [vmem:[%s6142_s22 + $0x118] sm:$0xff]  ;;  %v3838_v40 = vld [vmem:[%s6142_s22 + $0xe8] sm:$0xff] }
  0x25   :  { %129 = vmatpush.msra.mxu0 %v66_v14  ;;  %346 = vmatpush.msra.mxu3 %v3631_v46  ;;  %v3785_v14 = vld [vmem:[%s6142_s22 + $0x148] sm:$0xff]  ;;  %v83_v29 = vld [vmem:[%s6141_s29 + $0xb8] sm:$0xff]  ;;  %v3828_v32 = vld [vmem:[%s6142_s22 + $0x100] sm:$0xff] }
  0x26   :  { %167 = vmatpush.msra.mxu1 %v76_v48  ;;  %200 = vmatpush.msra.mxu2 %v101_v6  ;;  %v80_v35 = vld [vmem:[%s6141_s29 + $0xa0] sm:$0xff]  ;;  %v77_v42 = vld [vmem:[%s6141_s29 + $0x88] sm:$0xff]  ;;  %v3849_v45 = vld [vmem:[%s6142_s22 + $0xd0] sm:$0xff] }
  0x27   :  { %130 = vmatpush.msra.mxu0 %v63_v19  ;;  %347 = vmatpush.msra.mxu3 %v3651_v50  ;;  %v3800_v19 = vld [vmem:[%s6142_s22 + $0x130] sm:$0xff]  ;;  %v3887_v3 = vld [vmem:[%s6142_s22 + $0x88] sm:$0xff] }
  0x28   :  { %168 = vmatpush.msra.mxu1 %v73_v53  ;;  %201 = vmatpush.msra.mxu2 %v98_v11  ;;  %v3855_v48 = vld [vmem:[%s6143_s24 + $0x30] sm:$0xff]  ;;  %v65_v4 = vld [vmem:[%s6141_s29 + $0x28] sm:$0xff]  ;;  %v3904_v11 = vld [vmem:[%s6143_s24 + $0x38] sm:$0xff] }
  0x29   :  { %131 = vmatpush.msra.mxu0 %v60_v22  ;;  %348 = vmatpush.msra.mxu3 %v3673_v54  ;;  %v86_v22 = vld [vmem:[%s6141_s29 + $0xd0] sm:$0xff] }
  0x2a   :  { %132 = vmatmul.f32.vlgmr.msra.gmra.mxu0 %v3520_v24  ;;  %169 = vmatpush.msra.mxu1 %v70_v55  ;;  %v74_v53 = vld [vmem:[%s6141_s29 + $0x70] sm:$0xff]  ;;  %v3865_v55 = vld [vmem:[%s6142_s22 + $0xb8] sm:$0xff] }
  0x2b   :  { %315 = vmatpush.msrb.mxu0 %v3526_v25  ;;  %349 = vmatpush.msra.mxu3 %v3682_v56  ;;  %v3898_v6 = vld [vmem:[%s6142_s22 + $0x70] sm:$0xff] }
  0x2c   :  { %170 = vmatpush.msra.mxu1 %v67_v58  ;;  %202 = vmatpush.msra.mxu2 %v95_v13  ;;  %v71_v58 = vld [vmem:[%s6141_s29 + $0x58] sm:$0xff]  ;;  %v62_v13 = vld [vmem:[%s6141_s29 + $0x10] sm:$0xff] }
  0x2d   :  { %316 = vmatpush.msrb.mxu0 %v3533_v26  ;;  %350 = vmatpush.msra.mxu3 %v3697_v59 }
  0x2e   :  { %351 = vmatmul.f32.vlgmr.msra.gmra.mxu3 %v3336_v0  ;;  %171 = vmatpush.msra.mxu1 %v64_v62  ;;  %v3877_v62 = vld [vmem:[%s6142_s22 + $0xa0] sm:$0xff] }
  0x2f   :  { %317 = vmatpush.msrb.mxu0 %v3555_v31  ;;  %515 = vmatpush.msrb.mxu3 %v3756_v8 }
  0x30   :  { %172 = vmatpush.msra.mxu1 %v61_v2  ;;  %203 = vmatpush.msra.mxu2 %v92_v16  ;;  %v68_v2 = vld [vmem:[%s6141_s29 + $0x40] sm:$0xff]  ;;  %v3914_v16 = vld [vmem:[%s6142_s22 + $0x58] sm:$0xff] }
  0x31   :  { %318 = vmatpush.msrb.mxu0 %v3570_v34  ;;  %173 = vmatmul.f32.vlgmr.msra.gmra.mxu1 %v3520_v24 }
  0x32   :  { %135 = vmatmul.f32.gmra.mxu0 %v3579_v36  ;;  %475 = vmatpush.msrb.mxu1 %v3526_v25 }
  0x33   :  { %319 = vmatpush.msrb.mxu0 %v3590_v38  ;;  %516 = vmatpush.msrb.mxu3 %v3772_v12 }
  0x34   :  { %476 = vmatpush.msrb.mxu1 %v3533_v26  ;;  %204 = vmatpush.msra.mxu2 %v89_v18  ;;  %v3923_v18 = vld [vmem:[%s6142_s22 + $0x40] sm:$0xff] }
  0x35   :  { %320 = vmatpush.msrb.mxu0 %v3598_v39  ;;  %517 = vmatpush.msrb.mxu3 %v3785_v14 }
  0x36   :  { %477 = vmatpush.msrb.mxu1 %v3555_v31  ;;  %205 = vmatpush.msra.mxu2 %v86_v22  ;;  %v3930_v22 = vld [vmem:[%s6142_s22 + $0x28] sm:$0xff] }
  0x37   :  { %321 = vmatpush.msrb.mxu0 %v3621_v44  ;;  %518 = vmatpush.msrb.mxu3 %v3800_v19 }
  0x38   :  { %478 = vmatpush.msrb.mxu1 %v3570_v34  ;;  %206 = vmatpush.msra.mxu2 %v83_v29  ;;  %v3939_v29 = vld [vmem:[%s6142_s22 + $0x10] sm:$0xff] }
  0x39   :  { %322 = vmatpush.msrb.mxu0 %v3636_v47  ;;  %176 = vmatmul.f32.gmra.mxu1 %v3579_v36 }
  0x3a   :  { %138 = vmatmul.f32.gmra.mxu0 %v3645_v49  ;;  %479 = vmatpush.msrb.mxu1 %v3590_v38 }
  0x3b   :  { %323 = vmatpush.msrb.mxu0 %v3656_v51  ;;  %519 = vmatpush.msrb.mxu3 %v3816_v27 }
  0x3c   :  { %480 = vmatpush.msrb.mxu1 %v3598_v39  ;;  %207 = vmatpush.msra.mxu2 %v80_v35 }
  0x3d   :  { %324 = vmatpush.msrb.mxu0 %v3664_v52  ;;  %520 = vmatpush.msrb.mxu3 %v3828_v32 }
  0x3e   :  { %481 = vmatpush.msrb.mxu1 %v3621_v44  ;;  %208 = vmatpush.msra.mxu2 %v77_v42  ;;  %v4055_v42 = vld [vmem:[%s6111_s5] ss:$0 sm:$0xff] }
  0x3f   :  { %325 = vmatpush.msrb.mxu0 %v3687_v57  ;;  %521 = vmatpush.msrb.mxu3 %v3838_v40 }
  0x40   :  { %482 = vmatpush.msrb.mxu1 %v3636_v47  ;;  %209 = vmatpush.msra.mxu2 %v74_v53 }
  0x41   :  { %326 = vmatpush.msrb.mxu0 %v3702_v60  ;;  %179 = vmatmul.f32.gmra.mxu1 %v3645_v49 }
  0x42   :  { %141 = vmatmul.f32.gmra.mxu0 %v3708_v61  ;;  %522 = vmatpush.msrb.mxu3 %v3849_v45 }
  0x43   :  { %327 = vmatpush.msrb.mxu0 %v3717_v63  ;;  %483 = vmatpush.msrb.mxu1 %v3656_v51 }
  0x44   :  { %210 = vmatpush.msra.mxu2 %v71_v58  ;;  %523 = vmatpush.msrb.mxu3 %v3865_v55 }
  0x45   :  { %328 = vmatpush.msrb.mxu0 %v3726_v1  ;;  %484 = vmatpush.msrb.mxu1 %v3664_v52 }
  0x46   :  { %211 = vmatpush.msra.mxu2 %v68_v2  ;;  %524 = vmatpush.msrb.mxu3 %v3877_v62 }
  0x47   :  { %329 = vmatpush.msrb.mxu0 %v3741_v5  ;;  %485 = vmatpush.msrb.mxu1 %v3687_v57 }
  0x48   :  { %212 = vmatpush.msra.mxu2 %v65_v4  ;;  %525 = vmatpush.msrb.mxu3 %v3887_v3 }
  0x49   :  { %330 = vmatpush.msrb.mxu0 %v3751_v7  ;;  %182 = vmatmul.f32.gmra.mxu1 %v3708_v61 }
  0x4a   :  { %144 = vmatmul.f32.gmra.mxu0 %v3762_v9  ;;  %213 = vmatpush.msra.mxu2 %v62_v13 }
  0x4b   :  { %355 = vmatpush.msra.mxu0 %v3756_v8  ;;  %214 = vmatmul.f32.vlgmr.msra.gmra.mxu2 %v3520_v24 }
  0x4c   :  { %495 = vmatpush.msrb.mxu2 %v3465_v10  ;;  %486 = vmatpush.msrb.mxu1 %v3702_v60 }
  0x4d   :  { %356 = vmatpush.msra.mxu0 %v3772_v12  ;;  %526 = vmatpush.msrb.mxu3 %v3898_v6 }
  0x4e   :  { %496 = vmatpush.msrb.mxu2 %v3483_v15  ;;  %487 = vmatpush.msrb.mxu1 %v3717_v63 }
  0x4f   :  { %357 = vmatpush.msra.mxu0 %v3785_v14  ;;  %527 = vmatpush.msrb.mxu3 %v3914_v16 }
  0x50   :  { %497 = vmatpush.msrb.mxu2 %v3492_v17  ;;  %488 = vmatpush.msrb.mxu1 %v3726_v1 }
  0x51   :  { %358 = vmatpush.msra.mxu0 %v3800_v19  ;;  %185 = vmatmul.f32.gmra.mxu1 %v3762_v9 }
  0x52   :  { %147 = vmatmul.f32.gmra.mxu0 %v3806_v21  ;;  %498 = vmatpush.msrb.mxu2 %v3503_v20 }
  0x53   :  { %359 = vmatpush.msra.mxu0 %v3816_v27  ;;  %217 = vmatmul.f32.gmra.mxu2 %v3579_v36 }
  0x54   :  { %489 = vmatpush.msrb.mxu1 %v3741_v5  ;;  %499 = vmatpush.msrb.mxu2 %v3515_v23 }
  0x55   :  { %360 = vmatpush.msra.mxu0 %v3828_v32  ;;  %528 = vmatpush.msrb.mxu3 %v3923_v18 }
  0x56   :  { %500 = vmatpush.msrb.mxu2 %v3541_v28  ;;  %490 = vmatpush.msrb.mxu1 %v3751_v7 }
  0x57   :  { %361 = vmatpush.msra.mxu0 %v3838_v40  ;;  %529 = vmatpush.msrb.mxu3 %v3930_v22 }
  0x58   :  { %657 = vmatpush.msra.mxu1 %v3465_v10  ;;  %501 = vmatpush.msrb.mxu2 %v3550_v30 }
  0x59   :  { %362 = vmatpush.msra.mxu0 %v3849_v45  ;;  %188 = vmatmul.f32.gmra.mxu1 %v3806_v21 }
  0x5a   :  { %150 = vmatmul.f32.gmra.mxu0 %v3855_v48  ;;  %530 = vmatpush.msrb.mxu3 %v3939_v29 }
  0x5b   :  { %363 = vmatpush.msra.mxu0 %v3865_v55  ;;  %658 = vmatpush.msra.mxu1 %v3483_v15  ;;  %v108_v15 = vld [vmem:[%s6112_s4] sm:$0x7] }
  0x5c   :  { %502 = vmatpush.msrb.mxu2 %v3565_v33  ;;  %v4040_v36 = vperm.slane %v108_v15, 1 }
  0x5d   :  { %364 = vmatpush.msra.mxu0 %v3877_v62  ;;  %220 = vmatmul.f32.gmra.mxu2 %v3645_v49 }
  0x5e   :  { %503 = vmatpush.msrb.mxu2 %v3585_v37  ;;  %659 = vmatpush.msra.mxu1 %v3492_v17  ;;  %v110_v17 = vperm.slane %v108_v15, 0 }
  0x5f   :  { %365 = vmatpush.msra.mxu0 %v3887_v3 }
  0x60   :  { %504 = vmatpush.msrb.mxu2 %v3607_v41  ;;  %660 = vmatpush.msra.mxu1 %v3503_v20 }
  0x61   :  { %366 = vmatpush.msra.mxu0 %v3898_v6  ;;  %191 = vmatmul.f32.gmra.mxu1 %v3855_v48 }
  0x62   :  { %153 = vmatmul.f32.gmra.mxu0 %v3904_v11  ;;  %505 = vmatpush.msrb.mxu2 %v3616_v43 }
  0x63   :  { %367 = vmatpush.msra.mxu0 %v3914_v16  ;;  %661 = vmatpush.msra.mxu1 %v3515_v23 }
  0x64   :  { %506 = vmatpush.msrb.mxu2 %v3631_v46 }
  0x65   :  { %368 = vmatpush.msra.mxu0 %v3923_v18  ;;  %662 = vmatpush.msra.mxu1 %v3541_v28 }
  0x66   :  { %223 = vmatmul.f32.gmra.mxu2 %v3708_v61 }
  0x67   :  { %369 = vmatpush.msra.mxu0 %v3930_v22  ;;  %507 = vmatpush.msrb.mxu2 %v3651_v50 }
  0x68   :  { %663 = vmatpush.msra.mxu1 %v3550_v30 }
  0x69   :  { %370 = vmatpush.msra.mxu0 %v3939_v29  ;;  %194 = vmatmul.f32.gmra.mxu1 %v3904_v11 }
  0x6a   :  { %331 = vmatmul.f32.vlgmr.msrb.gmra.mxu0 %v3336_v0  ;;  %508 = vmatpush.msrb.mxu2 %v3673_v54 }
  0x6b   :  { %637 = vmatpush.msrb.mxu0 %v3526_v25  ;;  %664 = vmatpush.msra.mxu1 %v3565_v33 }
  0x6c   :  { %509 = vmatpush.msrb.mxu2 %v3682_v56 }
  0x6d   :  { %638 = vmatpush.msrb.mxu0 %v3533_v26  ;;  %665 = vmatpush.msra.mxu1 %v3585_v37 }
  0x6e   :  { %510 = vmatpush.msrb.mxu2 %v3697_v59 }
  0x6f   :  { %639 = vmatpush.msrb.mxu0 %v3555_v31  ;;  %666 = vmatpush.msra.mxu1 %v3607_v41 }
  0x70   :  { %226 = vmatmul.f32.gmra.mxu2 %v3762_v9 }
  0x71   :  { %640 = vmatpush.msrb.mxu0 %v3570_v34  ;;  %677 = vmatpush.msra.mxu2 %v3756_v8 }
  0x72   :  { %371 = vmatmul.f32.vlgmr.msra.gmra.mxu0 %v3336_v0  ;;  %667 = vmatpush.msra.mxu1 %v3616_v43 }
  0x73   :  { %641 = vmatpush.msrb.mxu0 %v3590_v38  ;;  %678 = vmatpush.msra.mxu2 %v3772_v12 }
  0x74   :  { %668 = vmatpush.msra.mxu1 %v3631_v46 }
  0x75   :  { %642 = vmatpush.msrb.mxu0 %v3598_v39  ;;  %679 = vmatpush.msra.mxu2 %v3785_v14 }
  0x76   :  { %669 = vmatpush.msra.mxu1 %v3651_v50 }
  0x77   :  { %643 = vmatpush.msrb.mxu0 %v3621_v44  ;;  %680 = vmatpush.msra.mxu2 %v3800_v19 }
  0x78   :  { %670 = vmatpush.msra.mxu1 %v3673_v54  ;;  %229 = vmatmul.f32.gmra.mxu2 %v3806_v21 }
  0x79   :  { %644 = vmatpush.msrb.mxu0 %v3636_v47  ;;  %681 = vmatpush.msra.mxu2 %v3816_v27 }
  0x7a   :  { %671 = vmatpush.msra.mxu1 %v3682_v56 }
  0x7b   :  { %645 = vmatpush.msrb.mxu0 %v3656_v51  ;;  %682 = vmatpush.msra.mxu2 %v3828_v32 }
  0x7c   :  { %672 = vmatpush.msra.mxu1 %v3697_v59 }
  0x7d   :  { %646 = vmatpush.msrb.mxu0 %v3664_v52  ;;  %683 = vmatpush.msra.mxu2 %v3838_v40 }
  0x7f   :  { %647 = vmatpush.msrb.mxu0 %v3687_v57  ;;  %684 = vmatpush.msra.mxu2 %v3849_v45 }
  0x80   :  { %232 = vmatmul.f32.gmra.mxu2 %v3855_v48 }
  0x81   :  { %648 = vmatpush.msrb.mxu0 %v3702_v60  ;;  %685 = vmatpush.msra.mxu2 %v3865_v55 }
  0x83   :  { %649 = vmatpush.msrb.mxu0 %v3717_v63  ;;  %686 = vmatpush.msra.mxu2 %v3877_v62  ;;  %v4047_v63 = vperm.slane %v108_v15, 2 }
  0x85   :  { %650 = vmatpush.msrb.mxu0 %v3726_v1  ;;  %687 = vmatpush.msra.mxu2 %v3887_v3  ;;  %6145 = vst [vmem:[#allocation5_spill] sm:$0xff] %v4047_v63 }
  0x87   :  { %651 = vmatpush.msrb.mxu0 %v3741_v5  ;;  %688 = vmatpush.msra.mxu2 %v3898_v6 }
  0x88   :  { %235 = vmatmul.f32.gmra.mxu2 %v3904_v11 }
  0x89   :  { %652 = vmatpush.msrb.mxu0 %v3751_v7  ;;  %689 = vmatpush.msra.mxu2 %v3914_v16 }
  0x8b   :  { %690 = vmatpush.msra.mxu2 %v3923_v18 }
  0x8d   :  { %691 = vmatpush.msra.mxu2 %v3930_v22 }
  0x8f   :  { %692 = vmatpush.msra.mxu2 %v3939_v29 }
  0xa7   :  { %v133_v10 = vpop.f32.mrf.mxu0 }
  0xa8   :  { %v134_v50 = vadd.f32 %v133_v10, %v110_v17 }
  0xae   :  { %v174_v37 = vpop.f32.mrf.mxu1 }
  0xaf   :  { %v136_v20 = vpop.f32.mrf.mxu0  ;;  %v175_v39 = vadd.f32 %v174_v37, %v4040_v36 }
  0xb0   :  { %v4030_v23 = vadd.f32 %v136_v20, %v110_v17 }
  0xb1   :  { %v352_v43 = vpop.f32.mrf.mxu3 }
  0xb2   :  { %v398_v44 = vadd.f32 %v352_v43, %v175_v39 }
  0xb4   :  { %v3130_v47 = vmul.f32 -1.442695, %v398_v44 }
  0xb6   :  { %3172 = vpow2.f32 %v3130_v47 }
  0xb7   :  { %v139_v24 = vpop.f32.mrf.mxu0 }
  0xb8   :  { %v4032_v25 = vadd.f32 %v139_v24, %v110_v17 }
  0xbc   :  { %v3173_v54 = vpop.eup %3172 }
  0xbd   :  { %v402_v57 = vadd.f32 1.0, %v3173_v54 }
  0xbf   :  { %v142_v26 = vpop.f32.mrf.mxu0  ;;  %vm408_vm2 = vweird.f32 %v402_v57  ;;  %v414_v24 = vand.u32 2147483648, %v402_v57 }
  0xc0   :  { %v4034_v28 = vadd.f32 %v142_v26, %v110_v17 }
  0xc7   :  { %v145_v30 = vpop.f32.mrf.mxu0 }
  0xc8   :  { %v4036_v31 = vadd.f32 %v145_v30, %v110_v17 }
  0xce   :  { %v215_v59 = vpop.f32.mrf.mxu2 }
  0xcf   :  { %v148_v33 = vpop.f32.mrf.mxu0  ;;  %v216_v30 = vadd.f32 %v215_v59, %v4047_v63 }
  0xd0   :  { %v4038_v34 = vadd.f32 %v148_v33, %v110_v17 }
  0xd6   :  { %v218_v1 = vpop.f32.mrf.mxu2 }
  0xd7   :  { %v151_v38 = vpop.f32.mrf.mxu0  ;;  %v4050_v5 = vadd.f32 %v218_v1, %v4047_v63 }
  0xd8   :  { %v4043_v41 = vadd.f32 %v151_v38, %v110_v17  ;;  %v412_v38 = vand.u32 2147483647, %v402_v57 }
  0xda   :  { %vm413_vm7 = vcmp.eq.f32.partialorder %v412_v38, 8.507059e+37 }
  0xdf   :  { %v154_v46 = vpop.f32.mrf.mxu0 }
  0xe0   :  { %v4045_v49 = vadd.f32 %v154_v46, %v110_v17  ;;  %v221_v53 = vpop.f32.mrf.mxu2  ;;  %v415_v46 = vor.u32 1.1754944e-38, %v414_v24 }
  0xe1   :  { %v4058_v4 = vadd.f32 %v221_v53, %v4047_v63 }
  0xe2   :  { %6144 = vst [vmem:[#allocation4_spill] sm:$0xff] %v4045_v49 }
  0xe7   :  { %v332_v51 = vpop.f32.mrf.mxu0 }
  0xe8   :  { %v378_v52 = vadd.f32 %v332_v51, %v134_v50 }
  0xe9   :  { %v224_v43 = vpop.f32.mrf.mxu2 }
  0xea   :  { %v3129_v56 = vmul.f32 -1.442695, %v378_v52  ;;  %v4063_v44 = vadd.f32 %v224_v43, %v4047_v63 }
  0xec   :  { %3174 = vpow2.f32 %v3129_v56 }
  0xed   :  { %3176 = vrcp.f32 %v402_v57 }
  0xef   :  { %v372_v58 = vpop.f32.mrf.mxu0 }
  0xf0   :  { %v418_v17 = vadd.f32 %v4055_v42, %v372_v58 }
  0xf2   :  { %v3175_v60 = vpop.eup %3174 }
  0xf3   :  { %v382_v61 = vadd.f32 1.0, %v3175_v60  ;;  %v3177_v0 = vpop.eup %3176  ;;  %v227_v52 = vpop.f32.mrf.mxu2 }
  0xf4   :  { %v404_v7 = vmul.f32 %v3177_v0, %v402_v57  ;;  %vm409_vm3 = vweird.f32 %v3177_v0  ;;  %v4066_v56 = vadd.f32 %v227_v52, %v4047_v63 }
  0xf5   :  { %3178 = vrcp.f32 %v382_v61  ;;  %v394_v2 = vand.u32 2147483648, %v382_v61  ;;  %v392_v13 = vand.u32 2147483647, %v382_v61  ;;  %vm388_vm1 = vweird.f32 %v382_v61  ;;  %vm410_vm6 = vmor %vm408_vm2, %vm409_vm3 }
  0xf6   :  { %v405_v35 = vsub.f32 1.0, %v404_v7 }
  0xf7   :  { %v395_v20 = vor.u32 1.1754944e-38, %v394_v2  ;;  %vm393_vm5 = vcmp.eq.f32.partialorder %v392_v13, 8.507059e+37 }
  0xf8   :  { %v406_v10 = vmul.f32 %v3177_v0, %v405_v35 }
  0xfa   :  { %v407_v37 = vadd.f32 %v3177_v0, %v406_v10 }
  0xfb   :  { %v3179_v9 = vpop.eup %3178 }
  0xfc   :  { %v384_v21 = vmul.f32 %v3179_v9, %v382_v61  ;;  %vm389_vm0 = vweird.f32 %v3179_v9  ;;  %v411_v50 = vsel %vm410_vm6, %v3177_v0, %v407_v37  ;;  %v230_v0 = vpop.f32.mrf.mxu2 }
  0xfd   :  { %vm390_vm4 = vmor %vm388_vm1, %vm389_vm0  ;;  %v416_v51 = vsel %vm413_vm7, %v415_v46, %v411_v50  ;;  %v4079_v1 = vadd.f32 %v230_v0, %v4047_v63 }
  0xfe   :  { %v385_v48 = vsub.f32 1.0, %v384_v21  ;;  %v422_v54 = vsub.f32 1.0, %v416_v51  ;;  %v424_v57 = vmul.f32 0.0, %v416_v51 }
 0x100   :  { %v386_v11 = vmul.f32 %v3179_v9, %v385_v48 }
 0x102   :  { %v387_v15 = vadd.f32 %v3179_v9, %v386_v11 }
 0x104   :  { %v391_v26 = vsel %vm390_vm4, %v3179_v9, %v387_v15  ;;  %v233_v7 = vpop.f32.mrf.mxu2 }
 0x105   :  { %v396_v33 = vsel %vm393_vm5, %v395_v20, %v391_v26  ;;  %v4086_v9 = vadd.f32 %v233_v7, %v4047_v63 }
 0x106   :  { %v419_v39 = vmul.f32 %v418_v17, %v396_v33 }
 0x108   :  { %v420_v47 = vadd.f32 %v419_v39, %v216_v30 }
 0x10a   :  { %3180 = vtanh.f32 %v420_v47 }
 0x110   :  { %v3181_v59 = vpop.eup %3180 }
 0x111   :  { %v423_v60 = vmul.f32 %v3181_v59, %v422_v54 }
 0x113   :  { %v4068_v61 = vadd.f32 %v424_v57, %v423_v60 }
 0x115   :  { %426 = vst [vmem:[%s6113_s14] sm:$0xff] %v4068_v61  ;;  %491 = vmatmul.f32.vlgmr.msrb.gmra.mxu1 %v4068_v61  ;;  %511 = vmatmul.f32.vlgmr.msrb.gmra.mxu2 %v4068_v61 }
 0x116   :  { %531 = vmatmul.f32.vlgmr.msrb.gmra.mxu3 %v4068_v61  ;;  %839 = vmatpush.msrb.mxu1 %v3756_v8  ;;  %v177_v8 = vpop.f32.mrf.mxu1 }
 0x118   :  { %840 = vmatpush.msrb.mxu1 %v3772_v12 }
 0x11a   :  { %841 = vmatpush.msrb.mxu1 %v3785_v14 }
 0x11c   :  { %842 = vmatpush.msrb.mxu1 %v3800_v19 }
 0x11e   :  { %843 = vmatpush.msrb.mxu1 %v3816_v27  ;;  %v4099_v12 = vpop.f32.mrf.mxu1 }
 0x120   :  { %844 = vmatpush.msrb.mxu1 %v3828_v32 }
 0x122   :  { %845 = vmatpush.msrb.mxu1 %v3838_v40 }
 0x124   :  { %846 = vmatpush.msrb.mxu1 %v3849_v45  ;;  %v4111_v45 = vpop.f32.mrf.mxu2 }
 0x125   :  { %6147 = vst [vmem:[#allocation7_spill] sm:$0xff] %v4111_v45 }
 0x126   :  { %847 = vmatpush.msrb.mxu1 %v3865_v55  ;;  %v4101_v14 = vpop.f32.mrf.mxu1 }
 0x128   :  { %848 = vmatpush.msrb.mxu1 %v3877_v62 }
 0x12a   :  { %849 = vmatpush.msrb.mxu1 %v3887_v3 }
 0x12c   :  { %850 = vmatpush.msrb.mxu1 %v3898_v6  ;;  %v178_v6 = vadd.f32 %v177_v8, %v4040_v36  ;;  %v4142_v8 = vld [vmem:[%s6142_s22 + $0x150] sm:$0xff] }
 0x12e   :  { %851 = vmatpush.msrb.mxu1 %v3914_v16  ;;  %v4103_v19 = vpop.f32.mrf.mxu1 }
 0x130   :  { %852 = vmatpush.msrb.mxu1 %v3923_v18 }
 0x132   :  { %853 = vmatpush.msrb.mxu1 %v3930_v22 }
 0x134   :  { %854 = vmatpush.msrb.mxu1 %v3939_v29 }
 0x136   :  { %v4105_v27 = vpop.f32.mrf.mxu1 }
 0x13e   :  { %v4107_v32 = vpop.f32.mrf.mxu1 }
 0x146   :  { %v4109_v40 = vpop.f32.mrf.mxu1 }
 0x147   :  { %6146 = vst [vmem:[#allocation6_spill] sm:$0xff] %v4109_v40 }
 0x192   :  { %v492_v55 = vpop.f32.mrf.mxu1 }
 0x193   :  { %v539_v62 = vadd.f32 %v492_v55, %v4030_v23  ;;  %v4147_v55 = vld [vmem:[%s6142_s22 + $0x158] sm:$0xff] }
 0x195   :  { %v3131_v3 = vmul.f32 -1.442695, %v539_v62  ;;  %v4156_v62 = vld [vmem:[%s6142_s22 + $0x138] sm:$0xff] }
 0x197   :  { %3182 = vpow2.f32 %v3131_v3  ;;  %v4161_v3 = vld [vmem:[%s6142_s22 + $0x140] sm:$0xff] }
 0x198   :  { %v512_v16 = vpop.f32.mrf.mxu2 }
 0x199   :  { %v559_v18 = vadd.f32 %v512_v16, %v178_v6  ;;  %v532_v15 = vpop.f32.mrf.mxu3  ;;  %v4170_v6 = vld [vmem:[%s6142_s22 + $0x120] sm:$0xff]  ;;  %v4175_v16 = vld [vmem:[%s6142_s22 + $0x128] sm:$0xff] }
 0x19a   :  { %v579_v33 = vadd.f32 %v4055_v42, %v532_v15 }
 0x19b   :  { %v3132_v22 = vmul.f32 -1.442695, %v559_v18  ;;  %v4184_v18 = vld [vmem:[%s6142_s22 + $0x108] sm:$0xff] }
 0x19d   :  { %v3183_v29 = vpop.eup %3182  ;;  %3184 = vpow2.f32 %v3132_v22  ;;  %v4189_v22 = vld [vmem:[%s6142_s22 + $0x110] sm:$0xff] }
 0x19e   :  { %v543_v21 = vadd.f32 1.0, %v3183_v29  ;;  %v4198_v29 = vld [vmem:[%s6142_s22 + $0xf0] sm:$0xff] }
 0x1a0   :  { %3186 = vrcp.f32 %v543_v21  ;;  %v555_v11 = vand.u32 2147483648, %v543_v21  ;;  %v553_v23 = vand.u32 2147483647, %v543_v21  ;;  %vm549_vm9 = vweird.f32 %v543_v21 }
 0x1a2   :  { %v556_v24 = vor.u32 1.1754944e-38, %v555_v11  ;;  %vm554_vm11 = vcmp.eq.f32.partialorder %v553_v23, 8.507059e+37  ;;  %v4242_v11 = vld [vmem:[%s6142_s22 + $0xa8] sm:$0xff] }
 0x1a3   :  { %v3185_v35 = vpop.eup %3184 }
 0x1a4   :  { %v563_v48 = vadd.f32 1.0, %v3185_v35  ;;  %v4212_v35 = vld [vmem:[%s6142_s22 + $0xd8] sm:$0xff] }
 0x1a6   :  { %v3187_v53 = vpop.eup %3186  ;;  %3188 = vrcp.f32 %v563_v48  ;;  %v575_v39 = vand.u32 2147483648, %v563_v48  ;;  %v573_v46 = vand.u32 2147483647, %v563_v48  ;;  %vm569_vm13 = vweird.f32 %v563_v48 }
 0x1a7   :  { %v545_v58 = vmul.f32 %v3187_v53, %v543_v21  ;;  %vm550_vm8 = vweird.f32 %v3187_v53  ;;  %v4203_v21 = vld [vmem:[%s6142_s22 + $0xf8] sm:$0xff] }
 0x1a8   :  { %vm551_vm10 = vmor %vm549_vm9, %vm550_vm8  ;;  %v576_v51 = vor.u32 1.1754944e-38, %v575_v39  ;;  %vm574_vm15 = vcmp.eq.f32.partialorder %v573_v46, 8.507059e+37  ;;  %v4304_v39 = vld [vmem:[%s6142_s22 + $0x50] sm:$0xff]  ;;  %v4318_v46 = vld [vmem:[%s6142_s22 + $0x38] sm:$0xff] }
 0x1a9   :  { %v546_v2 = vsub.f32 1.0, %v545_v58  ;;  %v4231_v58 = vld [vmem:[%s6142_s22 + $0xc8] sm:$0xff] }
 0x1ab   :  { %v547_v13 = vmul.f32 %v3187_v53, %v546_v2  ;;  %v181_v2 = vadd.f32 %v4099_v12, %v4040_v36 }
 0x1ac   :  { %v3189_v10 = vpop.eup %3188 }
 0x1ad   :  { %v565_v17 = vmul.f32 %v3189_v10, %v563_v48  ;;  %v548_v20 = vadd.f32 %v3187_v53, %v547_v13  ;;  %vm570_vm12 = vweird.f32 %v3189_v10  ;;  %v4217_v48 = vld [vmem:[%s6142_s22 + $0xe0] sm:$0xff]  ;;  %v4247_v13 = vld [vmem:[%s6142_s22 + $0xb0] sm:$0xff] }
 0x1ae   :  { %vm571_vm14 = vmor %vm569_vm13, %vm570_vm12 }
 0x1af   :  { %v566_v26 = vsub.f32 1.0, %v565_v17  ;;  %v552_v30 = vsel %vm551_vm10, %v3187_v53, %v548_v20  ;;  %v4226_v53 = vld [vmem:[%s6142_s22 + $0xc0] sm:$0xff]  ;;  %v4257_v17 = vld [vmem:[%s6142_s22 + $0x90] sm:$0xff]  ;;  %v4262_v20 = vld [vmem:[%s6142_s22 + $0x98] sm:$0xff] }
 0x1b0   :  { %v557_v37 = vsel %vm554_vm11, %v556_v24, %v552_v30  ;;  %v4276_v30 = vld [vmem:[%s6142_s22 + $0x80] sm:$0xff] }
 0x1b1   :  { %v567_v38 = vmul.f32 %v3189_v10, %v566_v26  ;;  %v580_v43 = vmul.f32 %v579_v33, %v557_v37  ;;  %v4271_v26 = vld [vmem:[%s6142_s22 + $0x78] sm:$0xff]  ;;  %v4285_v33 = vld [vmem:[%s6142_s22 + $0x60] sm:$0xff]  ;;  %v4290_v37 = vld [vmem:[%s6142_s22 + $0x68] sm:$0xff] }
 0x1b3   :  { %v568_v47 = vadd.f32 %v3189_v10, %v567_v38  ;;  %v581_v50 = vadd.f32 %v580_v43, %v4050_v5  ;;  %v4130_v5 = vld [vmem:[%s6142_s22 + $0x168] sm:$0xff]  ;;  %v4313_v43 = vld [vmem:[%s6142_s22 + $0x30] sm:$0xff] }
 0x1b4   :  { %799 = vmatpush.msra.mxu3 %v4130_v5  ;;  %961 = vmatpush.msrb.mxu2 %v4130_v5  ;;  %v4299_v38 = vld [vmem:[%s6142_s22 + $0x48] sm:$0xff] }
 0x1b5   :  { %v572_v52 = vsel %vm571_vm14, %v3189_v10, %v568_v47  ;;  %3190 = vtanh.f32 %v581_v50  ;;  %v4327_v47 = vld [vmem:[%s6142_s22 + $0x18] sm:$0xff]  ;;  %v4332_v50 = vld [vmem:[%s6142_s22 + $0x20] sm:$0xff] }
 0x1b6   :  { %v577_v54 = vsel %vm574_vm15, %v576_v51, %v572_v52  ;;  %800 = vmatpush.msra.mxu3 %v4142_v8  ;;  %962 = vmatpush.msrb.mxu2 %v4142_v8  ;;  %v4337_v52 = vld [vmem:[%s6142_s22] sm:$0xff] }
 0x1b7   :  { %v583_v59 = vsub.f32 1.0, %v577_v54  ;;  %v585_v0 = vmul.f32 %v577_v54, %v4068_v61  ;;  %v4135_v61 = vld [vmem:[%s6142_s22 + $0x170] sm:$0xff]  ;;  %v4342_v54 = vld [vmem:[%s6142_s22 + $0x8] sm:$0xff] }
 0x1b8   :  { %819 = vmatpush.msra.mxu0 %v4135_v61  ;;  %801 = vmatpush.msra.mxu3 %v4156_v62 }
 0x1b9   :  { %963 = vmatpush.msrb.mxu2 %v4156_v62 }
 0x1ba   :  { %820 = vmatpush.msra.mxu0 %v4147_v55  ;;  %802 = vmatpush.msra.mxu3 %v4170_v6 }
 0x1bb   :  { %v3191_v60 = vpop.eup %3190  ;;  %964 = vmatpush.msrb.mxu2 %v4170_v6 }
 0x1bc   :  { %v584_v57 = vmul.f32 %v3191_v60, %v583_v59  ;;  %821 = vmatpush.msra.mxu0 %v4161_v3  ;;  %803 = vmatpush.msra.mxu3 %v4184_v18 }
 0x1bd   :  { %965 = vmatpush.msrb.mxu2 %v4184_v18 }
 0x1be   :  { %v4118_v7 = vadd.f32 %v585_v0, %v584_v57  ;;  %822 = vmatpush.msra.mxu0 %v4175_v16  ;;  %804 = vmatpush.msra.mxu3 %v4198_v29 }
 0x1bf   :  { %966 = vmatpush.msrb.mxu2 %v4198_v29 }
 0x1c0   :  { %3133 = vst [vmem:[%s6113_s14 + $0x8] sm:$0xff] %v4118_v7  ;;  %653 = vmatmul.f32.vlgmr.msrb.gmra.mxu0 %v4118_v7  ;;  %673 = vmatmul.f32.vlgmr.msra.gmra.mxu1 %v4118_v7 }
 0x1c1   :  { %693 = vmatmul.f32.vlgmr.msra.gmra.mxu2 %v4118_v7  ;;  %1123 = vmatpush.msra.mxu1 %v4130_v5 }
 0x1c2   :  { %823 = vmatpush.msra.mxu0 %v4189_v22  ;;  %805 = vmatpush.msra.mxu3 %v4212_v35 }
 0x1c3   :  { %1124 = vmatpush.msra.mxu1 %v4142_v8  ;;  %967 = vmatpush.msrb.mxu2 %v4212_v35 }
 0x1c4   :  { %824 = vmatpush.msra.mxu0 %v4203_v21  ;;  %806 = vmatpush.msra.mxu3 %v4226_v53 }
 0x1c5   :  { %1125 = vmatpush.msra.mxu1 %v4156_v62  ;;  %968 = vmatpush.msrb.mxu2 %v4226_v53 }
 0x1c6   :  { %825 = vmatpush.msra.mxu0 %v4217_v48  ;;  %807 = vmatpush.msra.mxu3 %v4242_v11 }
 0x1c7   :  { %1126 = vmatpush.msra.mxu1 %v4170_v6  ;;  %969 = vmatpush.msrb.mxu2 %v4242_v11 }
 0x1c8   :  { %826 = vmatpush.msra.mxu0 %v4231_v58  ;;  %808 = vmatpush.msra.mxu3 %v4257_v17 }
 0x1c9   :  { %1127 = vmatpush.msra.mxu1 %v4184_v18  ;;  %970 = vmatpush.msrb.mxu2 %v4257_v17 }
 0x1ca   :  { %827 = vmatpush.msra.mxu0 %v4247_v13  ;;  %809 = vmatpush.msra.mxu3 %v4271_v26 }
 0x1cb   :  { %1128 = vmatpush.msra.mxu1 %v4198_v29  ;;  %971 = vmatpush.msrb.mxu2 %v4271_v26 }
 0x1cc   :  { %828 = vmatpush.msra.mxu0 %v4262_v20  ;;  %810 = vmatpush.msra.mxu3 %v4285_v33 }
 0x1cd   :  { %1129 = vmatpush.msra.mxu1 %v4212_v35  ;;  %972 = vmatpush.msrb.mxu2 %v4285_v33 }
 0x1ce   :  { %829 = vmatpush.msra.mxu0 %v4276_v30  ;;  %811 = vmatpush.msra.mxu3 %v4299_v38 }
 0x1cf   :  { %1130 = vmatpush.msra.mxu1 %v4226_v53  ;;  %973 = vmatpush.msrb.mxu2 %v4299_v38 }
 0x1d0   :  { %830 = vmatpush.msra.mxu0 %v4290_v37  ;;  %812 = vmatpush.msra.mxu3 %v4313_v43 }
 0x1d1   :  { %1131 = vmatpush.msra.mxu1 %v4242_v11  ;;  %974 = vmatpush.msrb.mxu2 %v4313_v43 }
 0x1d2   :  { %831 = vmatpush.msra.mxu0 %v4304_v39  ;;  %813 = vmatpush.msra.mxu3 %v4327_v47 }
 0x1d3   :  { %1132 = vmatpush.msra.mxu1 %v4257_v17  ;;  %975 = vmatpush.msrb.mxu2 %v4327_v47 }
 0x1d4   :  { %832 = vmatpush.msra.mxu0 %v4318_v46  ;;  %814 = vmatpush.msra.mxu3 %v4337_v52 }
 0x1d5   :  { %1133 = vmatpush.msra.mxu1 %v4271_v26  ;;  %976 = vmatpush.msrb.mxu2 %v4337_v52 }
 0x1d6   :  { %833 = vmatpush.msra.mxu0 %v4332_v50  ;;  %981 = vmatpush.msrb.mxu3 %v4135_v61 }
 0x1d7   :  { %1134 = vmatpush.msra.mxu1 %v4285_v33  ;;  %1143 = vmatpush.msra.mxu2 %v4135_v61 }
 0x1d8   :  { %834 = vmatpush.msra.mxu0 %v4342_v54  ;;  %982 = vmatpush.msrb.mxu3 %v4147_v55 }
 0x1d9   :  { %1135 = vmatpush.msra.mxu1 %v4299_v38  ;;  %1144 = vmatpush.msra.mxu2 %v4147_v55 }
 0x1da   :  { %983 = vmatpush.msrb.mxu3 %v4161_v3 }
 0x1db   :  { %1136 = vmatpush.msra.mxu1 %v4313_v43  ;;  %1145 = vmatpush.msra.mxu2 %v4161_v3 }
 0x1dc   :  { %984 = vmatpush.msrb.mxu3 %v4175_v16 }
 0x1dd   :  { %1137 = vmatpush.msra.mxu1 %v4327_v47  ;;  %1146 = vmatpush.msra.mxu2 %v4175_v16 }
 0x1de   :  { %985 = vmatpush.msrb.mxu3 %v4189_v22 }
 0x1df   :  { %1138 = vmatpush.msra.mxu1 %v4337_v52  ;;  %1147 = vmatpush.msra.mxu2 %v4189_v22 }
 0x1e0   :  { %986 = vmatpush.msrb.mxu3 %v4203_v21 }
 0x1e1   :  { %1148 = vmatpush.msra.mxu2 %v4203_v21 }
 0x1e2   :  { %987 = vmatpush.msrb.mxu3 %v4217_v48 }
 0x1e3   :  { %1149 = vmatpush.msra.mxu2 %v4217_v48 }
 0x1e4   :  { %988 = vmatpush.msrb.mxu3 %v4231_v58 }
 0x1e5   :  { %1150 = vmatpush.msra.mxu2 %v4231_v58 }
 0x1e6   :  { %989 = vmatpush.msrb.mxu3 %v4247_v13 }
 0x1e7   :  { %1151 = vmatpush.msra.mxu2 %v4247_v13 }
 0x1e8   :  { %990 = vmatpush.msrb.mxu3 %v4262_v20 }
 0x1e9   :  { %1152 = vmatpush.msra.mxu2 %v4262_v20 }
 0x1ea   :  { %991 = vmatpush.msrb.mxu3 %v4276_v30 }
 0x1eb   :  { %1153 = vmatpush.msra.mxu2 %v4276_v30 }
 0x1ec   :  { %992 = vmatpush.msrb.mxu3 %v4290_v37 }
 0x1ed   :  { %1154 = vmatpush.msra.mxu2 %v4290_v37 }
 0x1ee   :  { %993 = vmatpush.msrb.mxu3 %v4304_v39 }
 0x1ef   :  { %1155 = vmatpush.msra.mxu2 %v4304_v39 }
 0x1f0   :  { %994 = vmatpush.msrb.mxu3 %v4318_v46 }
 0x1f1   :  { %1156 = vmatpush.msra.mxu2 %v4318_v46 }
 0x1f2   :  { %995 = vmatpush.msrb.mxu3 %v4332_v50 }
 0x1f3   :  { %1157 = vmatpush.msra.mxu2 %v4332_v50 }
 0x1f4   :  { %996 = vmatpush.msrb.mxu3 %v4342_v54 }
 0x1f5   :  { %1158 = vmatpush.msra.mxu2 %v4342_v54 }
 0x23d   :  { %v654_v23 = vpop.f32.mrf.mxu0  ;;  %v674_v10 = vpop.f32.mrf.mxu1 }
 0x23e   :  { %v701_v12 = vadd.f32 %v654_v23, %v4032_v25  ;;  %v721_v15 = vadd.f32 %v674_v10, %v181_v2 }
 0x240   :  { %v3134_v25 = vmul.f32 -1.442695, %v701_v12  ;;  %v3135_v24 = vmul.f32 -1.442695, %v721_v15 }
 0x242   :  { %3192 = vpow2.f32 %v3134_v25 }
 0x243   :  { %3194 = vpow2.f32 %v3135_v24 }
 0x244   :  { %v694_v45 = vpop.f32.mrf.mxu2 }
 0x248   :  { %v3193_v51 = vpop.eup %3192 }
 0x249   :  { %v3195_v59 = vpop.eup %3194  ;;  %v705_v60 = vadd.f32 1.0, %v3193_v51 }
 0x24a   :  { %v725_v57 = vadd.f32 1.0, %v3195_v59 }
 0x24b   :  { %3196 = vrcp.f32 %v705_v60  ;;  %v717_v25 = vand.u32 2147483648, %v705_v60  ;;  %v715_v51 = vand.u32 2147483647, %v705_v60  ;;  %vm711_vm1 = vweird.f32 %v705_v60 }
 0x24c   :  { %3198 = vrcp.f32 %v725_v57  ;;  %v737_v40 = vand.u32 2147483648, %v725_v57  ;;  %vm731_vm5 = vweird.f32 %v725_v57 }
 0x24d   :  { %vm716_vm3 = vcmp.eq.f32.partialorder %v715_v51, 8.507059e+37  ;;  %v4495_v51 = vld [vmem:[%s6142_s22 + $0x70] sm:$0xff] }
 0x251   :  { %v3197_v0 = vpop.eup %3196 }
 0x252   :  { %v3199_v2 = vpop.eup %3198  ;;  %v707_v23 = vmul.f32 %v3197_v0, %v705_v60  ;;  %vm712_vm0 = vweird.f32 %v3197_v0  ;;  %v735_v60 = vand.u32 2147483647, %v725_v57 }
 0x253   :  { %v727_v10 = vmul.f32 %v3199_v2, %v725_v57  ;;  %vm713_vm2 = vmor %vm711_vm1, %vm712_vm0  ;;  %vm732_vm4 = vweird.f32 %v3199_v2 }
 0x254   :  { %v708_v12 = vsub.f32 1.0, %v707_v23  ;;  %v718_v23 = vor.u32 1.1754944e-38, %v717_v25  ;;  %vm733_vm6 = vmor %vm731_vm5, %vm732_vm4  ;;  %vm736_vm7 = vcmp.eq.f32.partialorder %v735_v60, 8.507059e+37 }
 0x255   :  { %v728_v15 = vsub.f32 1.0, %v727_v10 }
 0x256   :  { %v709_v24 = vmul.f32 %v3197_v0, %v708_v12  ;;  %v741_v12 = vadd.f32 %v4055_v42, %v694_v45 }
 0x257   :  { %v729_v59 = vmul.f32 %v3199_v2, %v728_v15 }
 0x258   :  { %v710_v63 = vadd.f32 %v3197_v0, %v709_v24 }
 0x259   :  { %v730_v49 = vadd.f32 %v3199_v2, %v729_v59  ;;  %v4502_v59 = vld [vmem:[%s6142_s22 + $0x58] sm:$0xff] }
 0x25a   :  { %v714_v10 = vsel %vm713_vm2, %v3197_v0, %v710_v63  ;;  %v738_v0 = vor.u32 1.1754944e-38, %v737_v40 }
 0x25b   :  { %v719_v15 = vsel %vm716_vm3, %v718_v23, %v714_v10  ;;  %v734_v45 = vsel %vm733_vm6, %v3199_v2, %v730_v49  ;;  %v4509_v10 = vld [vmem:[%s6142_s22 + $0x40] sm:$0xff] }
 0x25c   :  { %v742_v24 = vmul.f32 %v741_v12, %v719_v15  ;;  %v739_v25 = vsel %vm736_vm7, %v738_v0, %v734_v45  ;;  %v4516_v12 = vld [vmem:[%s6142_s22 + $0x28] sm:$0xff] }
 0x25d   :  { %v747_v57 = vmul.f32 %v739_v25, %v4118_v7  ;;  %v4417_v7 = vld [vmem:[%s6142_s22 + $0x178] sm:$0xff] }
 0x25e   :  { %v743_v63 = vadd.f32 %v742_v24, %v4058_v4  ;;  %v745_v4 = vsub.f32 1.0, %v739_v25  ;;  %1001 = vmatpush.msrb.mxu0 %v4417_v7  ;;  %v4523_v24 = vld [vmem:[%s6142_s22 + $0x10] sm:$0xff] }
 0x260   :  { %3200 = vtanh.f32 %v743_v63 }
 0x266   :  { %v3201_v49 = vpop.eup %3200 }
 0x267   :  { %v746_v40 = vmul.f32 %v3201_v49, %v745_v4 }
 0x269   :  { %v4386_v2 = vadd.f32 %v747_v57, %v746_v40 }
 0x26b   :  { %3136 = vst [vmem:[%s6113_s14 + $0x10] sm:$0xff] %v4386_v2  ;;  %815 = vmatmul.f32.vlgmr.msra.gmra.mxu3 %v4386_v2  ;;  %835 = vmatmul.f32.vlgmr.msra.gmra.mxu0 %v4386_v2 }
 0x26c   :  { %855 = vmatmul.f32.vlgmr.msrb.gmra.mxu1 %v4386_v2  ;;  %1163 = vmatpush.msra.mxu3 %v4417_v7 }
 0x26d   :  { %1305 = vmatpush.msrb.mxu1 %v4135_v61  ;;  %v4424_v61 = vld [vmem:[%s6142_s22 + $0x160] sm:$0xff] }
 0x26e   :  { %1002 = vmatpush.msrb.mxu0 %v4424_v61  ;;  %1164 = vmatpush.msra.mxu3 %v4424_v61 }
 0x26f   :  { %1306 = vmatpush.msrb.mxu1 %v4147_v55  ;;  %v4431_v55 = vld [vmem:[%s6142_s22 + $0x148] sm:$0xff] }
 0x270   :  { %1003 = vmatpush.msrb.mxu0 %v4431_v55  ;;  %1165 = vmatpush.msra.mxu3 %v4431_v55 }
 0x271   :  { %1307 = vmatpush.msrb.mxu1 %v4161_v3  ;;  %v4438_v3 = vld [vmem:[%s6142_s22 + $0x130] sm:$0xff] }
 0x272   :  { %1004 = vmatpush.msrb.mxu0 %v4438_v3  ;;  %1166 = vmatpush.msra.mxu3 %v4438_v3 }
 0x273   :  { %1308 = vmatpush.msrb.mxu1 %v4175_v16  ;;  %v4445_v16 = vld [vmem:[%s6142_s22 + $0x118] sm:$0xff] }
 0x274   :  { %1005 = vmatpush.msrb.mxu0 %v4445_v16  ;;  %1167 = vmatpush.msra.mxu3 %v4445_v16 }
 0x275   :  { %1309 = vmatpush.msrb.mxu1 %v4189_v22  ;;  %v184_v22 = vadd.f32 %v4101_v14, %v4040_v36 }
 0x277   :  { %1310 = vmatpush.msrb.mxu1 %v4203_v21  ;;  %v4454_v21 = vld [vmem:[%s6142_s22 + $0x100] sm:$0xff] }
 0x278   :  { %1006 = vmatpush.msrb.mxu0 %v4454_v21  ;;  %1168 = vmatpush.msra.mxu3 %v4454_v21 }
 0x279   :  { %1311 = vmatpush.msrb.mxu1 %v4217_v48 }
 0x27b   :  { %1312 = vmatpush.msrb.mxu1 %v4231_v58 }
 0x27d   :  { %1313 = vmatpush.msrb.mxu1 %v4247_v13  ;;  %v4461_v13 = vld [vmem:[%s6142_s22 + $0xe8] sm:$0xff] }
 0x27e   :  { %1007 = vmatpush.msrb.mxu0 %v4461_v13  ;;  %1169 = vmatpush.msra.mxu3 %v4461_v13 }
 0x27f   :  { %1314 = vmatpush.msrb.mxu1 %v4262_v20  ;;  %v4468_v20 = vld [vmem:[%s6142_s22 + $0xd0] sm:$0xff] }
 0x280   :  { %1008 = vmatpush.msrb.mxu0 %v4468_v20  ;;  %1170 = vmatpush.msra.mxu3 %v4468_v20 }
 0x281   :  { %1315 = vmatpush.msrb.mxu1 %v4276_v30  ;;  %v4475_v30 = vld [vmem:[%s6142_s22 + $0xb8] sm:$0xff] }
 0x282   :  { %1009 = vmatpush.msrb.mxu0 %v4475_v30  ;;  %1171 = vmatpush.msra.mxu3 %v4475_v30 }
 0x283   :  { %1316 = vmatpush.msrb.mxu1 %v4290_v37  ;;  %v4480_v37 = vld [vmem:[%s6142_s22 + $0xa0] sm:$0xff] }
 0x284   :  { %1010 = vmatpush.msrb.mxu0 %v4480_v37  ;;  %1172 = vmatpush.msra.mxu3 %v4480_v37 }
 0x285   :  { %1317 = vmatpush.msrb.mxu1 %v4304_v39 }
 0x287   :  { %1318 = vmatpush.msrb.mxu1 %v4318_v46 }
 0x289   :  { %1319 = vmatpush.msrb.mxu1 %v4332_v50  ;;  %v4488_v50 = vld [vmem:[%s6142_s22 + $0x88] sm:$0xff] }
 0x28a   :  { %1011 = vmatpush.msrb.mxu0 %v4488_v50  ;;  %1173 = vmatpush.msra.mxu3 %v4488_v50 }
 0x28b   :  { %1320 = vmatpush.msrb.mxu1 %v4342_v54 }
 0x28c   :  { %1012 = vmatpush.msrb.mxu0 %v4495_v51  ;;  %1174 = vmatpush.msra.mxu3 %v4495_v51 }
 0x28e   :  { %1013 = vmatpush.msrb.mxu0 %v4502_v59  ;;  %1175 = vmatpush.msra.mxu3 %v4502_v59 }
 0x290   :  { %1014 = vmatpush.msrb.mxu0 %v4509_v10  ;;  %1176 = vmatpush.msra.mxu3 %v4509_v10 }
 0x292   :  { %1015 = vmatpush.msrb.mxu0 %v4516_v12  ;;  %1177 = vmatpush.msra.mxu3 %v4516_v12 }
 0x294   :  { %1016 = vmatpush.msrb.mxu0 %v4523_v24  ;;  %1178 = vmatpush.msra.mxu3 %v4523_v24 }
 0x296   :  { %1285 = vmatpush.msra.mxu0 %v4130_v5 }
 0x298   :  { %1286 = vmatpush.msra.mxu0 %v4142_v8 }
 0x29a   :  { %1287 = vmatpush.msra.mxu0 %v4156_v62 }
 0x29c   :  { %1288 = vmatpush.msra.mxu0 %v4170_v6 }
 0x29e   :  { %1289 = vmatpush.msra.mxu0 %v4184_v18 }
 0x2a0   :  { %1290 = vmatpush.msra.mxu0 %v4198_v29 }
 0x2a2   :  { %1291 = vmatpush.msra.mxu0 %v4212_v35 }
 0x2a4   :  { %1292 = vmatpush.msra.mxu0 %v4226_v53 }
 0x2a6   :  { %1293 = vmatpush.msra.mxu0 %v4242_v11 }
 0x2a8   :  { %1294 = vmatpush.msra.mxu0 %v4257_v17 }
 0x2aa   :  { %1295 = vmatpush.msra.mxu0 %v4271_v26  ;;  %v187_v26 = vadd.f32 %v4103_v19, %v4040_v36 }
 0x2ac   :  { %1296 = vmatpush.msra.mxu0 %v4285_v33 }
 0x2ae   :  { %1297 = vmatpush.msra.mxu0 %v4299_v38 }
 0x2b0   :  { %1298 = vmatpush.msra.mxu0 %v4313_v43 }
 0x2b2   :  { %1299 = vmatpush.msra.mxu0 %v4327_v47 }
 0x2b4   :  { %1300 = vmatpush.msra.mxu0 %v4337_v52 }
 0x2e8   :  { %v836_v48 = vpop.f32.mrf.mxu0 }
 0x2e9   :  { %v883_v58 = vadd.f32 %v836_v48, %v184_v22  ;;  %v856_v48 = vpop.f32.mrf.mxu1 }
 0x2ea   :  { %v903_v6 = vadd.f32 %v4055_v42, %v856_v48 }
 0x2eb   :  { %v3138_v14 = vmul.f32 -1.442695, %v883_v58 }
 0x2ed   :  { %3202 = vpow2.f32 %v3138_v14 }
 0x2ee   :  { %v816_v39 = vpop.f32.mrf.mxu3 }
 0x2ef   :  { %v863_v46 = vadd.f32 %v816_v39, %v4034_v28 }
 0x2f1   :  { %v3137_v54 = vmul.f32 -1.442695, %v863_v46 }
 0x2f3   :  { %v3203_v28 = vpop.eup %3202  ;;  %3204 = vpow2.f32 %v3137_v54 }
 0x2f4   :  { %v887_v23 = vadd.f32 1.0, %v3203_v28 }
 0x2f6   :  { %3206 = vrcp.f32 %v887_v23  ;;  %v899_v39 = vand.u32 2147483648, %v887_v23  ;;  %vm893_vm13 = vweird.f32 %v887_v23  ;;  %v897_v29 = vand.u32 2147483647, %v887_v23 }
 0x2f8   :  { %v900_v28 = vor.u32 1.1754944e-38, %v899_v39  ;;  %vm898_vm15 = vcmp.eq.f32.partialorder %v897_v29, 8.507059e+37 }
 0x2f9   :  { %v3205_v15 = vpop.eup %3204 }
 0x2fa   :  { %v867_v60 = vadd.f32 1.0, %v3205_v15 }
 0x2fc   :  { %3208 = vrcp.f32 %v867_v60  ;;  %v3207_v63 = vpop.eup %3206  ;;  %v879_v40 = vand.u32 2147483648, %v867_v60  ;;  %v877_v22 = vand.u32 2147483647, %v867_v60  ;;  %vm873_vm9 = vweird.f32 %v867_v60 }
 0x2fd   :  { %v889_v45 = vmul.f32 %v3207_v63, %v887_v23  ;;  %vm894_vm12 = vweird.f32 %v3207_v63 }
 0x2fe   :  { %v880_v62 = vor.u32 1.1754944e-38, %v879_v40  ;;  %vm878_vm11 = vcmp.eq.f32.partialorder %v877_v22, 8.507059e+37  ;;  %vm895_vm14 = vmor %vm893_vm13, %vm894_vm12 }
 0x2ff   :  { %v890_v4 = vsub.f32 1.0, %v889_v45 }
 0x301   :  { %v891_v5 = vmul.f32 %v3207_v63, %v890_v4 }
 0x302   :  { %v3209_v0 = vpop.eup %3208 }
 0x303   :  { %v869_v25 = vmul.f32 %v3209_v0, %v867_v60  ;;  %vm874_vm8 = vweird.f32 %v3209_v0  ;;  %v892_v18 = vadd.f32 %v3207_v63, %v891_v5 }
 0x304   :  { %vm875_vm10 = vmor %vm873_vm9, %vm874_vm8 }
 0x305   :  { %v870_v49 = vsub.f32 1.0, %v869_v25  ;;  %v896_v54 = vsel %vm895_vm14, %v3207_v63, %v892_v18 }
 0x306   :  { %v901_v53 = vsel %vm898_vm15, %v900_v28, %v896_v54 }
 0x307   :  { %v871_v57 = vmul.f32 %v3209_v0, %v870_v49  ;;  %v907_v15 = vsub.f32 1.0, %v901_v53 }
 0x309   :  { %v872_v8 = vadd.f32 %v3209_v0, %v871_v57 }
 0x30b   :  { %v876_v58 = vsel %vm875_vm10, %v3209_v0, %v872_v8 }
 0x30c   :  { %v881_v14 = vsel %vm878_vm11, %v880_v62, %v876_v58 }
 0x30d   :  { %v904_v46 = vmul.f32 %v903_v6, %v881_v14 }
 0x30f   :  { %v905_v35 = vadd.f32 %v904_v46, %v4063_v44  ;;  %v909_v44 = vmul.f32 %v901_v53, %v4386_v2 }
 0x311   :  { %3210 = vtanh.f32 %v905_v35 }
 0x317   :  { %v3211_v11 = vpop.eup %3210 }
 0x318   :  { %v908_v23 = vmul.f32 %v3211_v11, %v907_v15 }
 0x31a   :  { %v4547_v17 = vadd.f32 %v909_v44, %v908_v23 }
 0x31c   :  { %3139 = vst [vmem:[%s6113_s14 + $0x18] sm:$0xff] %v4547_v17  ;;  %977 = vmatmul.f32.vlgmr.msrb.gmra.mxu2 %v4547_v17  ;;  %997 = vmatmul.f32.vlgmr.msrb.gmra.mxu3 %v4547_v17 }
 0x31d   :  { %1017 = vmatmul.f32.vlgmr.msrb.gmra.mxu0 %v4547_v17  ;;  %1325 = vmatpush.msrb.mxu2 %v4417_v7 }
 0x31f   :  { %1326 = vmatpush.msrb.mxu2 %v4424_v61 }
 0x321   :  { %1327 = vmatpush.msrb.mxu2 %v4431_v55 }
 0x323   :  { %1328 = vmatpush.msrb.mxu2 %v4438_v3 }
 0x325   :  { %1329 = vmatpush.msrb.mxu2 %v4445_v16 }
 0x327   :  { %1330 = vmatpush.msrb.mxu2 %v4454_v21 }
 0x329   :  { %1331 = vmatpush.msrb.mxu2 %v4461_v13 }
 0x32b   :  { %1332 = vmatpush.msrb.mxu2 %v4468_v20 }
 0x32d   :  { %1333 = vmatpush.msrb.mxu2 %v4475_v30 }
 0x32f   :  { %1334 = vmatpush.msrb.mxu2 %v4480_v37 }
 0x331   :  { %1335 = vmatpush.msrb.mxu2 %v4488_v50 }
 0x333   :  { %1336 = vmatpush.msrb.mxu2 %v4495_v51 }
 0x335   :  { %1337 = vmatpush.msrb.mxu2 %v4502_v59 }
 0x337   :  { %1338 = vmatpush.msrb.mxu2 %v4509_v10 }
 0x339   :  { %1339 = vmatpush.msrb.mxu2 %v4516_v12 }
 0x33b   :  { %1340 = vmatpush.msrb.mxu2 %v4523_v24 }
 0x39a   :  { %v1018_v48 = vpop.f32.mrf.mxu0 }
 0x39b   :  { %v1065_v58 = vadd.f32 %v4055_v42, %v1018_v48 }
 0x39f   :  { %v978_v33 = vpop.f32.mrf.mxu2  ;;  %v998_v38 = vpop.f32.mrf.mxu3 }
 0x3a0   :  { %v1025_v43 = vadd.f32 %v978_v33, %v4036_v31  ;;  %v1045_v47 = vadd.f32 %v998_v38, %v187_v26 }
 0x3a2   :  { %v3140_v52 = vmul.f32 -1.442695, %v1025_v43  ;;  %v3141_v2 = vmul.f32 -1.442695, %v1045_v47 }
 0x3a4   :  { %3212 = vpow2.f32 %v3140_v52  ;;  %v4610_v52 = vld [vmem:[%s6111_s5] ss:$0 sm:$0xff] }
 0x3a5   :  { %3214 = vpow2.f32 %v3141_v2 }
 0x3aa   :  { %v3213_v60 = vpop.eup %3212 }
 0x3ab   :  { %v3215_v63 = vpop.eup %3214  ;;  %v1029_v45 = vadd.f32 1.0, %v3213_v60 }
 0x3ac   :  { %v1049_v0 = vadd.f32 1.0, %v3215_v63 }
 0x3ad   :  { %3216 = vrcp.f32 %v1029_v45  ;;  %v1041_v57 = vand.u32 2147483648, %v1029_v45  ;;  %v1039_v31 = vand.u32 2147483647, %v1029_v45  ;;  %vm1035_vm1 = vweird.f32 %v1029_v45 }
 0x3ae   :  { %3218 = vrcp.f32 %v1049_v0  ;;  %v1061_v29 = vand.u32 2147483648, %v1049_v0  ;;  %vm1055_vm5 = vweird.f32 %v1049_v0  ;;  %v1059_v35 = vand.u32 2147483647, %v1049_v0 }
 0x3af   :  { %v1042_v6 = vor.u32 1.1754944e-38, %v1041_v57  ;;  %vm1040_vm3 = vcmp.eq.f32.partialorder %v1039_v31, 8.507059e+37 }
 0x3b0   :  { %v1062_v53 = vor.u32 1.1754944e-38, %v1061_v29  ;;  %vm1060_vm7 = vcmp.eq.f32.partialorder %v1059_v35, 8.507059e+37  ;;  %v1432_v29 = vld [vmem:[%s6142_s22 + $0x108] sm:$0xff]  ;;  %v1433_v35 = vld [vmem:[%s6142_s22 + $0x110] sm:$0xff] }
 0x3b3   :  { %v3217_v25 = vpop.eup %3216 }
 0x3b4   :  { %v3219_v4 = vpop.eup %3218  ;;  %v1031_v49 = vmul.f32 %v3217_v25, %v1029_v45  ;;  %vm1036_vm0 = vweird.f32 %v3217_v25 }
 0x3b5   :  { %v1051_v40 = vmul.f32 %v3219_v4, %v1049_v0  ;;  %vm1037_vm2 = vmor %vm1035_vm1, %vm1036_vm0  ;;  %vm1056_vm4 = vweird.f32 %v3219_v4 }
 0x3b6   :  { %v1032_v19 = vsub.f32 1.0, %v1031_v49  ;;  %vm1057_vm6 = vmor %vm1055_vm5, %vm1056_vm4 }
 0x3b7   :  { %v1052_v22 = vsub.f32 1.0, %v1051_v40 }
 0x3b8   :  { %v1033_v5 = vmul.f32 %v3217_v25, %v1032_v19 }
 0x3b9   :  { %v1053_v8 = vmul.f32 %v3219_v4, %v1052_v22 }
 0x3ba   :  { %v1034_v62 = vadd.f32 %v3217_v25, %v1033_v5 }
 0x3bb   :  { %v1054_v39 = vadd.f32 %v3219_v4, %v1053_v8 }
 0x3bc   :  { %v1038_v18 = vsel %vm1037_vm2, %v3217_v25, %v1034_v62  ;;  %v1445_v62 = vld [vmem:[%s6142_s22 + $0x170] sm:$0xff] }
 0x3bd   :  { %v1043_v14 = vsel %vm1040_vm3, %v1042_v6, %v1038_v18  ;;  %v1058_v28 = vsel %vm1057_vm6, %v3219_v4, %v1054_v39  ;;  %1467 = vmatpush.msrb.mxu0 %v1445_v62  ;;  %v1441_v6 = vld [vmem:[%s6142_s22 + $0x150] sm:$0xff]  ;;  %v1438_v18 = vld [vmem:[%s6142_s22 + $0x138] sm:$0xff]  ;;  %v1435_v39 = vld [vmem:[%s6142_s22 + $0x120] sm:$0xff] }
 0x3be   :  { %v1066_v46 = vmul.f32 %v1065_v58, %v1043_v14  ;;  %v1063_v15 = vsel %vm1060_vm7, %v1062_v53, %v1058_v28  ;;  %v1442_v58 = vld [vmem:[%s6142_s22 + $0x158] sm:$0xff]  ;;  %v1439_v14 = vld [vmem:[%s6142_s22 + $0x140] sm:$0xff] }
 0x3bf   :  { %v1069_v11 = vsub.f32 1.0, %v1063_v15  ;;  %v1071_v44 = vmul.f32 %v1063_v15, %v4547_v17  ;;  %1468 = vmatpush.msrb.mxu0 %v1442_v58  ;;  %v1430_v28 = vld [vmem:[%s6142_s22 + $0xf8] sm:$0xff]  ;;  %v1427_v15 = vld [vmem:[%s6142_s22 + $0xe0] sm:$0xff] }
 0x3c0   :  { %v1067_v54 = vadd.f32 %v1066_v46, %v4066_v56  ;;  %v1436_v46 = vld [vmem:[%s6142_s22 + $0x128] sm:$0xff]  ;;  %v1426_v53 = vld [vmem:[%s6142_s22 + $0xd8] sm:$0xff] }
 0x3c1   :  { %1469 = vmatpush.msrb.mxu0 %v1439_v14 }
 0x3c2   :  { %3220 = vtanh.f32 %v1067_v54  ;;  %v1429_v54 = vld [vmem:[%s6142_s22 + $0xf0] sm:$0xff] }
 0x3c3   :  { %1470 = vmatpush.msrb.mxu0 %v1436_v46 }
 0x3c5   :  { %1471 = vmatpush.msrb.mxu0 %v1433_v35 }
 0x3c7   :  { %1472 = vmatpush.msrb.mxu0 %v1430_v28 }
 0x3c8   :  { %v3221_v23 = vpop.eup %3220 }
 0x3c9   :  { %v1070_v42 = vmul.f32 %v3221_v23, %v1069_v11  ;;  %1473 = vmatpush.msrb.mxu0 %v1427_v15  ;;  %v1423_v11 = vld [vmem:[%s6142_s22 + $0xc0] sm:$0xff]  ;;  %v1424_v23 = vld [vmem:[%s6142_s22 + $0xc8] sm:$0xff] }
 0x3ca   :  { %v1590_v15 = vld [vmem:[%s6114_s6 + $0xe8] sm:$0xff] }
 0x3cb   :  { %v4579_v26 = vadd.f32 %v1071_v44, %v1070_v42  ;;  %1474 = vmatpush.msrb.mxu0 %v1424_v23  ;;  %v193_v42 = vadd.f32 %v4107_v32, %v4040_v36  ;;  %v1420_v44 = vld [vmem:[%s6142_s22 + $0xa8] sm:$0xff]  ;;  %v1418_v32 = vld [vmem:[%s6142_s22 + $0x98] sm:$0xff] }
 0x3cc   :  { %v1588_v23 = vld [vmem:[%s6114_s6 + $0xd8] sm:$0xff] }
 0x3cd   :  { %3142 = vst [vmem:[%s6113_s14 + $0x20] sm:$0xff] %v4579_v26  ;;  %1139 = vmatmul.f32.vlgmr.msra.gmra.mxu1 %v4579_v26  ;;  %1159 = vmatmul.f32.vlgmr.msra.gmra.mxu2 %v4579_v26 }
 0x3ce   :  { %1179 = vmatmul.f32.vlgmr.msra.gmra.mxu3 %v4579_v26  ;;  %1487 = vmatpush.msra.mxu1 %v4417_v7 }
 0x3d0   :  { %1488 = vmatpush.msra.mxu1 %v4424_v61 }
 0x3d2   :  { %1489 = vmatpush.msra.mxu1 %v4431_v55  ;;  %v190_v55 = vadd.f32 %v4105_v27, %v4040_v36 }
 0x3d4   :  { %1490 = vmatpush.msra.mxu1 %v4438_v3 }
 0x3d6   :  { %1491 = vmatpush.msra.mxu1 %v4445_v16 }
 0x3d8   :  { %1492 = vmatpush.msra.mxu1 %v4454_v21 }
 0x3da   :  { %1493 = vmatpush.msra.mxu1 %v4461_v13 }
 0x3dc   :  { %1494 = vmatpush.msra.mxu1 %v4468_v20 }
 0x3de   :  { %1495 = vmatpush.msra.mxu1 %v4475_v30 }
 0x3e0   :  { %1496 = vmatpush.msra.mxu1 %v4480_v37 }
 0x3e2   :  { %1497 = vmatpush.msra.mxu1 %v4488_v50 }
 0x3e4   :  { %1498 = vmatpush.msra.mxu1 %v4495_v51 }
 0x3e6   :  { %1499 = vmatpush.msra.mxu1 %v4502_v59 }
 0x3e8   :  { %1500 = vmatpush.msra.mxu1 %v4509_v10 }
 0x3ea   :  { %1501 = vmatpush.msra.mxu1 %v4516_v12 }
 0x3ec   :  { %1502 = vmatpush.msra.mxu1 %v4523_v24 }
 0x44a   :  { %v1140_v56 = vpop.f32.mrf.mxu1 }
 0x44b   :  { %v1187_v7 = vadd.f32 %v1140_v56, %v4038_v34 }
 0x44d   :  { %v3143_v61 = vmul.f32 -1.442695, %v1187_v7 }
 0x44f   :  { %3222 = vpow2.f32 %v3143_v61 }
 0x450   :  { %v1160_v3 = vpop.f32.mrf.mxu2 }
 0x451   :  { %v1207_v16 = vadd.f32 %v1160_v3, %v190_v55  ;;  %v1180_v27 = vpop.f32.mrf.mxu3  ;;  %v1417_v3 = vld [vmem:[%s6142_s22 + $0x90] sm:$0xff] }
 0x452   :  { %v1227_v2 = vadd.f32 %v4610_v52, %v1180_v27  ;;  %v1400_v27 = vld [vmem:[%s6142_s22 + $0x8] sm:$0xff] }
 0x453   :  { %v3144_v21 = vmul.f32 -1.442695, %v1207_v16 }
 0x455   :  { %v3223_v13 = vpop.eup %3222  ;;  %3224 = vpow2.f32 %v3144_v21 }
 0x456   :  { %v1191_v20 = vadd.f32 1.0, %v3223_v13  ;;  %v1414_v13 = vld [vmem:[%s6142_s22 + $0x78] sm:$0xff] }
 0x458   :  { %3226 = vrcp.f32 %v1191_v20  ;;  %v1203_v10 = vand.u32 2147483648, %v1191_v20  ;;  %v1201_v12 = vand.u32 2147483647, %v1191_v20  ;;  %vm1197_vm9 = vweird.f32 %v1191_v20 }
 0x45a   :  { %v1204_v38 = vor.u32 1.1754944e-38, %v1203_v10  ;;  %vm1202_vm11 = vcmp.eq.f32.partialorder %v1201_v12, 8.507059e+37  ;;  %v1402_v10 = vld [vmem:[%s6142_s22 + $0x18] sm:$0xff] }
 0x45b   :  { %v3225_v30 = vpop.eup %3224 }
 0x45c   :  { %v1211_v37 = vadd.f32 1.0, %v3225_v30  ;;  %v1412_v30 = vld [vmem:[%s6142_s22 + $0x68] sm:$0xff] }
 0x45e   :  { %v3227_v50 = vpop.eup %3226  ;;  %3228 = vrcp.f32 %v1211_v37  ;;  %v1223_v45 = vand.u32 2147483648, %v1211_v37  ;;  %v1221_v25 = vand.u32 2147483647, %v1211_v37  ;;  %vm1217_vm13 = vweird.f32 %v1211_v37 }
 0x45f   :  { %v1193_v51 = vmul.f32 %v3227_v50, %v1191_v20  ;;  %vm1198_vm8 = vweird.f32 %v3227_v50  ;;  %v1411_v20 = vld [vmem:[%s6142_s22 + $0x60] sm:$0xff] }
 0x460   :  { %vm1199_vm10 = vmor %vm1197_vm9, %vm1198_vm8  ;;  %v1224_v40 = vor.u32 1.1754944e-38, %v1223_v45  ;;  %vm1222_vm15 = vcmp.eq.f32.partialorder %v1221_v25, 8.507059e+37 }
 0x461   :  { %v1194_v59 = vsub.f32 1.0, %v1193_v51  ;;  %v1405_v51 = vld [vmem:[%s6142_s22 + $0x30] sm:$0xff] }
 0x463   :  { %v1195_v34 = vmul.f32 %v3227_v50, %v1194_v59  ;;  %v1406_v59 = vld [vmem:[%s6142_s22 + $0x38] sm:$0xff] }
 0x464   :  { %v3229_v24 = vpop.eup %3228 }
 0x465   :  { %v1213_v17 = vmul.f32 %v3229_v24, %v1211_v37  ;;  %v1196_v33 = vadd.f32 %v3227_v50, %v1195_v34  ;;  %vm1218_vm12 = vweird.f32 %v3229_v24  ;;  %v1408_v37 = vld [vmem:[%s6142_s22 + $0x48] sm:$0xff]  ;;  %v1403_v34 = vld [vmem:[%s6142_s22 + $0x20] sm:$0xff] }
 0x466   :  { %vm1219_vm14 = vmor %vm1217_vm13, %vm1218_vm12 }
 0x467   :  { %v1214_v43 = vsub.f32 1.0, %v1213_v17  ;;  %v1200_v47 = vsel %vm1199_vm10, %v3227_v50, %v1196_v33  ;;  %v1409_v50 = vld [vmem:[%s6142_s22 + $0x50] sm:$0xff] }
 0x468   :  { %v1205_v60 = vsel %vm1202_vm11, %v1204_v38, %v1200_v47 }
 0x469   :  { %v1215_v63 = vmul.f32 %v3229_v24, %v1214_v43  ;;  %v1228_v0 = vmul.f32 %v1227_v2, %v1205_v60 }
 0x46b   :  { %v1216_v4 = vadd.f32 %v3229_v24, %v1215_v63  ;;  %v1229_v49 = vadd.f32 %v1228_v0, %v4079_v1  ;;  %v1444_v1 = vld [vmem:[%s6142_s22 + $0x168] sm:$0xff] }
 0x46c   :  { %1447 = vmatpush.msrb.mxu3 %v1444_v1 }
 0x46d   :  { %v1220_v19 = vsel %vm1219_vm14, %v3229_v24, %v1216_v4  ;;  %3230 = vtanh.f32 %v1229_v49  ;;  %v1399_v24 = vld [vmem:[%s6142_s22] sm:$0xff] }
 0x46e   :  { %v1225_v57 = vsel %vm1222_vm15, %v1224_v40, %v1220_v19  ;;  %1448 = vmatpush.msrb.mxu3 %v1441_v6 }
 0x46f   :  { %v1231_v22 = vsub.f32 1.0, %v1225_v57  ;;  %v1233_v48 = vmul.f32 %v1225_v57, %v4579_v26  ;;  %v1421_v26 = vld [vmem:[%s6142_s22 + $0xb0] sm:$0xff] }
 0x470   :  { %1449 = vmatpush.msrb.mxu3 %v1438_v18  ;;  %1475 = vmatpush.msrb.mxu0 %v1421_v26  ;;  %v1583_v26 = vld [vmem:[%s6114_s6 + $0xb0] sm:$0xff] }
 0x472   :  { %1450 = vmatpush.msrb.mxu3 %v1435_v39  ;;  %1476 = vmatpush.msrb.mxu0 %v1418_v32 }
 0x473   :  { %v3231_v5 = vpop.eup %3230 }
 0x474   :  { %v1232_v31 = vmul.f32 %v3231_v5, %v1231_v22  ;;  %1451 = vmatpush.msrb.mxu3 %v1432_v29 }
 0x476   :  { %v4615_v8 = vadd.f32 %v1233_v48, %v1232_v31  ;;  %1452 = vmatpush.msrb.mxu3 %v1429_v54 }
 0x478   :  { %3145 = vst [vmem:[%s6113_s14 + $0x28] sm:$0xff] %v4615_v8  ;;  %1301 = vmatmul.f32.vlgmr.msra.gmra.mxu0 %v4615_v8  ;;  %1321 = vmatmul.f32.vlgmr.msrb.gmra.mxu1 %v4615_v8 }
 0x479   :  { %1341 = vmatmul.f32.vlgmr.msrb.gmra.mxu2 %v4615_v8  ;;  %1453 = vmatpush.msrb.mxu3 %v1426_v53  ;;  %v1589_v53 = vld [vmem:[%s6114_s6 + $0xe0] sm:$0xff] }
 0x47b   :  { %1454 = vmatpush.msrb.mxu3 %v1423_v11  ;;  %v1587_v11 = vld [vmem:[%s6114_s6 + $0xd0] sm:$0xff] }
 0x47d   :  { %1455 = vmatpush.msrb.mxu3 %v1420_v44  ;;  %v1586_v44 = vld [vmem:[%s6114_s6 + $0xc8] sm:$0xff] }
 0x47f   :  { %1456 = vmatpush.msrb.mxu3 %v1417_v3  ;;  %v1582_v3 = vld [vmem:[%s6114_s6 + $0xa8] sm:$0xff] }
 0x481   :  { %1457 = vmatpush.msrb.mxu3 %v1414_v13 }
 0x483   :  { %1458 = vmatpush.msrb.mxu3 %v1411_v20  ;;  %v1578_v20 = vld [vmem:[%s6114_s6 + $0x88] sm:$0xff] }
 0x485   :  { %1459 = vmatpush.msrb.mxu3 %v1408_v37  ;;  %v1576_v37 = vld [vmem:[%s6114_s6 + $0x78] sm:$0xff] }
 0x487   :  { %1460 = vmatpush.msrb.mxu3 %v1405_v51  ;;  %v1574_v51 = vld [vmem:[%s6114_s6 + $0x68] sm:$0xff] }
 0x489   :  { %1461 = vmatpush.msrb.mxu3 %v1402_v10  ;;  %v6149_v10 = vld [vmem:[#allocation4_spill] sm:$0xff] }
 0x48b   :  { %1462 = vmatpush.msrb.mxu3 %v1399_v24  ;;  %v1572_v24 = vld [vmem:[%s6114_s6 + $0x58] sm:$0xff] }
 0x4f5   :  { %v1302_v56 = vpop.f32.mrf.mxu0  ;;  %v1322_v7 = vpop.f32.mrf.mxu1 }
 0x4f6   :  { %v1349_v61 = vadd.f32 %v1302_v56, %v4043_v41  ;;  %v1369_v55 = vadd.f32 %v1322_v7, %v193_v42  ;;  %v1415_v41 = vld [vmem:[%s6142_s22 + $0x80] sm:$0xff]  ;;  %v1584_v56 = vld [vmem:[%s6114_s6 + $0xb8] sm:$0xff]  ;;  %v6148_v7 = vld [vmem:[#allocation6_spill] sm:$0xff] }
 0x4f7   :  { %1477 = vmatpush.msrb.mxu0 %v1415_v41  ;;  %v1585_v42 = vld [vmem:[%s6114_s6 + $0xc0] sm:$0xff] }
 0x4f8   :  { %v3146_v16 = vmul.f32 -1.442695, %v1349_v61  ;;  %v3147_v21 = vmul.f32 -1.442695, %v1369_v55  ;;  %v196_v61 = vadd.f32 %v6148_v7, %v4040_v36  ;;  %v1581_v55 = vld [vmem:[%s6114_s6 + $0xa0] sm:$0xff]  ;;  %v1580_v36 = vld [vmem:[%s6114_s6 + $0x98] sm:$0xff] }
 0x4f9   :  { %1478 = vmatpush.msrb.mxu0 %v1412_v30  ;;  %v1577_v41 = vld [vmem:[%s6114_s6 + $0x80] sm:$0xff]  ;;  %v1575_v30 = vld [vmem:[%s6114_s6 + $0x70] sm:$0xff]  ;;  %v1674_v7 = vld [vmem:[%s6115_s8 + $0xc8] sm:$0xff] }
 0x4fa   :  { %3232 = vpow2.f32 %v3146_v16 }
 0x4fb   :  { %3234 = vpow2.f32 %v3147_v21  ;;  %1479 = vmatpush.msrb.mxu0 %v1409_v50  ;;  %v1579_v21 = vld [vmem:[%s6114_s6 + $0x90] sm:$0xff]  ;;  %v1573_v50 = vld [vmem:[%s6114_s6 + $0x60] sm:$0xff] }
 0x4fc   :  { %v1342_v40 = vpop.f32.mrf.mxu2 }
 0x4fd   :  { %1480 = vmatpush.msrb.mxu0 %v1406_v59  ;;  %v1389_v5 = vadd.f32 %v4610_v52, %v1342_v40 }
 0x4ff   :  { %1481 = vmatpush.msrb.mxu0 %v1403_v34 }
 0x500   :  { %v3233_v12 = vpop.eup %3232 }
 0x501   :  { %v3235_v17 = vpop.eup %3234  ;;  %v1353_v33 = vadd.f32 1.0, %v3233_v12  ;;  %1482 = vmatpush.msrb.mxu0 %v1400_v27  ;;  %v1571_v12 = vld [vmem:[%s6114_s6 + $0x50] sm:$0xff] }
 0x502   :  { %v1373_v38 = vadd.f32 1.0, %v3235_v17  ;;  %v1569_v17 = vld [vmem:[%s6114_s6 + $0x40] sm:$0xff] }
 0x503   :  { %3236 = vrcp.f32 %v1353_v33  ;;  %v1365_v0 = vand.u32 2147483648, %v1353_v33  ;;  %v1363_v4 = vand.u32 2147483647, %v1353_v33  ;;  %vm1359_vm1 = vweird.f32 %v1353_v33 }
 0x504   :  { %3238 = vrcp.f32 %v1373_v38  ;;  %v1385_v1 = vand.u32 2147483648, %v1373_v38  ;;  %vm1379_vm5 = vweird.f32 %v1373_v38  ;;  %v1383_v6 = vand.u32 2147483647, %v1373_v38 }
 0x505   :  { %v1366_v57 = vor.u32 1.1754944e-38, %v1365_v0  ;;  %vm1364_vm3 = vcmp.eq.f32.partialorder %v1363_v4, 8.507059e+37  ;;  %v1564_v0 = vld [vmem:[%s6114_s6 + $0x18] sm:$0xff]  ;;  %v1561_v4 = vld [vmem:[%s6114_s6] sm:$0xff] }
 0x506   :  { %v1386_v14 = vor.u32 1.1754944e-38, %v1385_v1  ;;  %vm1384_vm7 = vcmp.eq.f32.partialorder %v1383_v6, 8.507059e+37  ;;  %v1689_v1 = vld [vmem:[%s6115_s8 + $0x140] sm:$0xff] }
 0x507   :  { %v1685_v6 = vld [vmem:[%s6115_s8 + $0x120] sm:$0xff] }
 0x509   :  { %v3237_v43 = vpop.eup %3236 }
 0x50a   :  { %v3239_v47 = vpop.eup %3238  ;;  %v1355_v2 = vmul.f32 %v3237_v43, %v1353_v33  ;;  %vm1360_vm0 = vweird.f32 %v3237_v43  ;;  %v1570_v33 = vld [vmem:[%s6114_s6 + $0x48] sm:$0xff] }
 0x50b   :  { %v1375_v60 = vmul.f32 %v3239_v47, %v1373_v38  ;;  %vm1361_vm2 = vmor %vm1359_vm1, %vm1360_vm0  ;;  %vm1380_vm4 = vweird.f32 %v3239_v47 }
 0x50c   :  { %v1356_v63 = vsub.f32 1.0, %v1355_v2  ;;  %vm1381_vm6 = vmor %vm1379_vm5, %vm1380_vm4 }
 0x50d   :  { %v1376_v45 = vsub.f32 1.0, %v1375_v60  ;;  %v1565_v60 = vld [vmem:[%s6114_s6 + $0x20] sm:$0xff] }
 0x50e   :  { %v1357_v25 = vmul.f32 %v3237_v43, %v1356_v63  ;;  %v1566_v63 = vld [vmem:[%s6114_s6 + $0x28] sm:$0xff] }
 0x50f   :  { %v1377_v49 = vmul.f32 %v3239_v47, %v1376_v45  ;;  %v1563_v45 = vld [vmem:[%s6114_s6 + $0x10] sm:$0xff] }
 0x510   :  { %v1358_v19 = vadd.f32 %v3237_v43, %v1357_v25 }
 0x511   :  { %v1378_v31 = vadd.f32 %v3239_v47, %v1377_v49  ;;  %v1562_v49 = vld [vmem:[%s6114_s6 + $0x8] sm:$0xff] }
 0x512   :  { %v1362_v22 = vsel %vm1361_vm2, %v3237_v43, %v1358_v19  ;;  %v1567_v43 = vld [vmem:[%s6114_s6 + $0x30] sm:$0xff]  ;;  %v1694_v19 = vld [vmem:[%s6115_s8 + $0x168] sm:$0xff] }
 0x513   :  { %v1367_v48 = vsel %vm1364_vm3, %v1366_v57, %v1362_v22  ;;  %v1382_v18 = vsel %vm1381_vm6, %v3239_v47, %v1378_v31  ;;  %v1568_v47 = vld [vmem:[%s6114_s6 + $0x38] sm:$0xff]  ;;  %v1695_v57 = vld [vmem:[%s6115_s8 + $0x170] sm:$0xff]  ;;  %1705 = vmatpush.msra.mxu0 %v1694_v19 }
 0x514   :  { %v1390_v62 = vmul.f32 %v1389_v5, %v1367_v48  ;;  %v1387_v39 = vsel %vm1384_vm7, %v1386_v14, %v1382_v18  ;;  %v1691_v22 = vld [vmem:[%s6115_s8 + $0x150] sm:$0xff]  ;;  %1725 = vmatpush.msrb.mxu1 %v1695_v57  ;;  %v1692_v31 = vld [vmem:[%s6115_s8 + $0x158] sm:$0xff]  ;;  %v1682_v14 = vld [vmem:[%s6115_s8 + $0x108] sm:$0xff] }
 0x515   :  { %v1393_v46 = vsub.f32 1.0, %v1387_v39  ;;  %v1395_v54 = vmul.f32 %v1387_v39, %v4615_v8  ;;  %v1592_v8 = vld [vmem:[%s6114_s6 + $0xf8] sm:$0xff]  ;;  %1706 = vmatpush.msra.mxu0 %v1691_v22  ;;  %v1683_v39 = vld [vmem:[%s6115_s8 + $0x110] sm:$0xff]  ;;  %v1653_v22 = vld [vmem:[%s6115_s8 + $0x20] sm:$0xff] }
 0x516   :  { %v1391_v58 = vadd.f32 %v1390_v62, %v4086_v9  ;;  %v1591_v9 = vld [vmem:[%s6114_s6 + $0xf0] sm:$0xff]  ;;  %1619 = vmatpush.msra.mxu3 %v1592_v8  ;;  %v1688_v48 = vld [vmem:[%s6115_s8 + $0x138] sm:$0xff]  ;;  %1726 = vmatpush.msrb.mxu1 %v1692_v31 }
 0x517   :  { %1599 = vmatpush.msra.mxu2 %v1591_v9  ;;  %1707 = vmatpush.msra.mxu0 %v1688_v48  ;;  %v1652_v57 = vld [vmem:[%s6115_s8 + $0x18] sm:$0xff] }
 0x518   :  { %3240 = vtanh.f32 %v1391_v58  ;;  %1620 = vmatpush.msra.mxu3 %v1590_v15  ;;  %v1686_v58 = vld [vmem:[%s6115_s8 + $0x128] sm:$0xff]  ;;  %1727 = vmatpush.msrb.mxu1 %v1689_v1  ;;  %v1677_v15 = vld [vmem:[%s6115_s8 + $0xe0] sm:$0xff] }
 0x519   :  { %1600 = vmatpush.msra.mxu2 %v1589_v53  ;;  %1708 = vmatpush.msra.mxu0 %v1685_v6  ;;  %v1676_v53 = vld [vmem:[%s6115_s8 + $0xd8] sm:$0xff]  ;;  %v1649_v1 = vld [vmem:[%s6115_s8] sm:$0xff] }
 0x51a   :  { %1621 = vmatpush.msra.mxu3 %v1588_v23  ;;  %1728 = vmatpush.msrb.mxu1 %v1686_v58  ;;  %v5009_v58 = vld [vmem:[%s6116_s9 + $0x170] sm:$0xff] }
 0x51b   :  { %1601 = vmatpush.msra.mxu2 %v1587_v11  ;;  %1709 = vmatpush.msra.mxu0 %v1682_v14  ;;  %v5027_v14 = vld [vmem:[%s6116_s9 + $0x160] sm:$0xff] }
 0x51c   :  { %1622 = vmatpush.msra.mxu3 %v1586_v44  ;;  %1729 = vmatpush.msrb.mxu1 %v1683_v39  ;;  %v5034_v39 = vld [vmem:[%s6116_s9 + $0x140] sm:$0xff] }
 0x51d   :  { %1602 = vmatpush.msra.mxu2 %v1585_v42  ;;  %v4892_v42 = vld [vmem:[%s6116_s9 + $0x168] sm:$0xff] }
 0x51e   :  { %v3241_v29 = vpop.eup %3240  ;;  %1623 = vmatpush.msra.mxu3 %v1584_v56  ;;  %v1673_v56 = vld [vmem:[%s6115_s8 + $0xc0] sm:$0xff] }
 0x51f   :  { %v1394_v35 = vmul.f32 %v3241_v29, %v1393_v46  ;;  %1603 = vmatpush.msra.mxu2 %v1583_v26 }
 0x520   :  { %1624 = vmatpush.msra.mxu3 %v1582_v3  ;;  %v4911_v3 = vld [vmem:[%s6116_s9 + $0x138] sm:$0xff] }
 0x521   :  { %v4726_v28 = vadd.f32 %v1395_v54, %v1394_v35  ;;  %1604 = vmatpush.msra.mxu2 %v1581_v55  ;;  %v1679_v35 = vld [vmem:[%s6115_s8 + $0xf0] sm:$0xff]  ;;  %v1680_v54 = vld [vmem:[%s6115_s8 + $0xf8] sm:$0xff] }
 0x522   :  { %1625 = vmatpush.msra.mxu3 %v1580_v36  ;;  %1710 = vmatpush.msra.mxu0 %v1679_v35  ;;  %v5051_v35 = vld [vmem:[%s6116_s9 + $0x130] sm:$0xff] }
 0x523   :  { %3148 = vst [vmem:[%s6113_s14 + $0x30] sm:$0xff] %v4726_v28  ;;  %1463 = vmatmul.f32.vlgmr.msrb.gmra.mxu3 %v4726_v28  ;;  %1483 = vmatmul.f32.vlgmr.msrb.gmra.mxu0 %v4726_v28 }
 0x524   :  { %1503 = vmatmul.f32.vlgmr.msra.gmra.mxu1 %v4726_v28  ;;  %1605 = vmatpush.msra.mxu2 %v1579_v21  ;;  %v1671_v21 = vld [vmem:[%s6115_s8 + $0xb0] sm:$0xff] }
 0x525   :  { %1626 = vmatpush.msra.mxu3 %v1578_v20  ;;  %1730 = vmatpush.msrb.mxu1 %v1680_v54  ;;  %v5058_v54 = vld [vmem:[%s6116_s9 + $0x110] sm:$0xff] }
 0x526   :  { %1606 = vmatpush.msra.mxu2 %v1577_v41  ;;  %1711 = vmatpush.msra.mxu0 %v1676_v53  ;;  %v4925_v41 = vld [vmem:[%s6116_s9 + $0x120] sm:$0xff] }
 0x527   :  { %1627 = vmatpush.msra.mxu3 %v1576_v37  ;;  %1731 = vmatpush.msrb.mxu1 %v1677_v15  ;;  %v1667_v37 = vld [vmem:[%s6115_s8 + $0x90] sm:$0xff]  ;;  %v5075_v53 = vld [vmem:[%s6116_s9 + $0x100] sm:$0xff] }
 0x528   :  { %1607 = vmatpush.msra.mxu2 %v1575_v30  ;;  %1712 = vmatpush.msra.mxu0 %v1673_v56  ;;  %v5082_v15 = vld [vmem:[%s6116_s9 + $0xe0] sm:$0xff]  ;;  %v5114_v56 = vld [vmem:[%s6116_s9 + $0xa8] sm:$0xff] }
 0x529   :  { %1628 = vmatpush.msra.mxu3 %v1574_v51  ;;  %1732 = vmatpush.msrb.mxu1 %v1674_v7  ;;  %v6151_v51 = vld [vmem:[#allocation7_spill] sm:$0xff]  ;;  %v5119_v7 = vld [vmem:[%s6116_s9 + $0xb0] sm:$0xff] }
 0x52a   :  { %1608 = vmatpush.msra.mxu2 %v1573_v50  ;;  %v6150_v50 = vld [vmem:[#allocation5_spill] sm:$0xff] }
 0x52b   :  { %1629 = vmatpush.msra.mxu3 %v1572_v24  ;;  %1733 = vmatpush.msrb.mxu1 %v1671_v21  ;;  %v5142_v21 = vld [vmem:[%s6116_s9 + $0xa0] sm:$0xff] }
 0x52c   :  { %1609 = vmatpush.msra.mxu2 %v1571_v12  ;;  %v4942_v12 = vld [vmem:[%s6116_s9 + $0x108] sm:$0xff] }
 0x52d   :  { %1630 = vmatpush.msra.mxu3 %v1570_v33  ;;  %v5232_v33 = vld [vmem:[%s6116_s9 + $0x20] sm:$0xff] }
 0x52e   :  { %1610 = vmatpush.msra.mxu2 %v1569_v17  ;;  %v1665_v17 = vld [vmem:[%s6115_s8 + $0x80] sm:$0xff] }
 0x52f   :  { %1631 = vmatpush.msra.mxu3 %v1568_v47 }
 0x530   :  { %1611 = vmatpush.msra.mxu2 %v1567_v43  ;;  %v4962_v43 = vld [vmem:[%s6116_s9 + $0xf0] sm:$0xff] }
 0x531   :  { %1632 = vmatpush.msra.mxu3 %v1566_v63 }
 0x532   :  { %1612 = vmatpush.msra.mxu2 %v1565_v60  ;;  %v1662_v60 = vld [vmem:[%s6115_s8 + $0x68] sm:$0xff] }
 0x533   :  { %1633 = vmatpush.msra.mxu3 %v1564_v0  ;;  %v1658_v0 = vld [vmem:[%s6115_s8 + $0x48] sm:$0xff] }
 0x534   :  { %1613 = vmatpush.msra.mxu2 %v1563_v45  ;;  %v4977_v45 = vld [vmem:[%s6116_s9 + $0xd8] sm:$0xff] }
 0x535   :  { %1634 = vmatpush.msra.mxu3 %v1562_v49  ;;  %v1655_v49 = vld [vmem:[%s6115_s8 + $0x30] sm:$0xff] }
 0x536   :  { %1614 = vmatpush.msra.mxu2 %v1561_v4 }
 0x537   :  { %1817 = vmatpush.msrb.mxu3 %v4892_v42 }
 0x5a0   :  { %v1484_v32 = vpop.f32.mrf.mxu0 }
 0x5a1   :  { %v1531_v16 = vadd.f32 %v1484_v32, %v196_v61  ;;  %v1504_v26 = vpop.f32.mrf.mxu1  ;;  %v4905_v61 = vld [vmem:[%s6116_s9 + $0x150] sm:$0xff] }
 0x5a2   :  { %1818 = vmatpush.msrb.mxu3 %v4905_v61  ;;  %v1551_v36 = vadd.f32 %v4610_v52, %v1504_v26  ;;  %v1668_v52 = vld [vmem:[%s6115_s8 + $0x98] sm:$0xff]  ;;  %v5106_v26 = vld [vmem:[%s6116_s9 + $0xd0] sm:$0xff] }
 0x5a3   :  { %v3150_v13 = vmul.f32 -1.442695, %v1531_v16  ;;  %v1670_v16 = vld [vmem:[%s6115_s8 + $0xa8] sm:$0xff]  ;;  %1734 = vmatpush.msrb.mxu1 %v1668_v52  ;;  %v5178_v52 = vld [vmem:[%s6116_s9 + $0x70] sm:$0xff] }
 0x5a4   :  { %1819 = vmatpush.msrb.mxu3 %v4911_v3  ;;  %1713 = vmatpush.msra.mxu0 %v1670_v16  ;;  %v5137_v16 = vld [vmem:[%s6116_s9 + $0x98] sm:$0xff] }
 0x5a5   :  { %3242 = vpow2.f32 %v3150_v13  ;;  %1735 = vmatpush.msrb.mxu1 %v1665_v17  ;;  %v5227_v17 = vld [vmem:[%s6116_s9 + $0x18] sm:$0xff] }
 0x5a6   :  { %v1464_v59 = vpop.f32.mrf.mxu3  ;;  %1820 = vmatpush.msrb.mxu3 %v4925_v41  ;;  %1714 = vmatpush.msra.mxu0 %v1667_v37  ;;  %v5173_v37 = vld [vmem:[%s6116_s9 + $0x68] sm:$0xff] }
 0x5a7   :  { %v1511_v34 = vadd.f32 %v1464_v59, %v6149_v10  ;;  %v237_v59 = vadd.f32 %v6151_v51, %v6150_v50  ;;  %1736 = vmatpush.msrb.mxu1 %v1662_v60  ;;  %v5185_v50 = vld [vmem:[%s6143_s24] sm:$0xff]  ;;  %v5192_v51 = vld [vmem:[%s6116_s9 + $0x48] sm:$0xff] }
 0x5a8   :  { %1821 = vmatpush.msrb.mxu3 %v4942_v12  ;;  %v5253_v60 = vld [vmem:[%s6116_s9 + $0x8] sm:$0xff] }
 0x5a9   :  { %v3149_v27 = vmul.f32 -1.442695, %v1511_v34 }
 0x5aa   :  { %1822 = vmatpush.msrb.mxu3 %v4962_v43 }
 0x5ab   :  { %v3243_v38 = vpop.eup %3242  ;;  %3244 = vpow2.f32 %v3149_v27  ;;  %v1664_v27 = vld [vmem:[%s6115_s8 + $0x78] sm:$0xff] }
 0x5ac   :  { %v4816_v2 = vadd.f32 1.0, %v3243_v38  ;;  %1715 = vmatpush.msra.mxu0 %v1664_v27  ;;  %1823 = vmatpush.msrb.mxu3 %v4977_v45  ;;  %v5221_v27 = vld [vmem:[%s6116_s9 + $0x40] sm:$0xff] }
 0x5ae   :  { %3246 = vrcp.f32 %v4816_v2  ;;  %v1547_v10 = vand.u32 2147483648, %v4816_v2  ;;  %vm1541_vm13 = vweird.f32 %v4816_v2  ;;  %v1545_v24 = vand.u32 2147483647, %v4816_v2 }
 0x5b0   :  { %v1548_v63 = vor.u32 1.1754944e-38, %v1547_v10  ;;  %vm1546_vm15 = vcmp.eq.f32.partialorder %v1545_v24, 8.507059e+37  ;;  %v5202_v10 = vld [vmem:[%s6116_s9 + $0x58] sm:$0xff] }
 0x5b1   :  { %v3245_v25 = vpop.eup %3244  ;;  %v5216_v24 = vld [vmem:[%s6116_s9 + $0x38] sm:$0xff] }
 0x5b2   :  { %v4837_v40 = vadd.f32 1.0, %v3245_v25  ;;  %v1659_v25 = vld [vmem:[%s6115_s8 + $0x50] sm:$0xff] }
 0x5b3   :  { %1737 = vmatpush.msrb.mxu1 %v1659_v25  ;;  %v1690_v25 = vld [vmem:[%s6115_s8 + $0x148] sm:$0xff] }
 0x5b4   :  { %3248 = vrcp.f32 %v4837_v40  ;;  %v4849_v5 = vpop.eup %3246  ;;  %v1527_v8 = vand.u32 2147483648, %v4837_v40  ;;  %v1525_v23 = vand.u32 2147483647, %v4837_v40  ;;  %vm1521_vm9 = vweird.f32 %v4837_v40 }
 0x5b5   :  { %v1537_v62 = vmul.f32 %v4849_v5, %v4816_v2  ;;  %vm1542_vm12 = vweird.f32 %v4849_v5  ;;  %v1661_v2 = vld [vmem:[%s6115_s8 + $0x60] sm:$0xff] }
 0x5b6   :  { %v1528_v32 = vor.u32 1.1754944e-38, %v1527_v8  ;;  %vm1526_vm11 = vcmp.eq.f32.partialorder %v1525_v23, 8.507059e+37  ;;  %vm4955_vm14 = vmor %vm1541_vm13, %vm1542_vm12  ;;  %1716 = vmatpush.msra.mxu0 %v1661_v2  ;;  %v5070_v8 = vld [vmem:[%s6116_s9 + $0xf8] sm:$0xff]  ;;  %v5096_v23 = vld [vmem:[%s6116_s9 + $0xc0] sm:$0xff] }
 0x5b7   :  { %v1538_v29 = vsub.f32 1.0, %v1537_v62  ;;  %v1650_v62 = vld [vmem:[%s6115_s8 + $0x8] sm:$0xff]  ;;  %1824 = vmatpush.msrb.mxu3 %v5096_v23  ;;  %v5247_v2 = vld [vmem:[%s6116_s9] sm:$0xff] }
 0x5b8   :  { %1717 = vmatpush.msra.mxu0 %v1658_v0  ;;  %v1693_v0 = vld [vmem:[%s6115_s8 + $0x160] sm:$0xff] }
 0x5b9   :  { %v1539_v44 = vmul.f32 %v4849_v5, %v1538_v29  ;;  %v5046_v29 = vld [vmem:[%s6116_s9 + $0x128] sm:$0xff]  ;;  %1825 = vmatpush.msrb.mxu3 %v5114_v56 }
 0x5ba   :  { %v3249_v18 = vpop.eup %3248  ;;  %1718 = vmatpush.msra.mxu0 %v1655_v49  ;;  %v1684_v49 = vld [vmem:[%s6115_s8 + $0x118] sm:$0xff] }
 0x5bb   :  { %v1517_v46 = vmul.f32 %v3249_v18, %v4837_v40  ;;  %vm1522_vm8 = vweird.f32 %v3249_v18  ;;  %v1540_v30 = vadd.f32 %v4849_v5, %v1539_v44  ;;  %v1656_v40 = vld [vmem:[%s6115_s8 + $0x38] sm:$0xff]  ;;  %v5101_v44 = vld [vmem:[%s6116_s9 + $0xc8] sm:$0xff] }
 0x5bc   :  { %vm1523_vm10 = vmor %vm1521_vm9, %vm1522_vm8  ;;  %1738 = vmatpush.msrb.mxu1 %v1656_v40  ;;  %1719 = vmatpush.msra.mxu0 %v1652_v57  ;;  %v1681_v40 = vld [vmem:[%s6115_s8 + $0x100] sm:$0xff]  ;;  %v1678_v57 = vld [vmem:[%s6115_s8 + $0xe8] sm:$0xff] }
 0x5bd   :  { %v1518_v9 = vsub.f32 1.0, %v1517_v46  ;;  %v1544_v47 = vsel %vm4955_vm14, %v4849_v5, %v1540_v30  ;;  %v5039_v46 = vld [vmem:[%s6116_s9 + $0x148] sm:$0xff]  ;;  %v5168_v30 = vld [vmem:[%s6116_s9 + $0x60] sm:$0xff] }
 0x5be   :  { %v1549_v4 = vsel %vm1546_vm15, %v1548_v63, %v1544_v47  ;;  %1739 = vmatpush.msrb.mxu1 %v1653_v22  ;;  %1720 = vmatpush.msra.mxu0 %v1649_v1  ;;  %v1696_v47 = vld [vmem:[%s6115_s8 + $0x178] sm:$0xff]  ;;  %v5258_v63 = vld [vmem:[%s6116_s9 + $0x10] sm:$0xff] }
 0x5bf   :  { %v1519_v11 = vmul.f32 %v3249_v18, %v1518_v9  ;;  %v1555_v19 = vsub.f32 1.0, %v1549_v4  ;;  %v1557_v48 = vmul.f32 %v1549_v4, %v4726_v28  ;;  %v5014_v28 = vld [vmem:[%s6116_s9 + $0x178] sm:$0xff]  ;;  %1721 = vmatmul.f32.vlgmr.msra.gmra.mxu0 %v5185_v50  ;;  %1745 = vmatpush.msrb.mxu2 %v1696_v47  ;;  %v1687_v4 = vld [vmem:[%s6115_s8 + $0x130] sm:$0xff] }
 0x5c0   :  { %1740 = vmatpush.msrb.mxu1 %v1650_v62  ;;  %1837 = vmatpush.msrb.mxu0 %v5009_v58  ;;  %v5063_v9 = vld [vmem:[%s6116_s9 + $0x118] sm:$0xff] }
 0x5c1   :  { %v1520_v55 = vadd.f32 %v3249_v18, %v1519_v11  ;;  %v5087_v11 = vld [vmem:[%s6116_s9 + $0xe8] sm:$0xff]  ;;  %1741 = vmatmul.f32.vlgmr.msrb.gmra.mxu1 %v5185_v50  ;;  %1746 = vmatpush.msrb.mxu2 %v1693_v0  ;;  %v1669_v0 = vld [vmem:[%s6115_s8 + $0xa0] sm:$0xff] }
 0x5c2   :  { %1857 = vmatpush.msra.mxu1 %v5014_v28 }
 0x5c3   :  { %v1524_v13 = vsel %vm1523_vm10, %v3249_v18, %v1520_v55  ;;  %v5022_v18 = vld [vmem:[%s6116_s9 + $0x158] sm:$0xff]  ;;  %1747 = vmatpush.msrb.mxu2 %v1690_v25 }
 0x5c4   :  { %v1529_v20 = vsel %vm1526_vm11, %v1528_v32, %v1524_v13  ;;  %1838 = vmatpush.msrb.mxu0 %v5022_v18  ;;  %1858 = vmatpush.msra.mxu1 %v5027_v14  ;;  %v5126_v55 = vld [vmem:[%s6116_s9 + $0xb8] sm:$0xff]  ;;  %v5132_v32 = vld [vmem:[%s6116_s9 + $0x90] sm:$0xff]  ;;  %v5155_v13 = vld [vmem:[%s6116_s9 + $0x80] sm:$0xff] }
 0x5c5   :  { %v1552_v34 = vmul.f32 %v1551_v36, %v1529_v20  ;;  %1826 = vmatpush.msrb.mxu3 %v5132_v32  ;;  %v5150_v36 = vld [vmem:[%s6116_s9 + $0x78] sm:$0xff]  ;;  %v5160_v20 = vld [vmem:[%s6116_s9 + $0x88] sm:$0xff]  ;;  %1748 = vmatpush.msrb.mxu2 %v1687_v4 }
 0x5c6   :  { %1839 = vmatpush.msrb.mxu0 %v5034_v39  ;;  %1859 = vmatpush.msra.mxu1 %v5039_v46  ;;  %v1666_v4 = vld [vmem:[%s6115_s8 + $0x88] sm:$0xff] }
 0x5c7   :  { %v1553_v38 = vadd.f32 %v1552_v34, %v237_v59  ;;  %1827 = vmatpush.msrb.mxu3 %v5150_v36  ;;  %v5197_v59 = vld [vmem:[%s6116_s9 + $0x50] sm:$0xff]  ;;  %1749 = vmatpush.msrb.mxu2 %v1684_v49 }
 0x5c8   :  { %1840 = vmatpush.msrb.mxu0 %v5046_v29  ;;  %1860 = vmatpush.msra.mxu1 %v5051_v35  ;;  %v5211_v34 = vld [vmem:[%s6116_s9 + $0x30] sm:$0xff] }
 0x5c9   :  { %3250 = vtanh.f32 %v1553_v38  ;;  %1828 = vmatpush.msrb.mxu3 %v5168_v30  ;;  %v5237_v38 = vld [vmem:[%s6116_s9 + $0x28] sm:$0xff]  ;;  %1750 = vmatpush.msrb.mxu2 %v1681_v40  ;;  %v1663_v40 = vld [vmem:[%s6115_s8 + $0x70] sm:$0xff] }
 0x5ca   :  { %1841 = vmatpush.msrb.mxu0 %v5058_v54  ;;  %1861 = vmatpush.msra.mxu1 %v5063_v9 }
 0x5cb   :  { %1829 = vmatpush.msrb.mxu3 %v5192_v51  ;;  %1751 = vmatpush.msrb.mxu2 %v1678_v57  ;;  %v1657_v57 = vld [vmem:[%s6115_s8 + $0x40] sm:$0xff] }
 0x5cc   :  { %1842 = vmatpush.msrb.mxu0 %v5070_v8  ;;  %1862 = vmatpush.msra.mxu1 %v5075_v53 }
 0x5cd   :  { %1830 = vmatpush.msrb.mxu3 %v5211_v34 }
 0x5ce   :  { %1843 = vmatpush.msrb.mxu0 %v5082_v15  ;;  %1863 = vmatpush.msra.mxu1 %v5087_v11 }
 0x5cf   :  { %v3251_v5 = vpop.eup %3250  ;;  %1831 = vmatpush.msrb.mxu3 %v5227_v17 }
 0x5d0   :  { %v1556_v31 = vmul.f32 %v3251_v5, %v1555_v19  ;;  %1844 = vmatpush.msrb.mxu0 %v5101_v44  ;;  %1864 = vmatpush.msra.mxu1 %v5106_v26  ;;  %v1593_v19 = vld [vmem:[%s6117_s7] sm:$0x3] }
 0x5d1   :  { %1832 = vmatpush.msrb.mxu3 %v5247_v2  ;;  %v1595_v22 = vperm.slane %v1593_v19, 0  ;;  %v1596_v5 = vperm.slane %v1593_v19, 1  ;;  %v1660_v19 = vld [vmem:[%s6115_s8 + $0x58] sm:$0xff] }
 0x5d2   :  { %v1558_v6 = vadd.f32 %v1557_v48, %v1556_v31  ;;  %1845 = vmatpush.msrb.mxu0 %v5119_v7  ;;  %1865 = vmatpush.msra.mxu1 %v5126_v55  ;;  %v1675_v31 = vld [vmem:[%s6115_s8 + $0xd0] sm:$0xff]  ;;  %v1672_v48 = vld [vmem:[%s6115_s8 + $0xb8] sm:$0xff] }
 0x5d3   :  { %1752 = vmatpush.msrb.mxu2 %v1675_v31 }
 0x5d4   :  { %3151 = vst [vmem:[%s6113_s14 + $0x38] sm:$0xff] %v1558_v6  ;;  %1615 = vmatmul.f32.vlgmr.msra.gmra.mxu2 %v1558_v6  ;;  %1635 = vmatmul.f32.vlgmr.msra.gmra.mxu3 %v1558_v6 }
 0x5d5   :  { %1846 = vmatpush.msrb.mxu0 %v5137_v16  ;;  %1866 = vmatpush.msra.mxu1 %v5142_v21 }
 0x5d6   :  { %1994 = vmatpush.msra.mxu3 %v5009_v58  ;;  %1753 = vmatpush.msrb.mxu2 %v1672_v48  ;;  %v1651_v48 = vld [vmem:[%s6115_s8 + $0x10] sm:$0xff] }
 0x5d7   :  { %1847 = vmatpush.msrb.mxu0 %v5155_v13  ;;  %1867 = vmatpush.msra.mxu1 %v5160_v20 }
 0x5d8   :  { %1995 = vmatpush.msra.mxu3 %v5022_v18  ;;  %1754 = vmatpush.msrb.mxu2 %v1669_v0 }
 0x5d9   :  { %1848 = vmatpush.msrb.mxu0 %v5173_v37  ;;  %1868 = vmatpush.msra.mxu1 %v5178_v52 }
 0x5da   :  { %1996 = vmatpush.msra.mxu3 %v5034_v39  ;;  %1755 = vmatpush.msrb.mxu2 %v1666_v4 }
 0x5db   :  { %1849 = vmatpush.msrb.mxu0 %v5197_v59  ;;  %1869 = vmatpush.msra.mxu1 %v5202_v10 }
 0x5dc   :  { %1997 = vmatpush.msra.mxu3 %v5046_v29  ;;  %1756 = vmatpush.msrb.mxu2 %v1663_v40 }
 0x5dd   :  { %1850 = vmatpush.msrb.mxu0 %v5216_v24  ;;  %1870 = vmatpush.msra.mxu1 %v5221_v27 }
 0x5de   :  { %1998 = vmatpush.msra.mxu3 %v5058_v54  ;;  %1757 = vmatpush.msrb.mxu2 %v1660_v19 }
 0x5df   :  { %1851 = vmatpush.msrb.mxu0 %v5232_v33  ;;  %1871 = vmatpush.msra.mxu1 %v5237_v38 }
 0x5e0   :  { %1999 = vmatpush.msra.mxu3 %v5070_v8  ;;  %1758 = vmatpush.msrb.mxu2 %v1657_v57 }
 0x5e1   :  { %1852 = vmatpush.msrb.mxu0 %v5253_v60  ;;  %1872 = vmatpush.msra.mxu1 %v5258_v63 }
 0x5e2   :  { %2000 = vmatpush.msra.mxu3 %v5082_v15 }
 0x5e3   :  { %2014 = vmatpush.msra.mxu0 %v5014_v28  ;;  %2132 = vmatpush.msrb.mxu1 %v4892_v42 }
 0x5e4   :  { %2001 = vmatpush.msra.mxu3 %v5101_v44 }
 0x5e5   :  { %2015 = vmatpush.msra.mxu0 %v5027_v14  ;;  %2133 = vmatpush.msrb.mxu1 %v4905_v61 }
 0x5e6   :  { %2002 = vmatpush.msra.mxu3 %v5119_v7 }
 0x5e7   :  { %2016 = vmatpush.msra.mxu0 %v5039_v46  ;;  %2134 = vmatpush.msrb.mxu1 %v4911_v3 }
 0x5e8   :  { %2003 = vmatpush.msra.mxu3 %v5137_v16 }
 0x5e9   :  { %2017 = vmatpush.msra.mxu0 %v5051_v35  ;;  %2135 = vmatpush.msrb.mxu1 %v4925_v41 }
 0x5ea   :  { %2004 = vmatpush.msra.mxu3 %v5155_v13 }
 0x5eb   :  { %2018 = vmatpush.msra.mxu0 %v5063_v9  ;;  %2136 = vmatpush.msrb.mxu1 %v4942_v12 }
 0x5ec   :  { %2005 = vmatpush.msra.mxu3 %v5173_v37 }
 0x5ed   :  { %2019 = vmatpush.msra.mxu0 %v5075_v53  ;;  %2137 = vmatpush.msrb.mxu1 %v4962_v43 }
 0x5ee   :  { %2006 = vmatpush.msra.mxu3 %v5197_v59 }
 0x5ef   :  { %2020 = vmatpush.msra.mxu0 %v5087_v11  ;;  %2138 = vmatpush.msrb.mxu1 %v4977_v45 }
 0x5f0   :  { %2007 = vmatpush.msra.mxu3 %v5216_v24 }
 0x5f1   :  { %2021 = vmatpush.msra.mxu0 %v5106_v26  ;;  %2139 = vmatpush.msrb.mxu1 %v5096_v23 }
 0x5f2   :  { %2008 = vmatpush.msra.mxu3 %v5232_v33 }
 0x5f3   :  { %2022 = vmatpush.msra.mxu0 %v5126_v55  ;;  %2140 = vmatpush.msrb.mxu1 %v5114_v56 }
 0x5f4   :  { %2009 = vmatpush.msra.mxu3 %v5253_v60 }
 0x5f5   :  { %2023 = vmatpush.msra.mxu0 %v5142_v21  ;;  %2141 = vmatpush.msrb.mxu1 %v5132_v32 }
 0x5f7   :  { %2024 = vmatpush.msra.mxu0 %v5160_v20  ;;  %2142 = vmatpush.msrb.mxu1 %v5150_v36 }
 0x5f9   :  { %2025 = vmatpush.msra.mxu0 %v5178_v52  ;;  %2143 = vmatpush.msrb.mxu1 %v5168_v30 }
 0x5fb   :  { %2026 = vmatpush.msra.mxu0 %v5202_v10  ;;  %2144 = vmatpush.msrb.mxu1 %v5192_v51 }
 0x5fd   :  { %2027 = vmatpush.msra.mxu0 %v5221_v27  ;;  %2145 = vmatpush.msrb.mxu1 %v5211_v34 }
 0x5ff   :  { %2028 = vmatpush.msra.mxu0 %v5237_v38  ;;  %2146 = vmatpush.msrb.mxu1 %v5227_v17 }
 0x601   :  { %2029 = vmatpush.msra.mxu0 %v5258_v63  ;;  %2147 = vmatpush.msrb.mxu1 %v5247_v2 }
 0x657   :  { %v1616_v1 = vpop.f32.mrf.mxu2  ;;  %v1636_v62 = vpop.f32.mrf.mxu3 }
 0x658   :  { %v1617_v6 = vadd.f32 %v1616_v1, %v1595_v22  ;;  %v1637_v47 = vadd.f32 %v1636_v62, %v1596_v5  ;;  %v1639_v22 = vld [vmem:[%s6120_s1] sm:$0xff]  ;;  %v1654_v5 = vld [vmem:[%s6115_s8 + $0x28] sm:$0xff] }
 0x659   :  { %1759 = vmatpush.msrb.mxu2 %v1654_v5 }
 0x65a   :  { %1645 = vst [vmem:[%s6118_s15] sm:$0xff] %v1617_v6  ;;  %v1640_v25 = vmul.f32 0.5, %v1637_v47 }
 0x65b   :  { %1646 = vst [vmem:[%s6119_s16] sm:$0xff] %v1637_v47  ;;  %1760 = vmatpush.msrb.mxu2 %v1651_v48 }
 0x65c   :  { %v1641_v49 = vmul.f32 1.442695, %v1640_v25  ;;  %1761 = vmatmul.f32.vlgmr.msrb.gmra.mxu2 %v5185_v50  ;;  %v5472_v50 = vld [vmem:[%s6121_s11] ss:$0 sm:$0xff] }
 0x65d   :  { %1974 = vmatpush.msra.mxu2 %v4892_v42 }
 0x65e   :  { %3252 = vpow2.f32 %v1641_v49 }
 0x65f   :  { %1975 = vmatpush.msra.mxu2 %v4905_v61 }
 0x661   :  { %1976 = vmatpush.msra.mxu2 %v4911_v3 }
 0x663   :  { %1977 = vmatpush.msra.mxu2 %v4925_v41 }
 0x664   :  { %v3253_v31 = vpop.eup %3252 }
 0x665   :  { %v1643_v1 = vmul.f32 %v3253_v31, %v1639_v22  ;;  %1978 = vmatpush.msra.mxu2 %v4942_v12 }
 0x667   :  { %v5364_v62 = vadd.f32 %v1643_v1, %v1617_v6  ;;  %1979 = vmatpush.msra.mxu2 %v4962_v43 }
 0x669   :  { %1647 = vst [vmem:[%s6122_s17] sm:$0xff] %v5364_v62  ;;  %1833 = vmatmul.f32.vlgmr.msrb.gmra.mxu3 %v5364_v62  ;;  %1853 = vmatmul.f32.vlgmr.msrb.gmra.mxu0 %v5364_v62 }
 0x66a   :  { %1873 = vmatmul.f32.vlgmr.msra.gmra.mxu1 %v5364_v62  ;;  %2172 = vmatpush.msrb.mxu3 %v5014_v28 }
 0x66b   :  { %2290 = vmatpush.msrb.mxu0 %v4892_v42  ;;  %2310 = vmatpush.msra.mxu1 %v5009_v58  ;;  %v1697_v42 = vld [vmem:[%s6123_s10] sm:$0x7] }
 0x66c   :  { %2173 = vmatpush.msrb.mxu3 %v5027_v14  ;;  %1980 = vmatpush.msra.mxu2 %v4977_v45 }
 0x66d   :  { %2291 = vmatpush.msrb.mxu0 %v4905_v61  ;;  %2311 = vmatpush.msra.mxu1 %v5022_v18  ;;  %v1722_v61 = vpop.f32.mrf.mxu0 }
 0x66e   :  { %2174 = vmatpush.msrb.mxu3 %v5039_v46  ;;  %1981 = vmatpush.msra.mxu2 %v5096_v23 }
 0x66f   :  { %2292 = vmatpush.msrb.mxu0 %v4911_v3  ;;  %2312 = vmatpush.msra.mxu1 %v5034_v39  ;;  %v1700_v3 = vperm.slane %v1697_v42, 1 }
 0x670   :  { %2175 = vmatpush.msrb.mxu3 %v5051_v35  ;;  %1982 = vmatpush.msra.mxu2 %v5114_v56 }
 0x671   :  { %2293 = vmatpush.msrb.mxu0 %v4925_v41  ;;  %2313 = vmatpush.msra.mxu1 %v5046_v29  ;;  %v1742_v41 = vpop.f32.mrf.mxu1 }
 0x672   :  { %2176 = vmatpush.msrb.mxu3 %v5063_v9  ;;  %1983 = vmatpush.msra.mxu2 %v5132_v32 }
 0x673   :  { %2294 = vmatpush.msrb.mxu0 %v4942_v12  ;;  %2314 = vmatpush.msra.mxu1 %v5058_v54  ;;  %v5463_v12 = vadd.f32 %v1742_v41, %v1700_v3 }
 0x674   :  { %2177 = vmatpush.msrb.mxu3 %v5075_v53  ;;  %1984 = vmatpush.msra.mxu2 %v5150_v36 }
 0x675   :  { %2295 = vmatpush.msrb.mxu0 %v4962_v43  ;;  %2315 = vmatpush.msra.mxu1 %v5070_v8  ;;  %6154 = vst [vmem:[#allocation6_spill] sm:$0xff] %v5463_v12  ;;  %v1699_v43 = vperm.slane %v1697_v42, 0 }
 0x676   :  { %2178 = vmatpush.msrb.mxu3 %v5087_v11  ;;  %1985 = vmatpush.msra.mxu2 %v5168_v30 }
 0x677   :  { %2296 = vmatpush.msrb.mxu0 %v4977_v45  ;;  %2316 = vmatpush.msra.mxu1 %v5082_v15 }
 0x678   :  { %2179 = vmatpush.msrb.mxu3 %v5106_v26  ;;  %1986 = vmatpush.msra.mxu2 %v5192_v51 }
 0x679   :  { %2297 = vmatpush.msrb.mxu0 %v5096_v23  ;;  %2317 = vmatpush.msra.mxu1 %v5101_v44 }
 0x67a   :  { %2180 = vmatpush.msrb.mxu3 %v5126_v55  ;;  %1987 = vmatpush.msra.mxu2 %v5211_v34 }
 0x67b   :  { %2298 = vmatpush.msrb.mxu0 %v5114_v56  ;;  %2318 = vmatpush.msra.mxu1 %v5119_v7 }
 0x67c   :  { %2181 = vmatpush.msrb.mxu3 %v5142_v21  ;;  %1988 = vmatpush.msra.mxu2 %v5227_v17 }
 0x67d   :  { %2299 = vmatpush.msrb.mxu0 %v5132_v32  ;;  %2319 = vmatpush.msra.mxu1 %v5137_v16 }
 0x67e   :  { %2182 = vmatpush.msrb.mxu3 %v5160_v20  ;;  %1989 = vmatpush.msra.mxu2 %v5247_v2 }
 0x67f   :  { %2300 = vmatpush.msrb.mxu0 %v5150_v36  ;;  %2320 = vmatpush.msra.mxu1 %v5155_v13 }
 0x680   :  { %2183 = vmatpush.msrb.mxu3 %v5178_v52  ;;  %2152 = vmatpush.msrb.mxu2 %v5009_v58 }
 0x681   :  { %2301 = vmatpush.msrb.mxu0 %v5168_v30  ;;  %2321 = vmatpush.msra.mxu1 %v5173_v37 }
 0x682   :  { %2184 = vmatpush.msrb.mxu3 %v5202_v10  ;;  %2153 = vmatpush.msrb.mxu2 %v5022_v18  ;;  %v5466_v18 = vadd.f32 %v1722_v61, %v1699_v43 }
 0x683   :  { %2302 = vmatpush.msrb.mxu0 %v5192_v51  ;;  %2322 = vmatpush.msra.mxu1 %v5197_v59 }
 0x684   :  { %2185 = vmatpush.msrb.mxu3 %v5221_v27  ;;  %2154 = vmatpush.msrb.mxu2 %v5034_v39  ;;  %6155 = vst [vmem:[#allocation4_spill] sm:$0xff] %v5466_v18 }
 0x685   :  { %2303 = vmatpush.msrb.mxu0 %v5211_v34  ;;  %2323 = vmatpush.msra.mxu1 %v5216_v24  ;;  %v1701_v34 = vperm.slane %v1697_v42, 2 }
 0x686   :  { %2186 = vmatpush.msrb.mxu3 %v5237_v38  ;;  %2155 = vmatpush.msrb.mxu2 %v5046_v29 }
 0x687   :  { %2304 = vmatpush.msrb.mxu0 %v5227_v17  ;;  %2324 = vmatpush.msra.mxu1 %v5232_v33 }
 0x688   :  { %2187 = vmatpush.msrb.mxu3 %v5258_v63  ;;  %2156 = vmatpush.msrb.mxu2 %v5058_v54 }
 0x689   :  { %2305 = vmatpush.msrb.mxu0 %v5247_v2  ;;  %2325 = vmatpush.msra.mxu1 %v5253_v60 }
 0x68a   :  { %2157 = vmatpush.msrb.mxu2 %v5070_v8 }
 0x68c   :  { %2158 = vmatpush.msrb.mxu2 %v5082_v15 }
 0x68e   :  { %2159 = vmatpush.msrb.mxu2 %v5101_v44 }
 0x690   :  { %2160 = vmatpush.msrb.mxu2 %v5119_v7 }
 0x692   :  { %2161 = vmatpush.msrb.mxu2 %v5137_v16 }
 0x694   :  { %2162 = vmatpush.msrb.mxu2 %v5155_v13 }
 0x696   :  { %2163 = vmatpush.msrb.mxu2 %v5173_v37 }
 0x698   :  { %2164 = vmatpush.msrb.mxu2 %v5197_v59 }
 0x69a   :  { %2165 = vmatpush.msrb.mxu2 %v5216_v24 }
 0x69c   :  { %2166 = vmatpush.msrb.mxu2 %v5232_v33 }
 0x69e   :  { %2167 = vmatpush.msrb.mxu2 %v5253_v60 }
 0x6df   :  { %v1762_v33 = vpop.f32.mrf.mxu2 }
 0x6e0   :  { %v5475_v0 = vadd.f32 %v1762_v33, %v1701_v34 }
 0x6e6   :  { %v1854_v45 = vpop.f32.mrf.mxu0 }
 0x6e7   :  { %v1897_v58 = vadd.f32 %v1854_v45, %v5463_v12  ;;  %v1874_v17 = vpop.f32.mrf.mxu1 }
 0x6e8   :  { %v1917_v6 = vadd.f32 %v5472_v50, %v1874_v17 }
 0x6e9   :  { %v3153_v39 = vmul.f32 -1.442695, %v1897_v58 }
 0x6eb   :  { %3254 = vpow2.f32 %v3153_v39 }
 0x6ec   :  { %v1834_v29 = vpop.f32.mrf.mxu3 }
 0x6ed   :  { %v1877_v54 = vadd.f32 %v1834_v29, %v5466_v18 }
 0x6ef   :  { %v3152_v8 = vmul.f32 -1.442695, %v1877_v54 }
 0x6f1   :  { %v3255_v15 = vpop.eup %3254  ;;  %3256 = vpow2.f32 %v3152_v8 }
 0x6f2   :  { %v1901_v23 = vadd.f32 1.0, %v3255_v15 }
 0x6f4   :  { %3258 = vrcp.f32 %v1901_v23  ;;  %v1913_v49 = vand.u32 2147483648, %v1901_v23  ;;  %vm1907_vm5 = vweird.f32 %v1901_v23  ;;  %v1911_v19 = vand.u32 2147483647, %v1901_v23 }
 0x6f6   :  { %v1914_v5 = vor.u32 1.1754944e-38, %v1913_v49  ;;  %vm1912_vm7 = vcmp.eq.f32.partialorder %v1911_v19, 8.507059e+37 }
 0x6f7   :  { %v3257_v44 = vpop.eup %3256 }
 0x6f8   :  { %v1881_v56 = vadd.f32 1.0, %v3257_v44 }
 0x6fa   :  { %3260 = vrcp.f32 %v1881_v56  ;;  %v3259_v7 = vpop.eup %3258  ;;  %v1893_v37 = vand.u32 2147483648, %v1881_v56  ;;  %v1891_v59 = vand.u32 2147483647, %v1881_v56  ;;  %vm1887_vm1 = vweird.f32 %v1881_v56 }
 0x6fb   :  { %v1903_v32 = vmul.f32 %v3259_v7, %v1901_v23  ;;  %vm1908_vm4 = vweird.f32 %v3259_v7 }
 0x6fc   :  { %v1894_v60 = vor.u32 1.1754944e-38, %v1893_v37  ;;  %vm1892_vm3 = vcmp.eq.f32.partialorder %v1891_v59, 8.507059e+37  ;;  %vm1909_vm6 = vmor %vm1907_vm5, %vm1908_vm4 }
 0x6fd   :  { %v1904_v13 = vsub.f32 1.0, %v1903_v32 }
 0x6ff   :  { %v1905_v24 = vmul.f32 %v3259_v7, %v1904_v13 }
 0x700   :  { %v3261_v16 = vpop.eup %3260 }
 0x701   :  { %v1883_v36 = vmul.f32 %v3261_v16, %v1881_v56  ;;  %vm1888_vm0 = vweird.f32 %v3261_v16  ;;  %v1906_v25 = vadd.f32 %v3259_v7, %v1905_v24 }
 0x702   :  { %vm1889_vm2 = vmor %vm1887_vm1, %vm1888_vm0 }
 0x703   :  { %v1884_v30 = vsub.f32 1.0, %v1883_v36  ;;  %v1910_v22 = vsel %vm1909_vm6, %v3259_v7, %v1906_v25 }
 0x704   :  { %v1915_v31 = vsel %vm1912_vm7, %v1914_v5, %v1910_v22 }
 0x705   :  { %v1885_v51 = vmul.f32 %v3261_v16, %v1884_v30  ;;  %v1921_v48 = vsub.f32 1.0, %v1915_v31  ;;  %v1923_v61 = vmul.f32 %v1915_v31, %v5364_v62 }
 0x707   :  { %v1886_v2 = vadd.f32 %v3261_v16, %v1885_v51 }
 0x709   :  { %v1890_v47 = vsel %vm1889_vm2, %v3261_v16, %v1886_v2 }
 0x70a   :  { %v1895_v4 = vsel %vm1892_vm3, %v1894_v60, %v1890_v47 }
 0x70b   :  { %v1918_v40 = vmul.f32 %v1917_v6, %v1895_v4 }
 0x70d   :  { %v1919_v57 = vadd.f32 %v1918_v40, %v5475_v0 }
 0x70f   :  { %3262 = vtanh.f32 %v1919_v57 }
 0x715   :  { %v3263_v1 = vpop.eup %3262 }
 0x716   :  { %v1922_v42 = vmul.f32 %v3263_v1, %v1921_v48 }
 0x718   :  { %v5479_v3 = vadd.f32 %v1923_v61, %v1922_v42 }
 0x71a   :  { %6156 = vst [vmem:[#allocation5_spill] sm:$0xff] %v5479_v3  ;;  %1990 = vmatmul.f32.vlgmr.msra.gmra.mxu2 %v5479_v3  ;;  %2010 = vmatmul.f32.vlgmr.msra.gmra.mxu3 %v5479_v3 }
 0x71b   :  { %2030 = vmatmul.f32.vlgmr.msra.gmra.mxu0 %v5479_v3  ;;  %2330 = vmatpush.msra.mxu2 %v5014_v28 }
 0x71d   :  { %2331 = vmatpush.msra.mxu2 %v5027_v14 }
 0x71f   :  { %2332 = vmatpush.msra.mxu2 %v5039_v46 }
 0x721   :  { %2333 = vmatpush.msra.mxu2 %v5051_v35 }
 0x723   :  { %2334 = vmatpush.msra.mxu2 %v5063_v9 }
 0x725   :  { %2335 = vmatpush.msra.mxu2 %v5075_v53 }
 0x727   :  { %2336 = vmatpush.msra.mxu2 %v5087_v11 }
 0x729   :  { %2337 = vmatpush.msra.mxu2 %v5106_v26 }
 0x72b   :  { %2338 = vmatpush.msra.mxu2 %v5126_v55 }
 0x72d   :  { %2339 = vmatpush.msra.mxu2 %v5142_v21 }
 0x72f   :  { %2340 = vmatpush.msra.mxu2 %v5160_v20 }
 0x731   :  { %2341 = vmatpush.msra.mxu2 %v5178_v52 }
 0x733   :  { %2342 = vmatpush.msra.mxu2 %v5202_v10 }
 0x735   :  { %2343 = vmatpush.msra.mxu2 %v5221_v27 }
 0x737   :  { %2344 = vmatpush.msra.mxu2 %v5237_v38 }
 0x739   :  { %2345 = vmatpush.msra.mxu2 %v5258_v63 }
 0x798   :  { %v2031_v45 = vpop.f32.mrf.mxu0 }
 0x799   :  { %v2074_v54 = vadd.f32 %v5472_v50, %v2031_v45  ;;  %v5523_v45 = vld [vmem:[%s6116_s9 + $0x168] sm:$0xff] }
 0x79a   :  { %2448 = vmatpush.msra.mxu3 %v5523_v45 }
 0x79d   :  { %v1991_v28 = vpop.f32.mrf.mxu2  ;;  %v2011_v14 = vpop.f32.mrf.mxu3 }
 0x79e   :  { %v2034_v46 = vadd.f32 %v1991_v28, %v5466_v18  ;;  %v2054_v35 = vadd.f32 %v2011_v14, %v5463_v12 }
 0x7a0   :  { %v3154_v9 = vmul.f32 -1.442695, %v2034_v46  ;;  %v3155_v53 = vmul.f32 -1.442695, %v2054_v35 }
 0x7a2   :  { %3264 = vpow2.f32 %v3154_v9 }
 0x7a3   :  { %3266 = vpow2.f32 %v3155_v53 }
 0x7a8   :  { %v3265_v11 = vpop.eup %3264 }
 0x7a9   :  { %v3267_v26 = vpop.eup %3266  ;;  %v2038_v55 = vadd.f32 1.0, %v3265_v11 }
 0x7aa   :  { %v2058_v21 = vadd.f32 1.0, %v3267_v26 }
 0x7ab   :  { %3268 = vrcp.f32 %v2038_v55  ;;  %v2050_v63 = vand.u32 2147483648, %v2038_v55  ;;  %v2048_v43 = vand.u32 2147483647, %v2038_v55  ;;  %vm2044_vm9 = vweird.f32 %v2038_v55 }
 0x7ac   :  { %3270 = vrcp.f32 %v2058_v21  ;;  %v2070_v56 = vand.u32 2147483648, %v2058_v21  ;;  %vm2064_vm13 = vweird.f32 %v2058_v21  ;;  %v2068_v7 = vand.u32 2147483647, %v2058_v21 }
 0x7ad   :  { %v2051_v29 = vor.u32 1.1754944e-38, %v2050_v63  ;;  %vm2049_vm11 = vcmp.eq.f32.partialorder %v2048_v43, 8.507059e+37 }
 0x7ae   :  { %v2071_v36 = vor.u32 1.1754944e-38, %v2070_v56  ;;  %vm2069_vm15 = vcmp.eq.f32.partialorder %v2068_v7, 8.507059e+37  ;;  %v5579_v56 = vld [vmem:[%s6116_s9 + $0x120] sm:$0xff]  ;;  %v5584_v7 = vld [vmem:[%s6116_s9 + $0x128] sm:$0xff] }
 0x7b1   :  { %v3269_v20 = vpop.eup %3268 }
 0x7b2   :  { %v3271_v52 = vpop.eup %3270  ;;  %v2040_v10 = vmul.f32 %v3269_v20, %v2038_v55  ;;  %vm2045_vm8 = vweird.f32 %v3269_v20 }
 0x7b3   :  { %v2060_v27 = vmul.f32 %v3271_v52, %v2058_v21  ;;  %vm2046_vm10 = vmor %vm2044_vm9, %vm2045_vm8  ;;  %vm2065_vm12 = vweird.f32 %v3271_v52 }
 0x7b4   :  { %v2041_v38 = vsub.f32 1.0, %v2040_v10  ;;  %vm2066_vm14 = vmor %vm2064_vm13, %vm2065_vm12 }
 0x7b5   :  { %v2061_v62 = vsub.f32 1.0, %v2060_v27 }
 0x7b6   :  { %v2042_v41 = vmul.f32 %v3269_v20, %v2041_v38 }
 0x7b7   :  { %v2062_v58 = vmul.f32 %v3271_v52, %v2061_v62 }
 0x7b8   :  { %v2043_v39 = vadd.f32 %v3269_v20, %v2042_v41 }
 0x7b9   :  { %v2063_v23 = vadd.f32 %v3271_v52, %v2062_v58  ;;  %v5528_v58 = vld [vmem:[%s6116_s9 + $0x170] sm:$0xff] }
 0x7ba   :  { %v2047_v8 = vsel %vm2046_vm10, %v3269_v20, %v2043_v39  ;;  %v5533_v39 = vld [vmem:[%s6116_s9 + $0x178] sm:$0xff]  ;;  %2468 = vmatpush.msra.mxu0 %v5528_v58 }
 0x7bb   :  { %v2052_v15 = vsel %vm2049_vm11, %v2051_v29, %v2047_v8  ;;  %v2067_v16 = vsel %vm2066_vm14, %v3271_v52, %v2063_v23  ;;  %v5541_v29 = vld [vmem:[%s6116_s9 + $0x150] sm:$0xff]  ;;  %v5551_v8 = vld [vmem:[%s6116_s9 + $0x160] sm:$0xff] }
 0x7bc   :  { %v2075_v44 = vmul.f32 %v2074_v54, %v2052_v15  ;;  %v2072_v13 = vsel %vm2069_vm15, %v2071_v36, %v2067_v16  ;;  %v5546_v54 = vld [vmem:[%s6116_s9 + $0x158] sm:$0xff]  ;;  %2449 = vmatpush.msra.mxu3 %v5541_v29  ;;  %v5565_v23 = vld [vmem:[%s6116_s9 + $0x140] sm:$0xff]  ;;  %v5598_v16 = vld [vmem:[%s6116_s9 + $0x108] sm:$0xff] }
 0x7bd   :  { %v2078_v30 = vsub.f32 1.0, %v2072_v13  ;;  %v2080_v59 = vmul.f32 %v2072_v13, %v5479_v3  ;;  %2469 = vmatpush.msra.mxu0 %v5546_v54  ;;  %v5560_v15 = vld [vmem:[%s6116_s9 + $0x138] sm:$0xff]  ;;  %v5603_v36 = vld [vmem:[%s6116_s9 + $0x110] sm:$0xff] }
 0x7be   :  { %v2076_v32 = vadd.f32 %v2075_v44, %v5475_v0  ;;  %v5570_v44 = vld [vmem:[%s6116_s9 + $0x148] sm:$0xff]  ;;  %2450 = vmatpush.msra.mxu3 %v5560_v15  ;;  %v5608_v13 = vld [vmem:[%s6116_s9 + $0x118] sm:$0xff] }
 0x7bf   :  { %2470 = vmatpush.msra.mxu0 %v5565_v23 }
 0x7c0   :  { %3272 = vtanh.f32 %v2076_v32  ;;  %v5589_v32 = vld [vmem:[%s6116_s9 + $0x130] sm:$0xff]  ;;  %2451 = vmatpush.msra.mxu3 %v5579_v56 }
 0x7c1   :  { %2471 = vmatpush.msra.mxu0 %v5584_v7 }
 0x7c2   :  { %2452 = vmatpush.msra.mxu3 %v5598_v16 }
 0x7c3   :  { %2472 = vmatpush.msra.mxu0 %v5603_v36 }
 0x7c6   :  { %v3273_v37 = vpop.eup %3272 }
 0x7c7   :  { %v2079_v51 = vmul.f32 %v3273_v37, %v2078_v30  ;;  %v5617_v30 = vld [vmem:[%s6116_s9 + $0xf0] sm:$0xff]  ;;  %v5622_v37 = vld [vmem:[%s6116_s9 + $0xf8] sm:$0xff] }
 0x7c8   :  { %6158 = vst [vmem:[#allocation8_spill] sm:$0xff] %v5622_v37  ;;  %2453 = vmatpush.msra.mxu3 %v5617_v30  ;;  %2473 = vmatpush.msra.mxu0 %v5622_v37 }
 0x7c9   :  { %v5505_v34 = vadd.f32 %v2080_v59, %v2079_v51  ;;  %v5627_v51 = vld [vmem:[%s6116_s9 + $0x100] sm:$0xff]  ;;  %v5636_v59 = vld [vmem:[%s6116_s9 + $0xd8] sm:$0xff] }
 0x7ca   :  { %2454 = vmatpush.msra.mxu3 %v5636_v59 }
 0x7cb   :  { %6157 = vst [vmem:[#allocation7_spill] sm:$0xff] %v5505_v34  ;;  %2148 = vmatmul.f32.vlgmr.msrb.gmra.mxu1 %v5505_v34  ;;  %2168 = vmatmul.f32.vlgmr.msrb.gmra.mxu2 %v5505_v34 }
 0x7cc   :  { %2188 = vmatmul.f32.vlgmr.msrb.gmra.mxu3 %v5505_v34  ;;  %2488 = vmatpush.msrb.mxu1 %v5533_v39 }
 0x7cd   :  { %2606 = vmatpush.msrb.mxu2 %v5523_v45 }
 0x7ce   :  { %2489 = vmatpush.msrb.mxu1 %v5551_v8 }
 0x7cf   :  { %2607 = vmatpush.msrb.mxu2 %v5541_v29 }
 0x7d0   :  { %2490 = vmatpush.msrb.mxu1 %v5570_v44 }
 0x7d1   :  { %2608 = vmatpush.msrb.mxu2 %v5560_v15 }
 0x7d2   :  { %2491 = vmatpush.msrb.mxu1 %v5589_v32 }
 0x7d3   :  { %2609 = vmatpush.msrb.mxu2 %v5579_v56 }
 0x7d4   :  { %2492 = vmatpush.msrb.mxu1 %v5608_v13 }
 0x7d5   :  { %2610 = vmatpush.msrb.mxu2 %v5598_v16 }
 0x7d6   :  { %2493 = vmatpush.msrb.mxu1 %v5627_v51 }
 0x7d7   :  { %2611 = vmatpush.msrb.mxu2 %v5617_v30 }
 0x7d9   :  { %2612 = vmatpush.msrb.mxu2 %v5636_v59 }
 0x848   :  { %v2149_v24 = vpop.f32.mrf.mxu1 }
 0x849   :  { %v2192_v17 = vadd.f32 %v2149_v24, %v5466_v18  ;;  %v5641_v24 = vld [vmem:[%s6116_s9 + $0xe0] sm:$0xff] }
 0x84a   :  { %2474 = vmatpush.msra.mxu0 %v5641_v24 }
 0x84b   :  { %v3156_v33 = vmul.f32 -1.442695, %v2192_v17  ;;  %v5646_v17 = vld [vmem:[%s6116_s9 + $0xe8] sm:$0xff] }
 0x84c   :  { %2494 = vmatpush.msrb.mxu1 %v5646_v17 }
 0x84d   :  { %3274 = vpow2.f32 %v3156_v33  ;;  %v5655_v33 = vld [vmem:[%s6116_s9 + $0xc0] sm:$0xff] }
 0x84e   :  { %v2169_v2 = vpop.f32.mrf.mxu2  ;;  %2455 = vmatpush.msra.mxu3 %v5655_v33  ;;  %2613 = vmatpush.msrb.mxu2 %v5655_v33 }
 0x84f   :  { %v2212_v60 = vadd.f32 %v2169_v2, %v5463_v12  ;;  %v2189_v1 = vpop.f32.mrf.mxu3  ;;  %v5660_v2 = vld [vmem:[%s6116_s9 + $0xc8] sm:$0xff] }
 0x850   :  { %v2232_v35 = vadd.f32 %v5472_v50, %v2189_v1  ;;  %2475 = vmatpush.msra.mxu0 %v5660_v2  ;;  %v5714_v1 = vld [vmem:[%s6116_s9 + $0x78] sm:$0xff] }
 0x851   :  { %v3157_v6 = vmul.f32 -1.442695, %v2212_v60  ;;  %v5665_v60 = vld [vmem:[%s6116_s9 + $0xd0] sm:$0xff] }
 0x852   :  { %2495 = vmatpush.msrb.mxu1 %v5665_v60 }
 0x853   :  { %v3275_v47 = vpop.eup %3274  ;;  %3276 = vpow2.f32 %v3157_v6  ;;  %v5674_v6 = vld [vmem:[%s6116_s9 + $0xa8] sm:$0xff] }
 0x854   :  { %v2196_v25 = vadd.f32 1.0, %v3275_v47  ;;  %v5679_v47 = vld [vmem:[%s6116_s9 + $0xb0] sm:$0xff]  ;;  %2456 = vmatpush.msra.mxu3 %v5674_v6  ;;  %2614 = vmatpush.msrb.mxu2 %v5674_v6 }
 0x855   :  { %2476 = vmatpush.msra.mxu0 %v5679_v47 }
 0x856   :  { %3278 = vrcp.f32 %v2196_v25  ;;  %v2208_v22 = vand.u32 2147483648, %v2196_v25  ;;  %v2206_v31 = vand.u32 2147483647, %v2196_v25  ;;  %vm2202_vm1 = vweird.f32 %v2196_v25 }
 0x858   :  { %v2209_v28 = vor.u32 1.1754944e-38, %v2208_v22  ;;  %vm2207_vm3 = vcmp.eq.f32.partialorder %v2206_v31, 8.507059e+37  ;;  %v5700_v22 = vld [vmem:[%s6116_s9 + $0x98] sm:$0xff] }
 0x859   :  { %v3277_v4 = vpop.eup %3276  ;;  %2477 = vmatpush.msra.mxu0 %v5700_v22 }
 0x85a   :  { %v2216_v49 = vadd.f32 1.0, %v3277_v4 }
 0x85c   :  { %v3279_v40 = vpop.eup %3278  ;;  %3280 = vrcp.f32 %v2216_v49  ;;  %v2228_v11 = vand.u32 2147483648, %v2216_v49  ;;  %v2226_v55 = vand.u32 2147483647, %v2216_v49  ;;  %vm2222_vm5 = vweird.f32 %v2216_v49 }
 0x85d   :  { %v2198_v19 = vmul.f32 %v3279_v40, %v2196_v25  ;;  %vm2203_vm0 = vweird.f32 %v3279_v40  ;;  %v5684_v25 = vld [vmem:[%s6116_s9 + $0xb8] sm:$0xff] }
 0x85e   :  { %vm2204_vm2 = vmor %vm2202_vm1, %vm2203_vm0  ;;  %v2229_v52 = vor.u32 1.1754944e-38, %v2228_v11  ;;  %vm2227_vm7 = vcmp.eq.f32.partialorder %v2226_v55, 8.507059e+37  ;;  %2496 = vmatpush.msrb.mxu1 %v5684_v25  ;;  %v5771_v11 = vld [vmem:[%s6116_s9 + $0x30] sm:$0xff]  ;;  %v5781_v55 = vld [vmem:[%s6116_s9 + $0x40] sm:$0xff] }
 0x85f   :  { %v2199_v57 = vsub.f32 1.0, %v2198_v19 }
 0x861   :  { %v2200_v5 = vmul.f32 %v3279_v40, %v2199_v57  ;;  %v5695_v57 = vld [vmem:[%s6116_s9 + $0x90] sm:$0xff] }
 0x862   :  { %v3281_v48 = vpop.eup %3280  ;;  %2457 = vmatpush.msra.mxu3 %v5695_v57  ;;  %2615 = vmatpush.msrb.mxu2 %v5695_v57 }
 0x863   :  { %v2218_v42 = vmul.f32 %v3281_v48, %v2216_v49  ;;  %v2201_v61 = vadd.f32 %v3279_v40, %v2200_v5  ;;  %vm2223_vm4 = vweird.f32 %v3281_v48  ;;  %v5705_v5 = vld [vmem:[%s6116_s9 + $0xa0] sm:$0xff] }
 0x864   :  { %vm2224_vm6 = vmor %vm2222_vm5, %vm2223_vm4  ;;  %2497 = vmatpush.msrb.mxu1 %v5705_v5  ;;  %2458 = vmatpush.msra.mxu3 %v5714_v1 }
 0x865   :  { %v2219_v14 = vsub.f32 1.0, %v2218_v42  ;;  %v2205_v46 = vsel %vm2204_vm2, %v3279_v40, %v2201_v61  ;;  %v5719_v42 = vld [vmem:[%s6116_s9 + $0x80] sm:$0xff]  ;;  %v5727_v61 = vld [vmem:[%s6116_s9 + $0x88] sm:$0xff]  ;;  %2616 = vmatpush.msrb.mxu2 %v5714_v1 }
 0x866   :  { %v2210_v9 = vsel %vm2207_vm3, %v2209_v28, %v2205_v46  ;;  %2478 = vmatpush.msra.mxu0 %v5719_v42  ;;  %2498 = vmatpush.msrb.mxu1 %v5727_v61  ;;  %v5733_v28 = vld [vmem:[%s6116_s9 + $0x60] sm:$0xff]  ;;  %v5743_v46 = vld [vmem:[%s6116_s9 + $0x70] sm:$0xff] }
 0x867   :  { %v2220_v53 = vmul.f32 %v3281_v48, %v2219_v14  ;;  %v2233_v26 = vmul.f32 %v2232_v35, %v2210_v9  ;;  %v5738_v14 = vld [vmem:[%s6116_s9 + $0x68] sm:$0xff]  ;;  %2459 = vmatpush.msra.mxu3 %v5733_v28  ;;  %v5757_v9 = vld [vmem:[%s6116_s9 + $0x50] sm:$0xff]  ;;  %2617 = vmatpush.msrb.mxu2 %v5733_v28 }
 0x868   :  { %2479 = vmatpush.msra.mxu0 %v5738_v14  ;;  %2499 = vmatpush.msrb.mxu1 %v5743_v46  ;;  %v5752_v35 = vld [vmem:[%s6116_s9 + $0x48] sm:$0xff] }
 0x869   :  { %v2221_v21 = vadd.f32 %v3281_v48, %v2220_v53  ;;  %v2234_v20 = vadd.f32 %v2233_v26, %v5475_v0  ;;  %v5762_v53 = vld [vmem:[%s6116_s9 + $0x58] sm:$0xff]  ;;  %2460 = vmatpush.msra.mxu3 %v5752_v35  ;;  %2618 = vmatpush.msrb.mxu2 %v5752_v35 }
 0x86a   :  { %2480 = vmatpush.msra.mxu0 %v5757_v9  ;;  %2500 = vmatpush.msrb.mxu1 %v5762_v53  ;;  %v5776_v26 = vld [vmem:[%s6116_s9 + $0x38] sm:$0xff] }
 0x86b   :  { %v2225_v10 = vsel %vm2224_vm6, %v3281_v48, %v2221_v21  ;;  %3282 = vtanh.f32 %v2234_v20  ;;  %2461 = vmatpush.msra.mxu3 %v5771_v11  ;;  %v5789_v21 = vld [vmem:[%s6116_s9 + $0x18] sm:$0xff]  ;;  %v5794_v20 = vld [vmem:[%s6116_s9 + $0x20] sm:$0xff]  ;;  %2619 = vmatpush.msrb.mxu2 %v5771_v11 }
 0x86c   :  { %v2230_v27 = vsel %vm2227_vm7, %v2229_v52, %v2225_v10  ;;  %2481 = vmatpush.msra.mxu0 %v5776_v26  ;;  %v5799_v52 = vld [vmem:[%s6116_s9 + $0x28] sm:$0xff]  ;;  %2501 = vmatpush.msrb.mxu1 %v5781_v55 }
 0x86d   :  { %v2236_v38 = vsub.f32 1.0, %v2230_v27  ;;  %v2238_v41 = vmul.f32 %v2230_v27, %v5505_v34  ;;  %v5805_v27 = vld [vmem:[%s6116_s9] sm:$0xff]  ;;  %2462 = vmatpush.msra.mxu3 %v5789_v21  ;;  %2620 = vmatpush.msrb.mxu2 %v5789_v21 }
 0x86e   :  { %2482 = vmatpush.msra.mxu0 %v5794_v20  ;;  %2502 = vmatpush.msrb.mxu1 %v5799_v52 }
 0x86f   :  { %2463 = vmatpush.msra.mxu3 %v5805_v27  ;;  %2621 = vmatpush.msrb.mxu2 %v5805_v27 }
 0x871   :  { %v3283_v63 = vpop.eup %3282  ;;  %2626 = vmatpush.msrb.mxu3 %v5528_v58 }
 0x872   :  { %v2237_v62 = vmul.f32 %v3283_v63, %v2236_v38  ;;  %v5810_v38 = vld [vmem:[%s6116_s9 + $0x8] sm:$0xff] }
 0x873   :  { %2483 = vmatpush.msra.mxu0 %v5810_v38  ;;  %2627 = vmatpush.msrb.mxu3 %v5546_v54 }
 0x874   :  { %v5515_v43 = vadd.f32 %v2238_v41, %v2237_v62  ;;  %v5818_v41 = vld [vmem:[%s6116_s9 + $0x10] sm:$0xff] }
 0x875   :  { %2503 = vmatpush.msrb.mxu1 %v5818_v41  ;;  %2628 = vmatpush.msrb.mxu3 %v5565_v23 }
 0x876   :  { %2306 = vmatmul.f32.vlgmr.msrb.gmra.mxu0 %v5515_v43  ;;  %2326 = vmatmul.f32.vlgmr.msra.gmra.mxu1 %v5515_v43 }
 0x877   :  { %2346 = vmatmul.f32.vlgmr.msra.gmra.mxu2 %v5515_v43  ;;  %2646 = vmatpush.msrb.mxu0 %v5533_v39 }
 0x878   :  { %2764 = vmatpush.msra.mxu1 %v5523_v45  ;;  %2784 = vmatpush.msra.mxu2 %v5528_v58 }
 0x879   :  { %2647 = vmatpush.msrb.mxu0 %v5551_v8  ;;  %2629 = vmatpush.msrb.mxu3 %v5584_v7 }
 0x87a   :  { %2765 = vmatpush.msra.mxu1 %v5541_v29  ;;  %2785 = vmatpush.msra.mxu2 %v5546_v54 }
 0x87b   :  { %2648 = vmatpush.msrb.mxu0 %v5570_v44  ;;  %2630 = vmatpush.msrb.mxu3 %v5603_v36 }
 0x87c   :  { %2766 = vmatpush.msra.mxu1 %v5560_v15  ;;  %2786 = vmatpush.msra.mxu2 %v5565_v23 }
 0x87d   :  { %2649 = vmatpush.msrb.mxu0 %v5589_v32  ;;  %2631 = vmatpush.msrb.mxu3 %v5622_v37 }
 0x87e   :  { %2767 = vmatpush.msra.mxu1 %v5579_v56  ;;  %2787 = vmatpush.msra.mxu2 %v5584_v7 }
 0x87f   :  { %2650 = vmatpush.msrb.mxu0 %v5608_v13  ;;  %2632 = vmatpush.msrb.mxu3 %v5641_v24 }
 0x880   :  { %2768 = vmatpush.msra.mxu1 %v5598_v16  ;;  %2788 = vmatpush.msra.mxu2 %v5603_v36 }
 0x881   :  { %2651 = vmatpush.msrb.mxu0 %v5627_v51  ;;  %2633 = vmatpush.msrb.mxu3 %v5660_v2 }
 0x882   :  { %2769 = vmatpush.msra.mxu1 %v5617_v30  ;;  %2789 = vmatpush.msra.mxu2 %v5622_v37 }
 0x883   :  { %2652 = vmatpush.msrb.mxu0 %v5646_v17  ;;  %2634 = vmatpush.msrb.mxu3 %v5679_v47 }
 0x884   :  { %2770 = vmatpush.msra.mxu1 %v5636_v59  ;;  %2790 = vmatpush.msra.mxu2 %v5641_v24 }
 0x885   :  { %2653 = vmatpush.msrb.mxu0 %v5665_v60  ;;  %2635 = vmatpush.msrb.mxu3 %v5700_v22 }
 0x886   :  { %2771 = vmatpush.msra.mxu1 %v5655_v33  ;;  %2791 = vmatpush.msra.mxu2 %v5660_v2 }
 0x887   :  { %2654 = vmatpush.msrb.mxu0 %v5684_v25  ;;  %2636 = vmatpush.msrb.mxu3 %v5719_v42 }
 0x888   :  { %2772 = vmatpush.msra.mxu1 %v5674_v6  ;;  %2792 = vmatpush.msra.mxu2 %v5679_v47 }
 0x889   :  { %2655 = vmatpush.msrb.mxu0 %v5705_v5  ;;  %2637 = vmatpush.msrb.mxu3 %v5738_v14 }
 0x88a   :  { %2773 = vmatpush.msra.mxu1 %v5695_v57  ;;  %2793 = vmatpush.msra.mxu2 %v5700_v22 }
 0x88b   :  { %2656 = vmatpush.msrb.mxu0 %v5727_v61  ;;  %2638 = vmatpush.msrb.mxu3 %v5757_v9 }
 0x88c   :  { %2774 = vmatpush.msra.mxu1 %v5714_v1  ;;  %2794 = vmatpush.msra.mxu2 %v5719_v42 }
 0x88d   :  { %2657 = vmatpush.msrb.mxu0 %v5743_v46  ;;  %2639 = vmatpush.msrb.mxu3 %v5776_v26 }
 0x88e   :  { %2775 = vmatpush.msra.mxu1 %v5733_v28  ;;  %2795 = vmatpush.msra.mxu2 %v5738_v14 }
 0x88f   :  { %2658 = vmatpush.msrb.mxu0 %v5762_v53  ;;  %2640 = vmatpush.msrb.mxu3 %v5794_v20 }
 0x890   :  { %2776 = vmatpush.msra.mxu1 %v5752_v35  ;;  %2796 = vmatpush.msra.mxu2 %v5757_v9 }
 0x891   :  { %2659 = vmatpush.msrb.mxu0 %v5781_v55  ;;  %2641 = vmatpush.msrb.mxu3 %v5810_v38 }
 0x892   :  { %2777 = vmatpush.msra.mxu1 %v5771_v11  ;;  %2797 = vmatpush.msra.mxu2 %v5776_v26 }
 0x893   :  { %2660 = vmatpush.msrb.mxu0 %v5799_v52 }
 0x894   :  { %2778 = vmatpush.msra.mxu1 %v5789_v21  ;;  %2798 = vmatpush.msra.mxu2 %v5794_v20 }
 0x895   :  { %2661 = vmatpush.msrb.mxu0 %v5818_v41 }
 0x896   :  { %2779 = vmatpush.msra.mxu1 %v5805_v27  ;;  %2799 = vmatpush.msra.mxu2 %v5810_v38 }
 0x8f3   :  { %v2307_v4 = vpop.f32.mrf.mxu0  ;;  %v2327_v49 = vpop.f32.mrf.mxu1 }
 0x8f4   :  { %v2350_v40 = vadd.f32 %v2307_v4, %v5466_v18  ;;  %v2370_v19 = vadd.f32 %v2327_v49, %v5463_v12 }
 0x8f6   :  { %v3158_v31 = vmul.f32 -1.442695, %v2350_v40  ;;  %v3159_v48 = vmul.f32 -1.442695, %v2370_v19 }
 0x8f8   :  { %3284 = vpow2.f32 %v3158_v31 }
 0x8f9   :  { %3286 = vpow2.f32 %v3159_v48 }
 0x8fe   :  { %v3285_v10 = vpop.eup %3284 }
 0x8ff   :  { %v3287_v63 = vpop.eup %3286  ;;  %v2354_v62 = vadd.f32 1.0, %v3285_v10 }
 0x900   :  { %v5820_v4 = vadd.f32 1.0, %v3287_v63 }
 0x901   :  { %3288 = vrcp.f32 %v2354_v62  ;;  %v2366_v63 = vand.u32 2147483648, %v2354_v62  ;;  %v2364_v3 = vand.u32 2147483647, %v2354_v62  ;;  %vm2360_vm9 = vweird.f32 %v2354_v62 }
 0x902   :  { %3290 = vrcp.f32 %v5820_v4  ;;  %vm2380_vm13 = vweird.f32 %v5820_v4 }
 0x903   :  { %vm2365_vm11 = vcmp.eq.f32.partialorder %v2364_v3, 8.507059e+37  ;;  %v2384_v3 = vand.u32 2147483647, %v5820_v4 }
 0x905   :  { %vm2385_vm15 = vcmp.eq.f32.partialorder %v2384_v3, 8.507059e+37 }
 0x907   :  { %v3289_v49 = vpop.eup %3288 }
 0x908   :  { %v5839_v40 = vpop.eup %3290  ;;  %v2356_v19 = vmul.f32 %v3289_v49, %v2354_v62  ;;  %vm2361_vm8 = vweird.f32 %v3289_v49 }
 0x909   :  { %v2376_v31 = vmul.f32 %v5839_v40, %v5820_v4  ;;  %vm2362_vm10 = vmor %vm2360_vm9, %vm2361_vm8  ;;  %vm2381_vm12 = vweird.f32 %v5839_v40 }
 0x90a   :  { %v2357_v48 = vsub.f32 1.0, %v2356_v19  ;;  %v2347_v19 = vpop.f32.mrf.mxu2  ;;  %vm2382_vm14 = vmor %vm2380_vm13, %vm2381_vm12 }
 0x90b   :  { %v2377_v10 = vsub.f32 1.0, %v2376_v31 }
 0x90c   :  { %v2358_v34 = vmul.f32 %v3289_v49, %v2357_v48  ;;  %v2367_v48 = vor.u32 1.1754944e-38, %v2366_v63  ;;  %v2386_v63 = vand.u32 2147483648, %v5820_v4 }
 0x90d   :  { %v2378_v18 = vmul.f32 %v5839_v40, %v2377_v10  ;;  %v2390_v10 = vadd.f32 %v5472_v50, %v2347_v19 }
 0x90e   :  { %v2359_v31 = vadd.f32 %v3289_v49, %v2358_v34 }
 0x90f   :  { %v2379_v34 = vadd.f32 %v5839_v40, %v2378_v18 }
 0x910   :  { %v2363_v12 = vsel %vm2362_vm10, %v3289_v49, %v2359_v31  ;;  %v2387_v49 = vor.u32 1.1754944e-38, %v2386_v63 }
 0x911   :  { %v2368_v62 = vsel %vm2365_vm11, %v2367_v48, %v2363_v12  ;;  %v2383_v18 = vsel %vm2382_vm14, %v5839_v40, %v2379_v34 }
 0x912   :  { %v2391_v37 = vmul.f32 %v2390_v10, %v2368_v62 }
 0x914   :  { %v2392_v12 = vadd.f32 %v2391_v37, %v5475_v0  ;;  %v2388_v37 = vsel %vm2385_vm15, %v2387_v49, %v2383_v18 }
 0x915   :  { %v2394_v4 = vsub.f32 1.0, %v2388_v37  ;;  %v2396_v31 = vmul.f32 %v2388_v37, %v5515_v43 }
 0x916   :  { %3292 = vtanh.f32 %v2392_v12 }
 0x91c   :  { %v3293_v40 = vpop.eup %3292 }
 0x91d   :  { %v2395_v19 = vmul.f32 %v3293_v40, %v2394_v4  ;;  %v3045_v40 = vld [vmem:[%s6124_s12 + $0x28] sm:$0xff] }
 0x91f   :  { %v5899_v48 = vadd.f32 %v2396_v31, %v2395_v19  ;;  %v3044_v31 = vld [vmem:[%s6124_s12 + $0x20] sm:$0xff] }
 0x921   :  { %2464 = vmatmul.f32.vlgmr.msra.gmra.mxu3 %v5899_v48  ;;  %2484 = vmatmul.f32.vlgmr.msra.gmra.mxu0 %v5899_v48 }
 0x922   :  { %2504 = vmatmul.f32.vlgmr.msrb.gmra.mxu1 %v5899_v48  ;;  %2804 = vmatpush.msra.mxu3 %v5533_v39 }
 0x923   :  { %2922 = vmatpush.msra.mxu0 %v5523_v45  ;;  %2942 = vmatpush.msrb.mxu1 %v5528_v58  ;;  %v6159_v45 = vld [vmem:[#allocation8_spill] sm:$0xff] }
 0x924   :  { %2805 = vmatpush.msra.mxu3 %v5551_v8 }
 0x925   :  { %2923 = vmatpush.msra.mxu0 %v5541_v29  ;;  %2943 = vmatpush.msrb.mxu1 %v5546_v54  ;;  %v6160_v29 = vld [vmem:[#allocation6_spill] sm:$0xff] }
 0x926   :  { %2806 = vmatpush.msra.mxu3 %v5570_v44 }
 0x927   :  { %2924 = vmatpush.msra.mxu0 %v5560_v15  ;;  %2944 = vmatpush.msrb.mxu1 %v5565_v23 }
 0x928   :  { %2807 = vmatpush.msra.mxu3 %v5589_v32 }
 0x929   :  { %2925 = vmatpush.msra.mxu0 %v5579_v56  ;;  %2945 = vmatpush.msrb.mxu1 %v5584_v7  ;;  %v6161_v56 = vld [vmem:[#allocation4_spill] sm:$0xff] }
 0x92a   :  { %2808 = vmatpush.msra.mxu3 %v5608_v13 }
 0x92b   :  { %2926 = vmatpush.msra.mxu0 %v5598_v16  ;;  %2946 = vmatpush.msrb.mxu1 %v5603_v36 }
 0x92c   :  { %2809 = vmatpush.msra.mxu3 %v5627_v51 }
 0x92d   :  { %2927 = vmatpush.msra.mxu0 %v5617_v30  ;;  %2947 = vmatpush.msrb.mxu1 %v6159_v45 }
 0x92e   :  { %2810 = vmatpush.msra.mxu3 %v5646_v17 }
 0x92f   :  { %2928 = vmatpush.msra.mxu0 %v5636_v59  ;;  %2948 = vmatpush.msrb.mxu1 %v5641_v24 }
 0x930   :  { %2811 = vmatpush.msra.mxu3 %v5665_v60 }
 0x931   :  { %2929 = vmatpush.msra.mxu0 %v5655_v33  ;;  %2949 = vmatpush.msrb.mxu1 %v5660_v2 }
 0x932   :  { %2812 = vmatpush.msra.mxu3 %v5684_v25 }
 0x933   :  { %2930 = vmatpush.msra.mxu0 %v5674_v6  ;;  %2950 = vmatpush.msrb.mxu1 %v5679_v47 }
 0x934   :  { %2813 = vmatpush.msra.mxu3 %v5705_v5 }
 0x935   :  { %2931 = vmatpush.msra.mxu0 %v5695_v57  ;;  %2951 = vmatpush.msrb.mxu1 %v5700_v22 }
 0x936   :  { %2814 = vmatpush.msra.mxu3 %v5727_v61 }
 0x937   :  { %2932 = vmatpush.msra.mxu0 %v5714_v1  ;;  %2952 = vmatpush.msrb.mxu1 %v5719_v42 }
 0x938   :  { %2815 = vmatpush.msra.mxu3 %v5743_v46 }
 0x939   :  { %2933 = vmatpush.msra.mxu0 %v5733_v28  ;;  %2953 = vmatpush.msrb.mxu1 %v5738_v14 }
 0x93a   :  { %2816 = vmatpush.msra.mxu3 %v5762_v53 }
 0x93b   :  { %2934 = vmatpush.msra.mxu0 %v5752_v35  ;;  %2954 = vmatpush.msrb.mxu1 %v5757_v9 }
 0x93c   :  { %2817 = vmatpush.msra.mxu3 %v5781_v55 }
 0x93d   :  { %2935 = vmatpush.msra.mxu0 %v5771_v11  ;;  %2955 = vmatpush.msrb.mxu1 %v5776_v26 }
 0x93e   :  { %2818 = vmatpush.msra.mxu3 %v5799_v52 }
 0x93f   :  { %2936 = vmatpush.msra.mxu0 %v5789_v21  ;;  %2956 = vmatpush.msrb.mxu1 %v5794_v20 }
 0x940   :  { %2819 = vmatpush.msra.mxu3 %v5818_v41 }
 0x941   :  { %2937 = vmatpush.msra.mxu0 %v5805_v27  ;;  %2957 = vmatpush.msrb.mxu1 %v5810_v38 }
 0x99e   :  { %v2485_v58 = vpop.f32.mrf.mxu0 }
 0x99f   :  { %v2528_v54 = vadd.f32 %v2485_v58, %v6160_v29  ;;  %v2505_v35 = vpop.f32.mrf.mxu1 }
 0x9a0   :  { %v2548_v26 = vadd.f32 %v5472_v50, %v2505_v35 }
 0x9a1   :  { %v3161_v15 = vmul.f32 -1.442695, %v2528_v54 }
 0x9a3   :  { %3294 = vpow2.f32 %v3161_v15  ;;  %v3043_v15 = vld [vmem:[%s6124_s12 + $0x18] sm:$0xff] }
 0x9a4   :  { %v2465_v23 = vpop.f32.mrf.mxu3 }
 0x9a5   :  { %v2508_v7 = vadd.f32 %v2465_v23, %v6161_v56  ;;  %v3042_v23 = vld [vmem:[%s6124_s12 + $0x10] sm:$0xff] }
 0x9a7   :  { %v3160_v16 = vmul.f32 -1.442695, %v2508_v7  ;;  %v3041_v7 = vld [vmem:[%s6124_s12 + $0x8] sm:$0xff] }
 0x9a9   :  { %v3295_v36 = vpop.eup %3294  ;;  %3296 = vpow2.f32 %v3160_v16  ;;  %v3040_v16 = vld [vmem:[%s6124_s12] sm:$0xff] }
 0x9aa   :  { %v2532_v30 = vadd.f32 1.0, %v3295_v36 }
 0x9ac   :  { %3298 = vrcp.f32 %v2532_v30  ;;  %v2544_v38 = vand.u32 2147483648, %v2532_v30  ;;  %vm2538_vm5 = vweird.f32 %v2532_v30  ;;  %v2542_v34 = vand.u32 2147483647, %v2532_v30 }
 0x9ae   :  { %v2545_v3 = vor.u32 1.1754944e-38, %v2544_v38  ;;  %vm2543_vm7 = vcmp.eq.f32.partialorder %v2542_v34, 8.507059e+37 }
 0x9af   :  { %v3297_v59 = vpop.eup %3296 }
 0x9b0   :  { %v2512_v24 = vadd.f32 1.0, %v3297_v59 }
 0x9b2   :  { %3300 = vrcp.f32 %v2512_v24  ;;  %v3299_v33 = vpop.eup %3298  ;;  %v2524_v1 = vand.u32 2147483648, %v2512_v24  ;;  %v2522_v28 = vand.u32 2147483647, %v2512_v24  ;;  %vm2518_vm1 = vweird.f32 %v2512_v24 }
 0x9b3   :  { %v2534_v2 = vmul.f32 %v3299_v33, %v2532_v30  ;;  %vm2539_vm4 = vweird.f32 %v3299_v33 }
 0x9b4   :  { %v2525_v11 = vor.u32 1.1754944e-38, %v2524_v1  ;;  %vm2523_vm3 = vcmp.eq.f32.partialorder %v2522_v28, 8.507059e+37  ;;  %vm2540_vm6 = vmor %vm2538_vm5, %vm2539_vm4 }
 0x9b5   :  { %v2535_v57 = vsub.f32 1.0, %v2534_v2 }
 0x9b7   :  { %v2536_v14 = vmul.f32 %v3299_v33, %v2535_v57 }
 0x9b8   :  { %v3301_v6 = vpop.eup %3300 }
 0x9b9   :  { %v2514_v47 = vmul.f32 %v3301_v6, %v2512_v24  ;;  %vm2519_vm0 = vweird.f32 %v3301_v6  ;;  %v2537_v20 = vadd.f32 %v3299_v33, %v2536_v14  ;;  %v6039_v14 = vld [vmem:[%s6121_s11] ss:$0 sm:$0xff] }
 0x9ba   :  { %vm2520_vm2 = vmor %vm2518_vm1, %vm2519_vm0 }
 0x9bb   :  { %v2515_v22 = vsub.f32 1.0, %v2514_v47  ;;  %v2541_v63 = vsel %vm2540_vm6, %v3299_v33, %v2537_v20 }
 0x9bc   :  { %v2546_v12 = vsel %vm2543_vm7, %v2545_v3, %v2541_v63 }
 0x9bd   :  { %v2516_v42 = vmul.f32 %v3301_v6, %v2515_v22  ;;  %v2552_v18 = vsub.f32 1.0, %v2546_v12  ;;  %v2554_v37 = vmul.f32 %v2546_v12, %v5899_v48 }
 0x9bf   :  { %v2517_v9 = vadd.f32 %v3301_v6, %v2516_v42 }
 0x9c1   :  { %v2521_v21 = vsel %vm2520_vm2, %v3301_v6, %v2517_v9 }
 0x9c2   :  { %v2526_v27 = vsel %vm2523_vm3, %v2525_v11, %v2521_v21 }
 0x9c3   :  { %v2549_v10 = vmul.f32 %v2548_v26, %v2526_v27 }
 0x9c5   :  { %v2550_v62 = vadd.f32 %v2549_v10, %v5475_v0 }
 0x9c7   :  { %3302 = vtanh.f32 %v2550_v62 }
 0x9cd   :  { %v3303_v49 = vpop.eup %3302 }
 0x9ce   :  { %v2553_v50 = vmul.f32 %v3303_v49, %v2552_v18 }
 0x9d0   :  { %v5965_v4 = vadd.f32 %v2554_v37, %v2553_v50  ;;  %v6162_v50 = vld [vmem:[#allocation5_spill] sm:$0xff]  ;;  %v6163_v37 = vld [vmem:[#allocation7_spill] sm:$0xff] }
 0x9d2   :  { %2622 = vmatmul.f32.vlgmr.msrb.gmra.mxu2 %v5965_v4  ;;  %2642 = vmatmul.f32.vlgmr.msrb.gmra.mxu3 %v5965_v4 }
 0x9d3   :  { %2662 = vmatmul.f32.vlgmr.msrb.gmra.mxu0 %v5965_v4  ;;  %2962 = vmatpush.msrb.mxu2 %v5533_v39  ;;  %v3055_v39 = vld [vmem:[%s6124_s12 + $0x78] sm:$0xff] }
 0x9d4   :  { %3060 = vmatpush.msrb.mxu3 %v3055_v39 }
 0x9d5   :  { %2963 = vmatpush.msrb.mxu2 %v5551_v8  ;;  %v3054_v8 = vld [vmem:[%s6124_s12 + $0x70] sm:$0xff] }
 0x9d6   :  { %3061 = vmatpush.msrb.mxu3 %v3054_v8 }
 0x9d7   :  { %2964 = vmatpush.msrb.mxu2 %v5570_v44  ;;  %v3053_v44 = vld [vmem:[%s6124_s12 + $0x68] sm:$0xff] }
 0x9d8   :  { %3062 = vmatpush.msrb.mxu3 %v3053_v44 }
 0x9d9   :  { %2965 = vmatpush.msrb.mxu2 %v5589_v32  ;;  %v3052_v32 = vld [vmem:[%s6124_s12 + $0x60] sm:$0xff] }
 0x9da   :  { %3063 = vmatpush.msrb.mxu3 %v3052_v32 }
 0x9db   :  { %2966 = vmatpush.msrb.mxu2 %v5608_v13  ;;  %v3051_v13 = vld [vmem:[%s6124_s12 + $0x58] sm:$0xff] }
 0x9dc   :  { %3064 = vmatpush.msrb.mxu3 %v3051_v13 }
 0x9dd   :  { %2967 = vmatpush.msrb.mxu2 %v5627_v51  ;;  %v3050_v51 = vld [vmem:[%s6124_s12 + $0x50] sm:$0xff] }
 0x9de   :  { %3065 = vmatpush.msrb.mxu3 %v3050_v51 }
 0x9df   :  { %2968 = vmatpush.msrb.mxu2 %v5646_v17 }
 0x9e1   :  { %2969 = vmatpush.msrb.mxu2 %v5665_v60 }
 0x9e3   :  { %2970 = vmatpush.msrb.mxu2 %v5684_v25 }
 0x9e5   :  { %2971 = vmatpush.msrb.mxu2 %v5705_v5 }
 0x9e7   :  { %2972 = vmatpush.msrb.mxu2 %v5727_v61  ;;  %v3049_v61 = vld [vmem:[%s6124_s12 + $0x48] sm:$0xff] }
 0x9e8   :  { %3066 = vmatpush.msrb.mxu3 %v3049_v61 }
 0x9e9   :  { %2973 = vmatpush.msrb.mxu2 %v5743_v46 }
 0x9eb   :  { %2974 = vmatpush.msrb.mxu2 %v5762_v53 }
 0x9ed   :  { %2975 = vmatpush.msrb.mxu2 %v5781_v55  ;;  %v3048_v55 = vld [vmem:[%s6124_s12 + $0x40] sm:$0xff] }
 0x9ee   :  { %3067 = vmatpush.msrb.mxu3 %v3048_v55 }
 0x9ef   :  { %2976 = vmatpush.msrb.mxu2 %v5799_v52  ;;  %v3047_v52 = vld [vmem:[%s6124_s12 + $0x38] sm:$0xff] }
 0x9f0   :  { %3068 = vmatpush.msrb.mxu3 %v3047_v52 }
 0x9f1   :  { %2977 = vmatpush.msrb.mxu2 %v5818_v41  ;;  %v3046_v41 = vld [vmem:[%s6124_s12 + $0x30] sm:$0xff] }
 0x9f2   :  { %3069 = vmatpush.msrb.mxu3 %v3046_v41 }
 0x9f4   :  { %3070 = vmatpush.msrb.mxu3 %v3045_v40 }
 0x9f6   :  { %3071 = vmatpush.msrb.mxu3 %v3044_v31 }
 0x9f8   :  { %3072 = vmatpush.msrb.mxu3 %v3043_v15 }
 0x9fa   :  { %3073 = vmatpush.msrb.mxu3 %v3042_v23 }
 0x9fc   :  { %3074 = vmatpush.msrb.mxu3 %v3041_v7 }
 0x9fe   :  { %3075 = vmatpush.msrb.mxu3 %v3040_v16 }
 0xa50   :  { %v2663_v22 = vpop.f32.mrf.mxu0 }
 0xa51   :  { %v2706_v35 = vadd.f32 %v6039_v14, %v2663_v22 }
 0xa55   :  { %v2623_v17 = vpop.f32.mrf.mxu2  ;;  %v2643_v60 = vpop.f32.mrf.mxu3 }
 0xa56   :  { %v2666_v25 = vadd.f32 %v2623_v17, %v6161_v56  ;;  %v2686_v5 = vadd.f32 %v2643_v60, %v6160_v29 }
 0xa58   :  { %v3162_v46 = vmul.f32 -1.442695, %v2666_v25  ;;  %v3163_v53 = vmul.f32 -1.442695, %v2686_v5 }
 0xa5a   :  { %3304 = vpow2.f32 %v3162_v46 }
 0xa5b   :  { %3306 = vpow2.f32 %v3163_v53 }
 0xa60   :  { %v3305_v19 = vpop.eup %3304 }
 0xa61   :  { %v3307_v45 = vpop.eup %3306  ;;  %v2670_v58 = vadd.f32 1.0, %v3305_v19 }
 0xa62   :  { %v2690_v54 = vadd.f32 1.0, %v3307_v45 }
 0xa63   :  { %3308 = vrcp.f32 %v2670_v58  ;;  %v2682_v2 = vand.u32 2147483648, %v2670_v58  ;;  %v2680_v57 = vand.u32 2147483647, %v2670_v58  ;;  %vm2676_vm9 = vweird.f32 %v2670_v58 }
 0xa64   :  { %3310 = vrcp.f32 %v2690_v54  ;;  %v2702_v20 = vand.u32 2147483648, %v2690_v54  ;;  %vm2696_vm13 = vweird.f32 %v2690_v54  ;;  %v2700_v27 = vand.u32 2147483647, %v2690_v54 }
 0xa65   :  { %v2683_v28 = vor.u32 1.1754944e-38, %v2682_v2  ;;  %vm2681_vm11 = vcmp.eq.f32.partialorder %v2680_v57, 8.507059e+37 }
 0xa66   :  { %v2703_v34 = vor.u32 1.1754944e-38, %v2702_v20  ;;  %vm2701_vm15 = vcmp.eq.f32.partialorder %v2700_v27, 8.507059e+37 }
 0xa69   :  { %v3309_v36 = vpop.eup %3308 }
 0xa6a   :  { %v3311_v30 = vpop.eup %3310  ;;  %v2672_v59 = vmul.f32 %v3309_v36, %v2670_v58  ;;  %vm2677_vm8 = vweird.f32 %v3309_v36 }
 0xa6b   :  { %v2692_v24 = vmul.f32 %v3311_v30, %v2690_v54  ;;  %vm2678_vm10 = vmor %vm2676_vm9, %vm2677_vm8  ;;  %vm2697_vm12 = vweird.f32 %v3311_v30 }
 0xa6c   :  { %v2673_v33 = vsub.f32 1.0, %v2672_v59  ;;  %vm2698_vm14 = vmor %vm2696_vm13, %vm2697_vm12 }
 0xa6d   :  { %v2693_v6 = vsub.f32 1.0, %v2692_v24 }
 0xa6e   :  { %v2674_v47 = vmul.f32 %v3309_v36, %v2673_v33 }
 0xa6f   :  { %v2694_v1 = vmul.f32 %v3311_v30, %v2693_v6 }
 0xa70   :  { %v2675_v42 = vadd.f32 %v3309_v36, %v2674_v47 }
 0xa71   :  { %v2695_v26 = vadd.f32 %v3311_v30, %v2694_v1 }
 0xa72   :  { %v2679_v9 = vsel %vm2678_vm10, %v3309_v36, %v2675_v42 }
 0xa73   :  { %v2684_v11 = vsel %vm2681_vm11, %v2683_v28, %v2679_v9  ;;  %v2699_v10 = vsel %vm2698_vm14, %v3311_v30, %v2695_v26 }
 0xa74   :  { %v2707_v21 = vmul.f32 %v2706_v35, %v2684_v11  ;;  %v2704_v62 = vsel %vm2701_vm15, %v2703_v34, %v2699_v10 }
 0xa75   :  { %v2710_v63 = vsub.f32 1.0, %v2704_v62  ;;  %v2712_v18 = vmul.f32 %v2704_v62, %v5965_v4 }
 0xa76   :  { %v2708_v38 = vadd.f32 %v2707_v21, %v5475_v0 }
 0xa78   :  { %3312 = vtanh.f32 %v2708_v38 }
 0xa7e   :  { %v3313_v3 = vpop.eup %3312 }
 0xa7f   :  { %v2711_v12 = vmul.f32 %v3313_v3, %v2710_v63 }
 0xa81   :  { %v6044_v49 = vadd.f32 %v2712_v18, %v2711_v12 }
 0xa83   :  { %2780 = vmatmul.f32.vlgmr.msra.gmra.mxu1 %v6044_v49  ;;  %2800 = vmatmul.f32.vlgmr.msra.gmra.mxu2 %v6044_v49 }
 0xa84   :  { %2820 = vmatmul.f32.vlgmr.msra.gmra.mxu3 %v6044_v49 }
 0xa8c   :  { %3076 = vmatmul.f32.vlgmr.msrb.gmra.mxu3 %v6162_v50 }
 0xa94   :  { %3079 = vmatmul.f32.gmra.mxu3 %v6163_v37 }
 0xa9c   :  { %3082 = vmatmul.f32.gmra.mxu3 %v5515_v43  ;;  %v6060_v43 = vld [vmem:[%s6125_s13] ss:$0 sm:$0xff] }
 0xaa4   :  { %3085 = vmatmul.f32.gmra.mxu3 %v5899_v48 }
 0xaac   :  { %3088 = vmatmul.f32.gmra.mxu3 %v5965_v4 }
 0xab4   :  { %3091 = vmatmul.f32.gmra.mxu3 %v6044_v49 }
 0xb00   :  { %v2781_v39 = vpop.f32.mrf.mxu1 }
 0xb01   :  { %v2824_v8 = vadd.f32 %v2781_v39, %v6161_v56 }
 0xb03   :  { %v3164_v44 = vmul.f32 -1.442695, %v2824_v8 }
 0xb05   :  { %3314 = vpow2.f32 %v3164_v44 }
 0xb06   :  { %v2801_v32 = vpop.f32.mrf.mxu2 }
 0xb07   :  { %v2844_v13 = vadd.f32 %v2801_v32, %v6160_v29  ;;  %v2821_v51 = vpop.f32.mrf.mxu3 }
 0xb08   :  { %v2864_v16 = vadd.f32 %v6039_v14, %v2821_v51 }
 0xb09   :  { %v3165_v17 = vmul.f32 -1.442695, %v2844_v13 }
 0xb0b   :  { %v3315_v60 = vpop.eup %3314  ;;  %3316 = vpow2.f32 %v3165_v17 }
 0xb0c   :  { %v2828_v25 = vadd.f32 1.0, %v3315_v60 }
 0xb0e   :  { %3318 = vrcp.f32 %v2828_v25  ;;  %v2840_v41 = vand.u32 2147483648, %v2828_v25  ;;  %v2838_v31 = vand.u32 2147483647, %v2828_v25  ;;  %vm2834_vm1 = vweird.f32 %v2828_v25 }
 0xb0f   :  { %v3077_v48 = vpop.f32.mrf.mxu3 }
 0xb10   :  { %v3078_v4 = vadd.f32 %v6060_v43, %v3077_v48  ;;  %v2841_v15 = vor.u32 1.1754944e-38, %v2840_v41  ;;  %vm2839_vm3 = vcmp.eq.f32.partialorder %v2838_v31, 8.507059e+37 }
 0xb11   :  { %v3317_v5 = vpop.eup %3316 }
 0xb12   :  { %v2848_v61 = vadd.f32 1.0, %v3317_v5  ;;  %3101 = vst [vmem:[%s6126_s18] sm:$0xff] %v3078_v4 }
 0xb14   :  { %v3319_v46 = vpop.eup %3318  ;;  %3320 = vrcp.f32 %v2848_v61  ;;  %v2860_v59 = vand.u32 2147483648, %v2848_v61  ;;  %v2858_v2 = vand.u32 2147483647, %v2848_v61  ;;  %vm2854_vm5 = vweird.f32 %v2848_v61 }
 0xb15   :  { %v2830_v53 = vmul.f32 %v3319_v46, %v2828_v25  ;;  %vm2835_vm0 = vweird.f32 %v3319_v46 }
 0xb16   :  { %vm2836_vm2 = vmor %vm2834_vm1, %vm2835_vm0  ;;  %v2861_v22 = vor.u32 1.1754944e-38, %v2860_v59  ;;  %vm2859_vm7 = vcmp.eq.f32.partialorder %v2858_v2, 8.507059e+37 }
 0xb17   :  { %v2831_v55 = vsub.f32 1.0, %v2830_v53  ;;  %v3080_v52 = vpop.f32.mrf.mxu3 }
 0xb18   :  { %v3081_v40 = vadd.f32 %v6060_v43, %v3080_v52 }
 0xb19   :  { %v2832_v19 = vmul.f32 %v3319_v46, %v2831_v55 }
 0xb1a   :  { %v3321_v45 = vpop.eup %3320  ;;  %3102 = vst [vmem:[%s6126_s18 + $0x8] sm:$0xff] %v3081_v40 }
 0xb1b   :  { %v2850_v58 = vmul.f32 %v3321_v45, %v2848_v61  ;;  %v2833_v54 = vadd.f32 %v3319_v46, %v2832_v19  ;;  %vm2855_vm4 = vweird.f32 %v3321_v45 }
 0xb1c   :  { %vm2856_vm6 = vmor %vm2854_vm5, %vm2855_vm4 }
 0xb1d   :  { %v2851_v23 = vsub.f32 1.0, %v2850_v58  ;;  %v2837_v7 = vsel %vm2836_vm2, %v3319_v46, %v2833_v54 }
 0xb1e   :  { %v2842_v36 = vsel %vm2839_vm3, %v2841_v15, %v2837_v7 }
 0xb1f   :  { %v2852_v30 = vmul.f32 %v3321_v45, %v2851_v23  ;;  %v2865_v24 = vmul.f32 %v2864_v16, %v2842_v36  ;;  %v3083_v33 = vpop.f32.mrf.mxu3 }
 0xb20   :  { %v3084_v6 = vadd.f32 %v6060_v43, %v3083_v33 }
 0xb21   :  { %v2853_v47 = vadd.f32 %v3321_v45, %v2852_v30  ;;  %v2866_v57 = vadd.f32 %v2865_v24, %v5475_v0 }
 0xb22   :  { %3103 = vst [vmem:[%s6126_s18 + $0x10] sm:$0xff] %v3084_v6 }
 0xb23   :  { %v2857_v1 = vsel %vm2856_vm6, %v3321_v45, %v2853_v47  ;;  %3322 = vtanh.f32 %v2866_v57 }
 0xb24   :  { %v2862_v42 = vsel %vm2859_vm7, %v2861_v22, %v2857_v1 }
 0xb25   :  { %v2868_v35 = vsub.f32 1.0, %v2862_v42  ;;  %v2870_v21 = vmul.f32 %v2862_v42, %v6044_v49 }
 0xb27   :  { %v3086_v28 = vpop.f32.mrf.mxu3 }
 0xb28   :  { %v3087_v9 = vadd.f32 %v6060_v43, %v3086_v28 }
 0xb29   :  { %v3323_v11 = vpop.eup %3322 }
 0xb2a   :  { %v2869_v26 = vmul.f32 %v3323_v11, %v2868_v35  ;;  %3104 = vst [vmem:[%s6126_s18 + $0x18] sm:$0xff] %v3087_v9 }
 0xb2c   :  { %v6081_v20 = vadd.f32 %v2870_v21, %v2869_v26 }
 0xb2e   :  { %2938 = vmatmul.f32.vlgmr.msra.gmra.mxu0 %v6081_v20  ;;  %2958 = vmatmul.f32.vlgmr.msrb.gmra.mxu1 %v6081_v20 }
 0xb2f   :  { %2978 = vmatmul.f32.vlgmr.msrb.gmra.mxu2 %v6081_v20  ;;  %v3089_v27 = vpop.f32.mrf.mxu3  ;;  %3094 = vmatmul.f32.gmra.mxu3 %v6081_v20 }
 0xb30   :  { %v3090_v38 = vadd.f32 %v6060_v43, %v3089_v27 }
 0xb32   :  { %3105 = vst [vmem:[%s6126_s18 + $0x20] sm:$0xff] %v3090_v38 }
 0xb37   :  { %v3092_v10 = vpop.f32.mrf.mxu3 }
 0xb38   :  { %v3093_v34 = vadd.f32 %v6060_v43, %v3092_v10 }
 0xb3a   :  { %3106 = vst [vmem:[%s6126_s18 + $0x28] sm:$0xff] %v3093_v34 }
 0xbab   :  { %v2939_v62 = vpop.f32.mrf.mxu0  ;;  %v2959_v63 = vpop.f32.mrf.mxu1 }
 0xbac   :  { %v2982_v3 = vadd.f32 %v2939_v62, %v6161_v56  ;;  %v3002_v12 = vadd.f32 %v2959_v63, %v6160_v29 }
 0xbae   :  { %v3166_v18 = vmul.f32 -1.442695, %v2982_v3  ;;  %v3167_v49 = vmul.f32 -1.442695, %v3002_v12 }
 0xbb0   :  { %3324 = vpow2.f32 %v3166_v18 }
 0xbb1   :  { %3326 = vpow2.f32 %v3167_v49 }
 0xbb2   :  { %v3095_v50 = vpop.f32.mrf.mxu3  ;;  %v2979_v5 = vpop.f32.mrf.mxu2 }
 0xbb3   :  { %v3096_v37 = vadd.f32 %v6060_v43, %v3095_v50  ;;  %v3022_v52 = vadd.f32 %v6039_v14, %v2979_v5 }
 0xbb5   :  { %3107 = vst [vmem:[%s6126_s18 + $0x30] sm:$0xff] %v3096_v37 }
 0xbb6   :  { %v3325_v39 = vpop.eup %3324 }
 0xbb7   :  { %v3327_v8 = vpop.eup %3326  ;;  %v2986_v44 = vadd.f32 1.0, %v3325_v39 }
 0xbb8   :  { %v3006_v32 = vadd.f32 1.0, %v3327_v8 }
 0xbb9   :  { %3328 = vrcp.f32 %v2986_v44  ;;  %v2998_v60 = vand.u32 2147483648, %v2986_v44  ;;  %v2996_v4 = vand.u32 2147483647, %v2986_v44  ;;  %vm2992_vm9 = vweird.f32 %v2986_v44 }
 0xbba   :  { %3330 = vrcp.f32 %v3006_v32  ;;  %v3018_v31 = vand.u32 2147483648, %v3006_v32  ;;  %vm3012_vm13 = vweird.f32 %v3006_v32  ;;  %v3016_v45 = vand.u32 2147483647, %v3006_v32 }
 0xbbb   :  { %v2999_v53 = vor.u32 1.1754944e-38, %v2998_v60  ;;  %vm2997_vm11 = vcmp.eq.f32.partialorder %v2996_v4, 8.507059e+37 }
 0xbbc   :  { %v3019_v15 = vor.u32 1.1754944e-38, %v3018_v31  ;;  %vm3017_vm15 = vcmp.eq.f32.partialorder %v3016_v45, 8.507059e+37 }
 0xbbf   :  { %v3329_v56 = vpop.eup %3328 }
 0xbc0   :  { %v3331_v13 = vpop.eup %3330  ;;  %v2988_v29 = vmul.f32 %v3329_v56, %v2986_v44  ;;  %vm2993_vm8 = vweird.f32 %v3329_v56 }
 0xbc1   :  { %v3008_v51 = vmul.f32 %v3331_v13, %v3006_v32  ;;  %vm2994_vm10 = vmor %vm2992_vm9, %vm2993_vm8  ;;  %vm3013_vm12 = vweird.f32 %v3331_v13 }
 0xbc2   :  { %v2989_v17 = vsub.f32 1.0, %v2988_v29  ;;  %vm3014_vm14 = vmor %vm3012_vm13, %vm3013_vm12 }
 0xbc3   :  { %v3009_v25 = vsub.f32 1.0, %v3008_v51 }
 0xbc4   :  { %v2990_v48 = vmul.f32 %v3329_v56, %v2989_v17 }
 0xbc5   :  { %v3010_v61 = vmul.f32 %v3331_v13, %v3009_v25 }
 0xbc6   :  { %v2991_v46 = vadd.f32 %v3329_v56, %v2990_v48 }
 0xbc7   :  { %v3011_v40 = vadd.f32 %v3331_v13, %v3010_v61 }
 0xbc8   :  { %v2995_v55 = vsel %vm2994_vm10, %v3329_v56, %v2991_v46 }
 0xbc9   :  { %v3000_v41 = vsel %vm2997_vm11, %v2999_v53, %v2995_v55  ;;  %v3015_v54 = vsel %vm3014_vm14, %v3331_v13, %v3011_v40 }
 0xbca   :  { %v3023_v19 = vmul.f32 %v3022_v52, %v3000_v41  ;;  %v3020_v23 = vsel %vm3017_vm15, %v3019_v15, %v3015_v54 }
 0xbcb   :  { %v3026_v7 = vsub.f32 1.0, %v3020_v23  ;;  %v3028_v14 = vmul.f32 %v3020_v23, %v6081_v20 }
 0xbcc   :  { %v3024_v58 = vadd.f32 %v3023_v19, %v5475_v0 }
 0xbce   :  { %3332 = vtanh.f32 %v3024_v58 }
 0xbd4   :  { %v3333_v16 = vpop.eup %3332 }
 0xbd5   :  { %v3027_v36 = vmul.f32 %v3333_v16, %v3026_v7 }
 0xbd7   :  { %v3029_v30 = vadd.f32 %v3028_v14, %v3027_v36 }
 0xbd9   :  { %3097 = vmatmul.f32.gmra.mxu3 %v3029_v30 }
 0xc5c   :  { %v3098_v59 = vpop.f32.mrf.mxu3 }
 0xc5d   :  { %v3099_v24 = vadd.f32 %v6060_v43, %v3098_v59 }
 0xc5f   :  { %3108 = vst [vmem:[%s6126_s18 + $0x38] sm:$0xff] %v3099_v24 }

</bundles_post_ra>
